<compile_context>
chip_gen: v7x
topology: tpu7x:2x2x1
jax: 0.10.0
libtpu: 0.0.40
codegen_flags: <defaults>
</compile_context>

<pallas_src>
import functools

import jax
import jax.numpy as jnp
from jax import lax
from jax.experimental import pallas as pl
from jax.experimental.pallas import tpu as pltpu


def _deform_conv_add_relu6_kernel(x_ref, coord_ref, w_ref, x2_ref, out_ref,
                                  col_ref, *, Hp, Wp, KT, Cin_pad):
    """One grid step = one batch element (channels-on-sublanes layout).

    x_ref    : (1, Cin_pad, HpWp_pad)  zero-padded input, spatial flattened
    coord_ref: (2*KT, 1, 1, HW)        rows 0..KT-1 = y coords, KT..2KT-1 = x
                                       coords (absolute, padded frame)
    w_ref    : (Cp, KT*Cin_pad)        im2col conv weights (taps major)
    x2_ref   : (1, Cp, HW)             residual with conv bias folded in
    out_ref  : (1, Cp, HW)
    col_ref  : (KT*Cin_pad, HW) f32    VMEM scratch: im2col slab
    """
    HpWp_pad = x_ref.shape[2]

    # Source-position iota, hoisted out of the tap loop; kept (HpWp_pad, 1) so
    # the broadcasted compare does the expansion (no full-size temporary here).
    row = lax.broadcasted_iota(jnp.int32, (HpWp_pad, 1), 0)

    x = x_ref[0]                                   # (Cin_pad, HpWp_pad)

    def tap_body(t, carry):
        sy = coord_ref[t, 0]                       # (1, HW) f32
        sx = coord_ref[KT + t, 0]                  # (1, HW) f32
        y0 = jnp.floor(sy)
        x0 = jnp.floor(sx)
        fy = sy - y0                               # bilinear fractions
        fx = sx - x0
        y0i = y0.astype(jnp.int32)
        x0i = x0.astype(jnp.int32)

        def corner(dy, dx):
            cy = y0i + dy
            cx = x0i + dx
            wy = fy if dy else 1.0 - fy
            wx = fx if dx else 1.0 - fx
            valid = (cy >= 0) & (cy < Hp) & (cx >= 0) & (cx < Wp)
            # invalid corners -> index -1 -> never match -> contribute 0,
            # reproducing torchvision's zero-boundary bilinear sampling.
            idx = jnp.where(valid, cy * Wp + cx, -1)       # (1, HW) int32
            return idx, wy * wx                            # weights (1, HW) f32

        i00, w00 = corner(0, 0)
        i01, w01 = corner(0, 1)
        i10, w10 = corner(1, 0)
        i11, w11 = corner(1, 1)

        # Sparse bilinear interpolation matrix (transposed) as a single nested
        # select chain: the 4 corner indices of any column are distinct, so the
        # chain equals the sum of the 4 weighted one-hots.  8 full-size VPU
        # passes per tap (4 compares + 4 selects); no zeros-init / accumulate.
        gT = jnp.where(row == i11, w11,
             jnp.where(row == i10, w10,
             jnp.where(row == i01, w01,
             jnp.where(row == i00, w00, 0.0))))            # (HpWp_pad, HW)

        # Deformable gather on the MXU: (Cin_pad, HpWp_pad) @ (HpWp_pad, HW).
        sampled = jnp.dot(x, gT, preferred_element_type=jnp.float32,
                          precision=lax.Precision.HIGHEST)
        start = pl.multiple_of(t * Cin_pad, Cin_pad)       # sublane-aligned
        col_ref[pl.ds(start, Cin_pad), :] = sampled
        return carry

    lax.fori_loop(0, KT, tap_body, 0)

    # Epilogue: ONE im2col matmul (Cp, KT*Cin_pad) @ (KT*Cin_pad, HW), then the
    # bias-folded residual add and the ReLU6 clamp; lane-dense (HW lanes) store.
    y = jnp.dot(w_ref[...], col_ref[...], preferred_element_type=jnp.float32,
                precision=lax.Precision.HIGHEST)
    y = y + x2_ref[0]
    out_ref[0] = jnp.clip(y, 0.0, 6.0).astype(out_ref.dtype)


def deform_conv_add_relu6_2d(x1, x2, weight, bias, *,
                             stride=1, padding=1, dilation=1):
    """forward(x1=(input, offset), x2) = relu6(deform_conv2d(input, offset) + x2).

    input : (N, Cin, H, W), offset: (N, 2*KH*KW, Ho, Wo) (torchvision layout),
    x2    : (N, Cout, Ho, Wo). Returns NCHW.
    """
    x, offset = x1
    N, Cin, H, W = x.shape
    Cout, Cin_w, KH, KW = weight.shape
    assert Cin_w == Cin, "groups != 1 not supported"
    KT = KH * KW
    Ho = (H + 2 * padding - dilation * (KH - 1) - 1) // stride + 1
    Wo = (W + 2 * padding - dilation * (KW - 1) - 1) // stride + 1
    HW = Ho * Wo
    Hp, Wp = H + 2 * padding, W + 2 * padding
    HpWp = Hp * Wp
    HpWp_pad = ((HpWp + 127) // 128) * 128   # lane-aligned K for the gather matmul
    Cin_pad = ((Cin + 7) // 8) * 8           # sublane-aligned input channels
    Cp = ((Cout + 7) // 8) * 8               # sublane-aligned output channels
    f32 = jnp.float32

    # --- wrapper glue (plain JAX): padding, flattening, sampling coordinates ---
    xp = jnp.pad(x.astype(f32),
                 ((0, 0), (0, Cin_pad - Cin),
                  (padding, padding), (padding, padding)))
    x_flat = jnp.pad(xp.reshape(N, Cin_pad, HpWp),
                     ((0, 0), (0, 0), (0, HpWp_pad - HpWp)))

    # offsets: channel 2k = dy, 2k+1 = dx for tap k (row-major over kh, kw);
    # absolute coordinates in the *padded* frame (the -pad and +pad cancel).
    off = offset.astype(f32).reshape(N, KT, 2, Ho, Wo)
    k_idx = jnp.arange(KT)
    ky = (k_idx // KW).astype(f32) * dilation
    kx = (k_idx % KW).astype(f32) * dilation
    gy = jnp.arange(Ho, dtype=f32) * stride
    gx = jnp.arange(Wo, dtype=f32) * stride
    py = (off[:, :, 0] + ky[None, :, None, None]
          + gy[None, None, :, None]).reshape(N, KT, HW)
    px = (off[:, :, 1] + kx[None, :, None, None]
          + gx[None, None, None, :]).reshape(N, KT, HW)
    coords = jnp.concatenate([py, px], axis=1)               # (N, 2*KT, HW)
    coords = jnp.transpose(coords, (1, 0, 2)).reshape(2 * KT, N, 1, HW)

    # im2col weight matrix (Cp, KT*Cin_pad), taps major / channels minor,
    # matching the col scratch row order.
    w_k = jnp.transpose(weight.astype(f32), (0, 2, 3, 1)).reshape(Cout, KT, Cin)
    w_k = jnp.pad(w_k, ((0, Cp - Cout), (0, 0), (0, Cin_pad - Cin)))
    w_k = w_k.reshape(Cp, KT * Cin_pad)

    # residual with the conv bias folded in, (N, Cp, HW)
    x2b = (x2.astype(f32) + bias.astype(f32)[None, :, None, None]
           ).reshape(N, Cout, HW)
    x2b = jnp.pad(x2b, ((0, 0), (0, Cp - Cout), (0, 0)))

    kernel = functools.partial(_deform_conv_add_relu6_kernel,
                               Hp=Hp, Wp=Wp, KT=KT, Cin_pad=Cin_pad)

    out = pl.pallas_call(
        kernel,
        out_shape=jax.ShapeDtypeStruct((N, Cp, HW), x.dtype),
        grid_spec=pltpu.PrefetchScalarGridSpec(
            num_scalar_prefetch=0,
            grid=(N,),
            in_specs=[
                pl.BlockSpec((1, Cin_pad, HpWp_pad), lambda n: (n, 0, 0)),
                pl.BlockSpec((2 * KT, 1, 1, HW), lambda n: (0, n, 0, 0)),
                pl.BlockSpec((Cp, KT * Cin_pad), lambda n: (0, 0)),
                pl.BlockSpec((1, Cp, HW), lambda n: (n, 0, 0)),
            ],
            out_specs=pl.BlockSpec((1, Cp, HW), lambda n: (n, 0, 0)),
            scratch_shapes=[pltpu.VMEM((KT * Cin_pad, HW), jnp.float32)],
        ),
        compiler_params=pltpu.CompilerParams(
            dimension_semantics=("parallel",)),
    )(x_flat, coords, w_k, x2b)

    return out[:, :Cout, :].reshape(N, Cout, Ho, Wo)          # already NCHW


def _reference(x, offset, x2, weight, bias, *, stride=1, padding=1, dilation=1):
    """Pure-JAX deformable conv (torchvision semantics) + add + ReLU6."""
    N, Cin, H, W = x.shape
    Cout, _, KH, KW = weight.shape
    KT = KH * KW
    Ho = (H + 2 * padding - dilation * (KH - 1) - 1) // stride + 1
    Wo = (W + 2 * padding - dilation * (KW - 1) - 1) // stride + 1
    f32 = jnp.float32

    off = offset.reshape(N, KT, 2, Ho, Wo)
    k_idx = jnp.arange(KT)
    ky = (k_idx // KW).astype(f32) * dilation
    kx = (k_idx % KW).astype(f32) * dilation
    gy = jnp.arange(Ho, dtype=f32) * stride
    gx = jnp.arange(Wo, dtype=f32) * stride
    py = off[:, :, 0] + ky[None, :, None, None] + gy[None, None, :, None] - padding
    px = off[:, :, 1] + kx[None, :, None, None] + gx[None, None, None, :] - padding

    y0 = jnp.floor(py)
    x0 = jnp.floor(px)
    fy = py - y0
    fx = px - x0
    y0 = y0.astype(jnp.int32)
    x0 = x0.astype(jnp.int32)
    n_idx = jnp.arange(N)[:, None, None, None]

    def corner(cy, cx, w):
        valid = (cy >= 0) & (cy < H) & (cx >= 0) & (cx < W)
        v = x[n_idx, :, jnp.clip(cy, 0, H - 1), jnp.clip(cx, 0, W - 1)]
        return v * (w * valid)[..., None]                     # (N,KT,Ho,Wo,Cin)

    sampled = (corner(y0, x0, (1 - fy) * (1 - fx))
               + corner(y0, x0 + 1, (1 - fy) * fx)
               + corner(y0 + 1, x0, fy * (1 - fx))
               + corner(y0 + 1, x0 + 1, fy * fx))

    w_k = jnp.transpose(weight, (2, 3, 1, 0)).reshape(KT, Cin, Cout)
    conv = jnp.einsum('nkhwi,kio->nohw', sampled, w_k) + bias[None, :, None, None]
    return jnp.clip(conv + x2, 0.0, 6.0)


if __name__ == "__main__":
    key = jax.random.PRNGKey(0)
    kx, koff, kx2, kw, kb = jax.random.split(key, 5)

    N, Cin, H, W = 2, 4, 16, 16
    Cout, KH, KW = 8, 3, 3
    stride, padding, dilation = 1, 1, 1
    Ho = (H + 2 * padding - dilation * (KH - 1) - 1) // stride + 1
    Wo = (W + 2 * padding - dilation * (KW - 1) - 1) // stride + 1

    x = jax.random.normal(kx, (N, Cin, H, W), jnp.float32)
    # offsets up to a few pixels: exercises fractional and out-of-bounds sampling
    offset = 2.5 * jax.random.normal(koff, (N, 2 * KH * KW, Ho, Wo), jnp.float32)
    x2 = jax.random.normal(kx2, (N, Cout, Ho, Wo), jnp.float32)
    weight = 0.1 * jax.random.normal(kw, (Cout, Cin, KH, KW), jnp.float32)
    bias = 0.1 * jax.random.normal(kb, (Cout,), jnp.float32)

    out = deform_conv_add_relu6_2d((x, offset), x2, weight, bias,
                                   stride=stride, padding=padding,
                                   dilation=dilation)
    out = jax.block_until_ready(out)

    ref = _reference(x, offset, x2, weight, bias,
                     stride=stride, padding=padding, dilation=dilation)

    assert out.shape == (N, Cout, Ho, Wo)
    # Precision.HIGHEST matmuls: the kernel should agree with the f32 reference
    # well inside this tolerance.
    assert jnp.allclose(out, ref, atol=1e-3, rtol=1e-3), \
        float(jnp.max(jnp.abs(out - ref)))
    print("KERNEL_OK")
</pallas_src>

<mosaic_0001>
module attributes {stable_mosaic.version = 11 : i64} {
  func.func @_deform_conv_add_relu6_kernel(%arg0: i32, %arg1: memref<1x8x384xf32, #tpu.memory_space<vmem>>, %arg2: memref<18x1x1x256xf32, #tpu.memory_space<vmem>>, %arg3: memref<8x72xf32, #tpu.memory_space<vmem>>, %arg4: memref<1x8x256xf32, #tpu.memory_space<vmem>>, %arg5: memref<1x8x256xf32, #tpu.memory_space<vmem>>, %arg6: memref<72x256xf32, #tpu.memory_space<vmem>>) attributes {dimension_semantics = [#tpu.dimension_semantics<parallel>], iteration_bounds = array<i64: 2>, scalar_prefetch = 0 : i64, scratch_operands = 1 : i64, tpu.core_type = #tpu.core_type<tc>, window_params = [{transform_indices = @transform_0, window_bounds = array<i64: 1, 8, 384>}, {transform_indices = @transform_1, window_bounds = array<i64: 18, 1, 1, 256>}, {pipeline_mode = #tpu.pipeline_mode<synchronous>, transform_indices = @transform_2, window_bounds = array<i64: 8, 72>}, {transform_indices = @transform_3, window_bounds = array<i64: 1, 8, 256>}, {transform_indices = @transform_4, window_bounds = array<i64: 1, 8, 256>}]} {
    %0 = tpu.iota {dimensions = array<i32: 0>} : vector<384x1xi32>
    %c0 = arith.constant 0 : index
    %c0_0 = arith.constant 0 : index
    %c0_1 = arith.constant 0 : index
    %1 = vector.load %arg1[%c0, %c0_0, %c0_1] : memref<1x8x384xf32, #tpu.memory_space<vmem>>, vector<1x8x384xf32>
    %2 = vector.shape_cast %1 : vector<1x8x384xf32> to vector<8x384xf32>
    %c0_i32 = arith.constant 0 : i32
    %c9_i32 = arith.constant 9 : i32
    %3 = arith.addi %c0_i32, %c9_i32 : i32
    %c1_i32 = arith.constant 1 : i32
    scf.for %arg7 = %c0_i32 to %3 step %c1_i32  : i32 {
      %17 = arith.index_cast %arg7 : i32 to index
      %c0_15 = arith.constant 0 : index
      %c0_16 = arith.constant 0 : index
      %c0_17 = arith.constant 0 : index
      %18 = vector.load %arg2[%17, %c0_15, %c0_16, %c0_17] : memref<18x1x1x256xf32, #tpu.memory_space<vmem>>, vector<1x1x1x256xf32>
      %19 = vector.shape_cast %18 : vector<1x1x1x256xf32> to vector<1x256xf32>
      %c9_i32_18 = arith.constant 9 : i32
      %20 = arith.addi %c9_i32_18, %arg7 : i32
      %21 = arith.index_cast %20 : i32 to index
      %c0_19 = arith.constant 0 : index
      %c0_20 = arith.constant 0 : index
      %c0_21 = arith.constant 0 : index
      %22 = vector.load %arg2[%21, %c0_19, %c0_20, %c0_21] : memref<18x1x1x256xf32, #tpu.memory_space<vmem>>, vector<1x1x1x256xf32>
      %23 = vector.shape_cast %22 : vector<1x1x1x256xf32> to vector<1x256xf32>
      %24 = math.floor %19 : vector<1x256xf32>
      %25 = math.floor %23 : vector<1x256xf32>
      %26 = arith.subf %19, %24 : vector<1x256xf32>
      %27 = arith.subf %23, %25 : vector<1x256xf32>
      %28 = arith.fptosi %24 : vector<1x256xf32> to vector<1x256xi32>
      %29 = arith.fptosi %25 : vector<1x256xf32> to vector<1x256xi32>
      %c0_i32_22 = arith.constant 0 : i32
      %30 = vector.broadcast %c0_i32_22 : i32 to vector<1x256xi32>
      %31 = arith.addi %28, %30 : vector<1x256xi32>
      %c0_i32_23 = arith.constant 0 : i32
      %32 = vector.broadcast %c0_i32_23 : i32 to vector<1x256xi32>
      %33 = arith.addi %29, %32 : vector<1x256xi32>
      %cst_24 = arith.constant 1.000000e+00 : f32
      %34 = vector.broadcast %cst_24 : f32 to vector<1x256xf32>
      %35 = arith.subf %34, %26 : vector<1x256xf32>
      %cst_25 = arith.constant 1.000000e+00 : f32
      %36 = vector.broadcast %cst_25 : f32 to vector<1x256xf32>
      %37 = arith.subf %36, %27 : vector<1x256xf32>
      %c0_i32_26 = arith.constant 0 : i32
      %38 = vector.broadcast %c0_i32_26 : i32 to vector<1x256xi32>
      %39 = arith.cmpi sge, %31, %38 : vector<1x256xi32>
      %c18_i32 = arith.constant 18 : i32
      %40 = vector.broadcast %c18_i32 : i32 to vector<1x256xi32>
      %41 = arith.cmpi slt, %31, %40 : vector<1x256xi32>
      %42 = arith.andi %39, %41 : vector<1x256xi1>
      %c0_i32_27 = arith.constant 0 : i32
      %43 = vector.broadcast %c0_i32_27 : i32 to vector<1x256xi32>
      %44 = arith.cmpi sge, %33, %43 : vector<1x256xi32>
      %45 = arith.andi %42, %44 : vector<1x256xi1>
      %c18_i32_28 = arith.constant 18 : i32
      %46 = vector.broadcast %c18_i32_28 : i32 to vector<1x256xi32>
      %47 = arith.cmpi slt, %33, %46 : vector<1x256xi32>
      %48 = arith.andi %45, %47 : vector<1x256xi1>
      %c18_i32_29 = arith.constant 18 : i32
      %49 = vector.broadcast %c18_i32_29 : i32 to vector<1x256xi32>
      %50 = arith.muli %31, %49 : vector<1x256xi32>
      %51 = arith.addi %50, %33 : vector<1x256xi32>
      %c-1_i32 = arith.constant -1 : i32
      %52 = vector.broadcast %c-1_i32 : i32 to vector<1x256xi32>
      %53 = arith.select %48, %51, %52 : vector<1x256xi1>, vector<1x256xi32>
      %54 = arith.mulf %35, %37 : vector<1x256xf32>
      %c0_i32_30 = arith.constant 0 : i32
      %55 = vector.broadcast %c0_i32_30 : i32 to vector<1x256xi32>
      %56 = arith.addi %28, %55 : vector<1x256xi32>
      %c1_i32_31 = arith.constant 1 : i32
      %57 = vector.broadcast %c1_i32_31 : i32 to vector<1x256xi32>
      %58 = arith.addi %29, %57 : vector<1x256xi32>
      %cst_32 = arith.constant 1.000000e+00 : f32
      %59 = vector.broadcast %cst_32 : f32 to vector<1x256xf32>
      %60 = arith.subf %59, %26 : vector<1x256xf32>
      %c0_i32_33 = arith.constant 0 : i32
      %61 = vector.broadcast %c0_i32_33 : i32 to vector<1x256xi32>
      %62 = arith.cmpi sge, %56, %61 : vector<1x256xi32>
      %c18_i32_34 = arith.constant 18 : i32
      %63 = vector.broadcast %c18_i32_34 : i32 to vector<1x256xi32>
      %64 = arith.cmpi slt, %56, %63 : vector<1x256xi32>
      %65 = arith.andi %62, %64 : vector<1x256xi1>
      %c0_i32_35 = arith.constant 0 : i32
      %66 = vector.broadcast %c0_i32_35 : i32 to vector<1x256xi32>
      %67 = arith.cmpi sge, %58, %66 : vector<1x256xi32>
      %68 = arith.andi %65, %67 : vector<1x256xi1>
      %c18_i32_36 = arith.constant 18 : i32
      %69 = vector.broadcast %c18_i32_36 : i32 to vector<1x256xi32>
      %70 = arith.cmpi slt, %58, %69 : vector<1x256xi32>
      %71 = arith.andi %68, %70 : vector<1x256xi1>
      %c18_i32_37 = arith.constant 18 : i32
      %72 = vector.broadcast %c18_i32_37 : i32 to vector<1x256xi32>
      %73 = arith.muli %56, %72 : vector<1x256xi32>
      %74 = arith.addi %73, %58 : vector<1x256xi32>
      %c-1_i32_38 = arith.constant -1 : i32
      %75 = vector.broadcast %c-1_i32_38 : i32 to vector<1x256xi32>
      %76 = arith.select %71, %74, %75 : vector<1x256xi1>, vector<1x256xi32>
      %77 = arith.mulf %60, %27 : vector<1x256xf32>
      %c1_i32_39 = arith.constant 1 : i32
      %78 = vector.broadcast %c1_i32_39 : i32 to vector<1x256xi32>
      %79 = arith.addi %28, %78 : vector<1x256xi32>
      %c0_i32_40 = arith.constant 0 : i32
      %80 = vector.broadcast %c0_i32_40 : i32 to vector<1x256xi32>
      %81 = arith.addi %29, %80 : vector<1x256xi32>
      %cst_41 = arith.constant 1.000000e+00 : f32
      %82 = vector.broadcast %cst_41 : f32 to vector<1x256xf32>
      %83 = arith.subf %82, %27 : vector<1x256xf32>
      %c0_i32_42 = arith.constant 0 : i32
      %84 = vector.broadcast %c0_i32_42 : i32 to vector<1x256xi32>
      %85 = arith.cmpi sge, %79, %84 : vector<1x256xi32>
      %c18_i32_43 = arith.constant 18 : i32
      %86 = vector.broadcast %c18_i32_43 : i32 to vector<1x256xi32>
      %87 = arith.cmpi slt, %79, %86 : vector<1x256xi32>
      %88 = arith.andi %85, %87 : vector<1x256xi1>
      %c0_i32_44 = arith.constant 0 : i32
      %89 = vector.broadcast %c0_i32_44 : i32 to vector<1x256xi32>
      %90 = arith.cmpi sge, %81, %89 : vector<1x256xi32>
      %91 = arith.andi %88, %90 : vector<1x256xi1>
      %c18_i32_45 = arith.constant 18 : i32
      %92 = vector.broadcast %c18_i32_45 : i32 to vector<1x256xi32>
      %93 = arith.cmpi slt, %81, %92 : vector<1x256xi32>
      %94 = arith.andi %91, %93 : vector<1x256xi1>
      %c18_i32_46 = arith.constant 18 : i32
      %95 = vector.broadcast %c18_i32_46 : i32 to vector<1x256xi32>
      %96 = arith.muli %79, %95 : vector<1x256xi32>
      %97 = arith.addi %96, %81 : vector<1x256xi32>
      %c-1_i32_47 = arith.constant -1 : i32
      %98 = vector.broadcast %c-1_i32_47 : i32 to vector<1x256xi32>
      %99 = arith.select %94, %97, %98 : vector<1x256xi1>, vector<1x256xi32>
      %100 = arith.mulf %26, %83 : vector<1x256xf32>
      %c1_i32_48 = arith.constant 1 : i32
      %101 = vector.broadcast %c1_i32_48 : i32 to vector<1x256xi32>
      %102 = arith.addi %28, %101 : vector<1x256xi32>
      %c1_i32_49 = arith.constant 1 : i32
      %103 = vector.broadcast %c1_i32_49 : i32 to vector<1x256xi32>
      %104 = arith.addi %29, %103 : vector<1x256xi32>
      %c0_i32_50 = arith.constant 0 : i32
      %105 = vector.broadcast %c0_i32_50 : i32 to vector<1x256xi32>
      %106 = arith.cmpi sge, %102, %105 : vector<1x256xi32>
      %c18_i32_51 = arith.constant 18 : i32
      %107 = vector.broadcast %c18_i32_51 : i32 to vector<1x256xi32>
      %108 = arith.cmpi slt, %102, %107 : vector<1x256xi32>
      %109 = arith.andi %106, %108 : vector<1x256xi1>
      %c0_i32_52 = arith.constant 0 : i32
      %110 = vector.broadcast %c0_i32_52 : i32 to vector<1x256xi32>
      %111 = arith.cmpi sge, %104, %110 : vector<1x256xi32>
      %112 = arith.andi %109, %111 : vector<1x256xi1>
      %c18_i32_53 = arith.constant 18 : i32
      %113 = vector.broadcast %c18_i32_53 : i32 to vector<1x256xi32>
      %114 = arith.cmpi slt, %104, %113 : vector<1x256xi32>
      %115 = arith.andi %112, %114 : vector<1x256xi1>
      %c18_i32_54 = arith.constant 18 : i32
      %116 = vector.broadcast %c18_i32_54 : i32 to vector<1x256xi32>
      %117 = arith.muli %102, %116 : vector<1x256xi32>
      %118 = arith.addi %117, %104 : vector<1x256xi32>
      %c-1_i32_55 = arith.constant -1 : i32
      %119 = vector.broadcast %c-1_i32_55 : i32 to vector<1x256xi32>
      %120 = arith.select %115, %118, %119 : vector<1x256xi1>, vector<1x256xi32>
      %121 = arith.mulf %26, %27 : vector<1x256xf32>
      %122 = vector.broadcast %0 : vector<384x1xi32> to vector<384x256xi32>
      %123 = vector.broadcast %120 : vector<1x256xi32> to vector<384x256xi32>
      %124 = arith.cmpi eq, %122, %123 : vector<384x256xi32>
      %125 = vector.broadcast %0 : vector<384x1xi32> to vector<384x256xi32>
      %126 = vector.broadcast %99 : vector<1x256xi32> to vector<384x256xi32>
      %127 = arith.cmpi eq, %125, %126 : vector<384x256xi32>
      %128 = vector.broadcast %0 : vector<384x1xi32> to vector<384x256xi32>
      %129 = vector.broadcast %76 : vector<1x256xi32> to vector<384x256xi32>
      %130 = arith.cmpi eq, %128, %129 : vector<384x256xi32>
      %131 = vector.broadcast %0 : vector<384x1xi32> to vector<384x256xi32>
      %132 = vector.broadcast %53 : vector<1x256xi32> to vector<384x256xi32>
      %133 = arith.cmpi eq, %131, %132 : vector<384x256xi32>
      %cst_56 = arith.constant 0.000000e+00 : f32
      %134 = vector.shape_cast %54 : vector<1x256xf32> to vector<1x256xf32>
      %135 = vector.broadcast %134 : vector<1x256xf32> to vector<384x256xf32>
      %136 = vector.broadcast %cst_56 : f32 to vector<384x256xf32>
      %137 = arith.select %133, %135, %136 : vector<384x256xi1>, vector<384x256xf32>
      %138 = vector.shape_cast %77 : vector<1x256xf32> to vector<1x256xf32>
      %139 = vector.broadcast %138 : vector<1x256xf32> to vector<384x256xf32>
      %140 = arith.select %130, %139, %137 : vector<384x256xi1>, vector<384x256xf32>
      %141 = vector.shape_cast %100 : vector<1x256xf32> to vector<1x256xf32>
      %142 = vector.broadcast %141 : vector<1x256xf32> to vector<384x256xf32>
      %143 = arith.select %127, %142, %140 : vector<384x256xi1>, vector<384x256xf32>
      %144 = vector.shape_cast %121 : vector<1x256xf32> to vector<1x256xf32>
      %145 = vector.broadcast %144 : vector<1x256xf32> to vector<384x256xf32>
      %146 = arith.select %124, %145, %143 : vector<384x256xi1>, vector<384x256xf32>
      %cst_57 = arith.constant dense<0.000000e+00> : vector<8x256xf32>
      %147 = tpu.matmul %2, %146, %cst_57 {dimension_numbers = #tpu.dot_dimension_numbers<[1], [0], [0], [1], [0, 0, 1, 1], [], []>, precision = #tpu.contract_precision<fp32>} : vector<8x384xf32>, vector<384x256xf32>, vector<8x256xf32> -> vector<8x256xf32>
      %c8_i32 = arith.constant 8 : i32
      %148 = arith.muli %arg7, %c8_i32 : i32
      %149 = tpu.assume_multiple %148, 8 : i32
      %150 = arith.index_cast %149 : i32 to index
      %c0_58 = arith.constant 0 : index
      %151 = vector.load %arg6[%150, %c0_58] : memref<72x256xf32, #tpu.memory_space<vmem>>, vector<8x256xf32>
      tpu.vector_store %arg6[%150, %c0_58], %147 {strides = array<i32>} : memref<72x256xf32, #tpu.memory_space<vmem>>, vector<8x256xf32>,
    }
    %c9_i32_2 = arith.constant 9 : i32
    %c0_3 = arith.constant 0 : index
    %c0_4 = arith.constant 0 : index
    %4 = vector.load %arg3[%c0_3, %c0_4] : memref<8x72xf32, #tpu.memory_space<vmem>>, vector<8x72xf32>
    %c0_5 = arith.constant 0 : index
    %c0_6 = arith.constant 0 : index
    %5 = vector.load %arg6[%c0_5, %c0_6] : memref<72x256xf32, #tpu.memory_space<vmem>>, vector<72x256xf32>
    %cst = arith.constant dense<0.000000e+00> : vector<8x256xf32>
    %6 = tpu.matmul %4, %5, %cst {dimension_numbers = #tpu.dot_dimension_numbers<[1], [0], [0], [1], [0, 0, 1, 1], [], []>, precision = #tpu.contract_precision<fp32>} : vector<8x72xf32>, vector<72x256xf32>, vector<8x256xf32> -> vector<8x256xf32>
    %c0_7 = arith.constant 0 : index
    %c0_8 = arith.constant 0 : index
    %c0_9 = arith.constant 0 : index
    %7 = vector.load %arg4[%c0_7, %c0_8, %c0_9] : memref<1x8x256xf32, #tpu.memory_space<vmem>>, vector<1x8x256xf32>
    %8 = vector.shape_cast %7 : vector<1x8x256xf32> to vector<8x256xf32>
    %9 = arith.addf %6, %8 : vector<8x256xf32>
    %cst_10 = arith.constant 0.000000e+00 : f32
    %cst_11 = arith.constant 6.000000e+00 : f32
    %10 = vector.broadcast %cst_10 : f32 to vector<8x256xf32>
    %11 = arith.maximumf %10, %9 : vector<8x256xf32>
    %12 = vector.broadcast %cst_11 : f32 to vector<8x256xf32>
    %13 = arith.minimumf %12, %11 : vector<8x256xf32>
    %c0_12 = arith.constant 0 : index
    %c0_13 = arith.constant 0 : index
    %c0_14 = arith.constant 0 : index
    %14 = vector.load %arg5[%c0_12, %c0_13, %c0_14] : memref<1x8x256xf32, #tpu.memory_space<vmem>>, vector<1x8x256xf32>
    %15 = vector.shape_cast %14 : vector<1x8x256xf32> to vector<8x256xf32>
    %16 = vector.shape_cast %13 : vector<8x256xf32> to vector<1x8x256xf32>
    tpu.vector_store %arg5[%c0_12, %c0_13, %c0_14], %16 {strides = array<i32>} : memref<1x8x256xf32, #tpu.memory_space<vmem>>, vector<1x8x256xf32>,
    return
  }
  func.func @transform_0(%arg0: i32) -> (i32, i32, i32) {
    %c0_i32 = arith.constant 0 : i32
    %c0_i32_0 = arith.constant 0 : i32
    %c0_i32_1 = arith.constant 0 : i32
    return %arg0, %c0_i32, %c0_i32_0 : i32, i32, i32
  }
  func.func @transform_1(%arg0: i32) -> (i32, i32, i32, i32) {
    %c0_i32 = arith.constant 0 : i32
    %c0_i32_0 = arith.constant 0 : i32
    %c0_i32_1 = arith.constant 0 : i32
    %c0_i32_2 = arith.constant 0 : i32
    return %c0_i32, %arg0, %c0_i32_0, %c0_i32_1 : i32, i32, i32, i32
  }
  func.func @transform_2(%arg0: i32) -> (i32, i32) {
    %c0_i32 = arith.constant 0 : i32
    %c0_i32_0 = arith.constant 0 : i32
    %c0_i32_1 = arith.constant 0 : i32
    return %c0_i32, %c0_i32_0 : i32, i32
  }
  func.func @transform_3(%arg0: i32) -> (i32, i32, i32) {
    %c0_i32 = arith.constant 0 : i32
    %c0_i32_0 = arith.constant 0 : i32
    %c0_i32_1 = arith.constant 0 : i32
    return %arg0, %c0_i32, %c0_i32_0 : i32, i32, i32
  }
  func.func @transform_4(%arg0: i32) -> (i32, i32, i32) {
    %c0_i32 = arith.constant 0 : i32
    %c0_i32_0 = arith.constant 0 : i32
    %c0_i32_1 = arith.constant 0 : i32
    return %arg0, %c0_i32, %c0_i32_0 : i32, i32, i32
  }
}

</mosaic_0001>

<bundles_post_ra>
// kernel: tpu_custom_call.1
= control target key start
LH: loop header
LB: loop body
LE: loop exit
PB: predicated region body
PF: predicated region fallthrough
CT: control target
= control target key end

     0   :  { %s9321_s0 = inlined_call_operand.hbm [shape: f32[2,8,384], index: 0, kind: input, shape index: {}]   ;;  %s9322_s1 = inlined_call_operand.hbm [shape: f32[18,2,1,256], index: 1, kind: input, shape index: {}]   ;;  %s9323_s2 = inlined_call_operand.hbm [shape: f32[8,72], index: 2, kind: input, shape index: {}]   ;;  %s9324_s3 = inlined_call_operand.hbm [shape: f32[2,8,256], index: 3, kind: input, shape index: {}]   ;;  %s9325_s4 = inlined_call_operand.hbm [shape: f32[2,8,256], index: 4, kind: output, shape index: {}]  }
   0x1   :  { %9725 = sst [smem:[#allocation175_spill]] %s9321_s0 }
   0x2   :  { %9726 = sst [smem:[#allocation176_spill]] %s9322_s1 }
   0x3   :  { %9727 = sst [smem:[#allocation177_spill]] %s9323_s2 }
   0x4   :  { %9 = vsyncpa [#allocation4], 0 }
   0x5   :  { %11 = vsyncpa [#allocation4 + $0x1], 0 }
   0x6   :  { %12 = vsyncpa [#allocation7], 0 }
   0x7   :  { %14 = vsyncpa [#allocation7 + $0x1], 0 }
   0x8   :  { %15 = vsyncpa [#allocation10], 0 }
   0x9   :  { %17 = vsyncpa [#allocation10 + $0x1], 0 }
   0xa   :  { %18 = vsyncpa [#allocation5], 0 }
   0xb   :  { %20 = vsyncpa [#allocation5 + $0x1], 0  ;;  %s5323_s15 = smov 0   ;;  %s5325_s16 = smov 0  }
   0xc   :  { %s5327_s17 = smov 0   ;;  %s5329_s18 = smov 0  }
   0xd LB: > { %s5344_s19 = sadd.s32 4294967295, %s5282_s18   ;;  %s4258_s20 = sadd.s32 4294967294, %s5282_s18   ;;  %s5282_s18 = sphi %s5329_s18, %s10329_s18   ;;  %s5278_s17 = sphi %s5327_s17, %s10328_s17   ;;  %s5274_s16 = sphi %s5325_s16, %s10327_s16   ;;  %s5270_s15 = sphi %s5323_s15, %s10326_s15  }
   0xe   : > { %s5348_s21 = sadd.s32 1, %s5282_s18   ;;  %s33_s22 = sadd.s32 1, %s5278_s17 }
   0xf   : > { %s30_s23 = ssub.s32 %s5282_s18, %s5348_s21  ;;  %p40_p0 = scmp.ne.s32.totalorder %s5278_s17, %s5274_s16 }
  0x10   : > { %p31_p1 = scmp.eq.s32.totalorder %s30_s23, 0  ;;  %p46_p2 = scmp.ne.s32.totalorder %s5274_s16, %s5270_s15 }
  0x11   : > { %p9326_p3 = scmp.eq.s32.totalorder %s5344_s19, 0  ;;  %p143_p4 = scmp.eq.s32.totalorder %s5344_s19, 1 }
  0x12   : > { %s5360_s24 = scalar_select %p31_p1, %s5278_s17, %s33_s22  }
  0x13   : > { %p5364_p5 = por %p9326_p3, %p46_p2  ;;  %p5371_p6 = por %p143_p4, %p40_p0 }
  0x14   : > { %p149_p7 = scmp.eq.s32.totalorder %s4258_s20, 1  ;;  %p4259_p8 = scmp.ge.s32.totalorder %s5282_s18, 1 }
  0x15   : > { %s9728_s25 = scalar_select %p5364_p5, 1, 0 }
  0x16   : > { %s9729_s26 = scalar_select %p5371_p6, 1, 0 }
  0x17   : > { %p156_p9 = scmp.lt.s32.totalorder %s5282_s18, 3  ;;  %p5377_p10 = por %p149_p7, %p46_p2 }
  0x18   : > { %s5288_s29 = smov [#allocation8]   ;;  %p41_p1 = scmp.eq.s32.totalorder %s5282_s18, 0 }
  0x19   : > { %s9730_s27 = scalar_select %p5377_p10, 1, 0 }
  0x1a   : > { %p5381_p11 = pnand %p4259_p8, %p156_p9  ;;  %s169_s30 = sshll.u32 %s5288_s29, 4  ;;  %s170_s30 = int_to_ptr.vmem [resolvable:$true] %s169_s30 }
  0x1b   : > { %s5391_s5 = sand.u32 1, %s5278_s17   ;;  %p5402_p7 = por %p41_p1, %p40_p0 }
  0x1c   : > { %s9731_s28 = scalar_select %p5381_p11, 1, 0 }
  0x1d   : > { %p5014_p13 = pneg %p5381_p11  ;;  %s4993_s8 = smul.u32 24, %s5391_s5 }
  0x1e   : > { %s9733_s7 = scalar_select %p5402_p7, 1, 0 }
  0x1f   : > { %p5395_p2 = pnand %p5014_p13, %p9326_p3  ;;  %s4994_s9 = smul.u32 384, %s5282_s18 }
  0x20   : > { %s9734_s2 = sld [smem:[#allocation177_spill]] }
  0x21   : > { %p5084_p9 = pneg %p5395_p2 }
  0x26   : > { %s5082_s12 = scalar_lea.hbm %s9734_s2, 128 }
  0x27   : > { %p5083_p8 = scmp.ne.s32.totalorder %s9734_s2, %s5082_s12  ;;  %p5089_p0 = scmp.lt.u32.totalorder %s5082_s12, %s9734_s2 }
  0x29   : > { %p5085_p13 = pnand %p5084_p9, %p5083_p8 }
  0x2b   : > { %p5086_p12 = pneg %p5085_p13 }
  0x2d   : > { %p5091_p1 = pnand %p5089_p0, %p5086_p12 }
  0x2f   : > { %5094 = shalt.err (!%p5091_p1)
}
  0x30   : > { %s5095_s23 = scalar_lea.vmem %s170_s30, 128  ;;  %p5103_p6 = scmp.lt.s32.totalorder %s170_s30, %s170_s30 }
  0x31   : > { %p5096_p3 = scmp.ne.s32.totalorder %s170_s30, %s5095_s23  ;;  %p5104_p5 = scmp.lt.s32.totalorder %s5095_s23, %s5095_s23 }
  0x33   : > { %p5098_p4 = pnand %p5096_p3, %p5084_p9  ;;  %p5105_p11 = por %p5104_p5, %p5103_p6 }
  0x35   : > { %p5099_p10 = pneg %p5098_p4 }
  0x37   : > { %p5106_p7 = pnand %p5105_p11, %p5099_p10 }
  0x39   : > { %5109 = shalt.err (!%p5106_p7)
}
  0x3a   : > { %5017 = dma.hbm_to_vmem [thread:$0]  (!%p5395_p2), %s9734_s2, 128, %s170_s30, [#allocation7]  }
  0x3b   : > { %s9735_s0 = sld [smem:[#allocation175_spill]]  ;;  %s184_s14 = scalar_lea.vmem [#allocation3], %s4993_s8 }
  0x3c   : > { %s192_s6 = sshll.u32 %s184_s14, 4  ;;  %p9736_p3 = scmp.ne.s32.totalorder %s9733_s7, 0  ;;  %s5437_s6 = int_to_ptr.vmem [resolvable:$true] %s192_s6 }
  0x3d   : > { %p9737_p5 = scmp.lt.s32.totalorder %s5282_s18, 2  ;;  %s4995_s30 = smul.u32 36, %s5391_s5 }
  0x3e   : > { %s181_s23 = scalar_lea.sflag [#allocation4], %s5391_s5 }
  0x3f   : > { %p5433_p6 = pnand %p9737_p5, %p9736_p3 }
  0x41   : > { %s5427_s13 = scalar_lea.hbm %s9735_s0, %s4994_s9  ;;  %p5446_p11 = pneg %p5433_p6 }
  0x42   : > { %s9738_s20 = scalar_select %p5433_p6, 1, 0 }
  0x43   : > { %s5110_s9 = scalar_lea.hbm %s5427_s13, 384  ;;  %s5115_s10 = scalar_lea.hbm %s9735_s0, 768 }
  0x44   : > { %p5111_p10 = scmp.ne.s32.totalorder %s5427_s13, %s5110_s9  ;;  %p5116_p2 = scmp.lt.u32.totalorder %s5427_s13, %s9735_s0 }
  0x45   : > { %p5117_p7 = scmp.lt.u32.totalorder %s5115_s10, %s5110_s9  ;;  %p5119_p9 = scmp.lt.u32.totalorder %s5110_s9, %s5427_s13 }
  0x46   : > { %p5113_p12 = pnand %p5446_p11, %p5111_p10 }
  0x47   : > { %p5118_p8 = por %p5117_p7, %p5116_p2 }
  0x48   : > { %p5114_p4 = pneg %p5113_p12 }
  0x49   : > { %p5120_p13 = por %p5119_p9, %p5118_p8 }
  0x4b   : > { %p5121_p0 = pnand %p5120_p13, %p5114_p4 }
  0x4d   : > { %5124 = shalt.err (!%p5121_p0)
}
  0x4e   : > { %s5125_s14 = scalar_lea.vmem %s5437_s6, 384  ;;  %s5289_s7 = smov [#allocation3]  }
  0x4f   : > { %p5126_p1 = scmp.ne.s32.totalorder %s5437_s6, %s5125_s14  ;;  %s5130_s8 = sshll.u32 %s5289_s7, 4  ;;  %s5131_s8 = int_to_ptr.vmem [resolvable:$false] %s5130_s8 }
  0x50   : > { %s5132_s11 = scalar_lea.vmem %s5131_s8, 768  ;;  %p5133_p10 = scmp.lt.s32.totalorder %s5437_s6, %s5131_s8 }
  0x51   : > { %p5128_p3 = pnand %p5126_p1, %p5446_p11  ;;  %p5134_p12 = scmp.lt.s32.totalorder %s5132_s11, %s5125_s14 }
  0x53   : > { %p5129_p5 = pneg %p5128_p3  ;;  %p5135_p2 = por %p5134_p12, %p5133_p10 }
  0x55   : > { %p5136_p7 = pnand %p5135_p2, %p5129_p5 }
  0x57   : > { %5139 = shalt.err (!%p5136_p7)
}
  0x58   : > { %5021 = dma.hbm_to_vmem [thread:$0]  (!%p5433_p6), %s5427_s13, 384, %s5437_s6, %s181_s23  }
  0x59   : > { %s4283_s9 = sshll.u32 %s5282_s18, 5  ;;  %s203_s10 = scalar_lea.vmem [#allocation6], %s4995_s30 }
  0x5a   : > { %s210_s12 = sshll.u32 %s203_s10, 4  ;;  %s9740_s1 = sld [smem:[#allocation176_spill]]  ;;  %s5477_s12 = int_to_ptr.vmem [resolvable:$true] %s210_s12 }
  0x5b   : > { %s9741_s8 = sand.u32 1, %s5282_s18  }
  0x5c   : > { %s5481_s11 = scalar_lea.sflag [#allocation7], %s9741_s8 }
  0x60   : > { %s5475_s14 = scalar_lea.hbm %s9740_s1, %s4283_s9  ;;  %s5145_s30 = scalar_lea.hbm %s9740_s1, 1152 }
  0x61   : > { %s5140_s0 = scalar_lea.hbm %s5475_s14, 576  ;;  %p5146_p13 = scmp.lt.u32.totalorder %s5475_s14, %s9740_s1 }
  0x62   : > { %p5141_p4 = scmp.ne.s32.totalorder %s5475_s14, %s5140_s0  ;;  %p5147_p0 = scmp.lt.u32.totalorder %s5145_s30, %s5140_s0 }
  0x63   : > { %p5149_p3 = scmp.lt.u32.totalorder %s5140_s0, %s5475_s14 }
  0x64   : > { %p5143_p8 = pnand %p5141_p4, %p5446_p11  ;;  %p5148_p1 = por %p5147_p0, %p5146_p13 }
  0x66   : > { %p5144_p9 = pneg %p5143_p8  ;;  %p5150_p5 = por %p5149_p3, %p5148_p1 }
  0x68   : > { %p5151_p10 = pnand %p5150_p5, %p5144_p9 }
  0x6a   : > { %5154 = shalt.err (!%p5151_p10)
}
  0x6b   : > { %s5155_s9 = scalar_lea.vmem %s5477_s12, 576  ;;  %s5290_s10 = smov [#allocation6]  }
  0x6c   : > { %p5156_p12 = scmp.ne.s32.totalorder %s5477_s12, %s5155_s9  ;;  %s5160_s7 = sshll.u32 %s5290_s10, 4  ;;  %s5161_s7 = int_to_ptr.vmem [resolvable:$false] %s5160_s7 }
  0x6d   : > { %s5162_s8 = scalar_lea.vmem %s5161_s7, 1152  ;;  %p5163_p4 = scmp.lt.s32.totalorder %s5477_s12, %s5161_s7 }
  0x6e   : > { %p5158_p2 = pnand %p5156_p12, %p5446_p11  ;;  %p5164_p8 = scmp.lt.s32.totalorder %s5162_s8, %s5155_s9 }
  0x70   : > { %p5159_p7 = pneg %p5158_p2  ;;  %p5165_p13 = por %p5164_p8, %p5163_p4 }
  0x72   : > { %p5166_p0 = pnand %p5165_p13, %p5159_p7 }
  0x74   : > { %5169 = shalt.err (!%p5166_p0)
}
  0x75   : > { %s5291_s0 = smov 64   ;;  %s5292_s13 = smov 32  }
  0x76   : > { %s5293_s6 = smov 2   ;;  %s4265_s30 = sshll.u32 %s5391_s5, 4 }
  0x77   : > { %5024 = dma.hbm_to_vmem [thread:$0]  (!%p5433_p6), %s5475_s14, 576, %s5477_s12, %s5481_s11, %s5291_s0, %s5292_s13, %s5293_s6  }
  0x78   : > { %s4284_s22 = sshll.u32 %s5282_s18, 8  ;;  %s224_s7 = scalar_lea.vmem [#allocation9], %s4265_s30 }
  0x79   : > { %s5510_s10 = scalar_lea.hbm %s9324_s3, %s4284_s22  ;;  %s232_s8 = sshll.u32 %s224_s7, 4  ;;  %s233_s8 = int_to_ptr.vmem [resolvable:$true] %s232_s8 }
  0x7a   : > { %s221_s1 = scalar_lea.sflag [#allocation10], %s5391_s5  ;;  %s5170_s2 = scalar_lea.hbm %s5510_s10, 256 }
  0x7b   : > { %p5171_p9 = scmp.ne.s32.totalorder %s5510_s10, %s5170_s2  ;;  %s5175_s11 = scalar_lea.hbm %s9324_s3, 512 }
  0x7c   : > { %p5176_p5 = scmp.lt.u32.totalorder %s5510_s10, %s9324_s3  ;;  %p5177_p10 = scmp.lt.u32.totalorder %s5175_s11, %s5170_s2 }
  0x7d   : > { %p5173_p1 = pnand %p5171_p9, %p5446_p11  ;;  %p5179_p2 = scmp.lt.u32.totalorder %s5170_s2, %s5510_s10 }
  0x7e   : > { %p5178_p12 = por %p5177_p10, %p5176_p5 }
  0x7f   : > { %p5174_p3 = pneg %p5173_p1 }
  0x80   : > { %p5180_p7 = por %p5179_p2, %p5178_p12 }
  0x82   : > { %p5181_p4 = pnand %p5180_p7, %p5174_p3 }
  0x84   : > { %5184 = shalt.err (!%p5181_p4)
}
  0x85   : > { %s5185_s5 = scalar_lea.vmem %s233_s8, 256  ;;  %s5294_s6 = smov [#allocation9]  }
  0x86   : > { %p5186_p8 = scmp.ne.s32.totalorder %s233_s8, %s5185_s5  ;;  %s5190_s30 = sshll.u32 %s5294_s6, 4  ;;  %s5191_s30 = int_to_ptr.vmem [resolvable:$false] %s5190_s30 }
  0x87   : > { %s5192_s22 = scalar_lea.vmem %s5191_s30, 512  ;;  %p5193_p9 = scmp.lt.s32.totalorder %s233_s8, %s5191_s30 }
  0x88   : > { %p5188_p13 = pnand %p5186_p8, %p5446_p11  ;;  %p5194_p1 = scmp.lt.s32.totalorder %s5192_s22, %s5185_s5 }
  0x8a   : > { %p5189_p0 = pneg %p5188_p13  ;;  %p5195_p6 = por %p5194_p1, %p5193_p9 }
  0x8c   : > { %p5196_p5 = pnand %p5195_p6, %p5189_p0 }
  0x8e   : > { %5199 = shalt.err (!%p5196_p5)
}
  0x8f   : > { %p9742_p10 = scmp.ne.s32.totalorder %s9738_s20, 0  ;;  %p9743_p3 = scmp.ne.s32.totalorder %s9731_s28, 0 }
  0x91   : > { %5027 = dma.hbm_to_vmem [thread:$0]  (!%p9742_p10), %s5510_s10, 256, %s233_s8, %s221_s1  }
  0x92   : > { %241 = sbr.rel (%p9743_p3) target bundleno = 1249 (0x4e1), region = 36 }
  0x99   : > { %s5533_s2 = sand.u32 1, %s5274_s16   ;;  %p9744_p11 = scmp.ne.s32.totalorder %s9728_s25, 0 }
  0x9a   : > { %s4996_s29 = smul.u32 24, %s5533_s2  ;;  %s244_s23 = scalar_lea.sflag [#allocation4], %s5533_s2 }
  0x9c   : > { %s5537_s9 = scalar_lea.vmem [#allocation3], %s4996_s29 }
  0x9d   : > { %5249 = dma.done.wait (%p9744_p11), %s244_s23, 384  }
  0x9e   : > { %5251 = vsyncadd (%p9744_p11), %s244_s23, 4294966912  ;;  %s252_s1 = sand.u32 1, %s5344_s19   ;;  %s4997_s28 = smul.u32 36, %s5533_s2 }
  0x9f   : > { %s253_s20 = scalar_lea.sflag [#allocation7], %s252_s1 }
  0xa0   : > { %s5545_s10 = scalar_lea.vmem [#allocation6], %s4997_s28 }
  0xa1   : > { %5253 = dma.done.wait (%p9744_p11), %s253_s20, 576  }
  0xa2   : > { %5255 = vsyncadd (%p9744_p11), %s253_s20, 4294966720  ;;  %p9745_p6 = scmp.eq.s32.totalorder %s5344_s19, 0 }
  0xa4   : > { %5257 = dma.done.wait (%p9745_p6), [#allocation7], 128   ;;  %p9746_p12 = pmov %p9745_p6 }
  0xa5   : > { %s4270_s7 = sshll.u32 %s5533_s2, 4  ;;  %s266_s8 = scalar_lea.sflag [#allocation10], %s5533_s2 }
  0xa6   : > { %5259 = vsyncadd (%p9746_p12), [#allocation7], 4294967168  ;;  %s5559_s12 = scalar_lea.vmem [#allocation9], %s4270_s7 }
  0xa7   : > { %5261 = dma.done.wait (%p9744_p11), %s266_s8, 256  }
  0xa8   : > { %5263 = vsyncadd (%p9744_p11), %s266_s8, 4294967040  ;;  %v304_v0 = vlaneseq  ;;  %v5604_v14 = vld [vmem:[%s5537_s9] sm:$0xff]  ;;  %v5607_v15 = vld [vmem:[%s5537_s9 + $0x8] sm:$0xff]  ;;  %s5719_s25 = scalar_lea.vmem [#allocation11], %s4270_s7  ;;  %s5721_s14 = smov 0  }
  0xa9   : > { %9760 = vst [vmem:[#allocation30_spill] sm:$0xff] %v5604_v14  ;;  %9761 = vst [vmem:[#allocation31_spill] sm:$0xff] %v5607_v15  ;;  %v5610_v16 = vld [vmem:[%s5537_s9 + $0x10] sm:$0xff] }
  0xaa   : > { %v5565_v1 = vshrl.u32 %v304_v0, 7  ;;  %9762 = vst [vmem:[#allocation32_spill] sm:$0xff] %v5610_v16 }
  0xac   : > { %9747 = vst [vmem:[#allocation17_spill] sm:$0xff] %v5565_v1  ;;  %v5568_v2 = vadd.s32 8, %v5565_v1  ;;  %v5571_v3 = vadd.s32 16, %v5565_v1  ;;  %v5574_v4 = vadd.s32 24, %v5565_v1  ;;  %v5577_v5 = vadd.s32 32, %v5565_v1 }
  0xad   : > { %v5580_v6 = vadd.s32 40, %v5565_v1  ;;  %v5583_v7 = vadd.s32 48, %v5565_v1  ;;  %v5586_v8 = vadd.s32 56, %v5565_v1  ;;  %v5589_v9 = vadd.s32 64, %v5565_v1 }
  0xae   : > { %9748 = vst [vmem:[#allocation18_spill] sm:$0xff] %v5568_v2  ;;  %9749 = vst [vmem:[#allocation19_spill] sm:$0xff] %v5571_v3  ;;  %v5592_v10 = vadd.s32 72, %v5565_v1  ;;  %v5595_v11 = vadd.s32 80, %v5565_v1  ;;  %v5598_v12 = vadd.s32 88, %v5565_v1  ;;  %v5601_v13 = vadd.s32 96, %v5565_v1 }
  0xaf   : > { %9750 = vst [vmem:[#allocation20_spill] sm:$0xff] %v5574_v4  ;;  %9751 = vst [vmem:[#allocation21_spill] sm:$0xff] %v5577_v5  ;;  %v5613_v17 = vadd.s32 104, %v5565_v1  ;;  %v5616_v18 = vadd.s32 112, %v5565_v1  ;;  %v5619_v19 = vadd.s32 120, %v5565_v1  ;;  %v5622_v20 = vadd.s32 128, %v5565_v1 }
  0xb0   : > { %9752 = vst [vmem:[#allocation22_spill] sm:$0xff] %v5580_v6  ;;  %9753 = vst [vmem:[#allocation23_spill] sm:$0xff] %v5583_v7  ;;  %v5625_v21 = vadd.s32 136, %v5565_v1  ;;  %v5628_v22 = vadd.s32 144, %v5565_v1  ;;  %v5631_v23 = vadd.s32 152, %v5565_v1  ;;  %v5634_v24 = vadd.s32 160, %v5565_v1 }
  0xb1   : > { %9754 = vst [vmem:[#allocation24_spill] sm:$0xff] %v5586_v8  ;;  %9755 = vst [vmem:[#allocation25_spill] sm:$0xff] %v5589_v9  ;;  %v5637_v25 = vadd.s32 168, %v5565_v1  ;;  %v5640_v26 = vadd.s32 176, %v5565_v1  ;;  %v5643_v27 = vadd.s32 184, %v5565_v1  ;;  %v5646_v28 = vadd.s32 192, %v5565_v1 }
  0xb2   : > { %9756 = vst [vmem:[#allocation26_spill] sm:$0xff] %v5592_v10  ;;  %9757 = vst [vmem:[#allocation27_spill] sm:$0xff] %v5595_v11  ;;  %v5649_v29 = vadd.s32 200, %v5565_v1  ;;  %v5652_v30 = vadd.s32 208, %v5565_v1  ;;  %v5655_v31 = vadd.s32 216, %v5565_v1  ;;  %v5658_v32 = vadd.s32 224, %v5565_v1 }
  0xb3   : > { %9758 = vst [vmem:[#allocation28_spill] sm:$0xff] %v5598_v12  ;;  %9759 = vst [vmem:[#allocation29_spill] sm:$0xff] %v5601_v13  ;;  %v5661_v33 = vadd.s32 232, %v5565_v1  ;;  %v5664_v34 = vadd.s32 240, %v5565_v1  ;;  %v5667_v35 = vadd.s32 248, %v5565_v1  ;;  %v5670_v36 = vadd.s32 256, %v5565_v1 }
  0xb4   : > { %9763 = vst [vmem:[#allocation33_spill] sm:$0xff] %v5613_v17  ;;  %9764 = vst [vmem:[#allocation34_spill] sm:$0xff] %v5616_v18  ;;  %v5673_v37 = vadd.s32 264, %v5565_v1  ;;  %v5676_v38 = vadd.s32 272, %v5565_v1  ;;  %v5679_v39 = vadd.s32 280, %v5565_v1  ;;  %v5682_v40 = vadd.s32 288, %v5565_v1 }
  0xb5   : > { %9765 = vst [vmem:[#allocation35_spill] sm:$0xff] %v5619_v19  ;;  %9766 = vst [vmem:[#allocation36_spill] sm:$0xff] %v5622_v20  ;;  %v5685_v41 = vadd.s32 296, %v5565_v1  ;;  %v5688_v42 = vadd.s32 304, %v5565_v1  ;;  %v5691_v43 = vadd.s32 312, %v5565_v1  ;;  %v5694_v44 = vadd.s32 320, %v5565_v1 }
  0xb6   : > { %9767 = vst [vmem:[#allocation37_spill] sm:$0xff] %v5625_v21  ;;  %9768 = vst [vmem:[#allocation38_spill] sm:$0xff] %v5628_v22  ;;  %v5697_v45 = vadd.s32 328, %v5565_v1  ;;  %v5700_v46 = vadd.s32 336, %v5565_v1  ;;  %v5703_v47 = vadd.s32 344, %v5565_v1  ;;  %v5706_v48 = vadd.s32 352, %v5565_v1 }
  0xb7   : > { %9769 = vst [vmem:[#allocation39_spill] sm:$0xff] %v5631_v23  ;;  %9770 = vst [vmem:[#allocation40_spill] sm:$0xff] %v5634_v24  ;;  %v5709_v49 = vadd.s32 360, %v5565_v1  ;;  %v5712_v50 = vadd.s32 368, %v5565_v1  ;;  %v5715_v51 = vadd.s32 376, %v5565_v1 }
  0xb8   : > { %9771 = vst [vmem:[#allocation41_spill] sm:$0xff] %v5637_v25  ;;  %9772 = vst [vmem:[#allocation42_spill] sm:$0xff] %v5640_v26 }
  0xb9   : > { %9773 = vst [vmem:[#allocation43_spill] sm:$0xff] %v5643_v27  ;;  %9774 = vst [vmem:[#allocation44_spill] sm:$0xff] %v5646_v28 }
  0xba   : > { %9775 = vst [vmem:[#allocation45_spill] sm:$0xff] %v5649_v29  ;;  %9776 = vst [vmem:[#allocation46_spill] sm:$0xff] %v5652_v30 }
  0xbb   : > { %9777 = vst [vmem:[#allocation47_spill] sm:$0xff] %v5655_v31  ;;  %9778 = vst [vmem:[#allocation48_spill] sm:$0xff] %v5658_v32 }
  0xbc   : > { %9779 = vst [vmem:[#allocation49_spill] sm:$0xff] %v5661_v33  ;;  %9780 = vst [vmem:[#allocation50_spill] sm:$0xff] %v5664_v34 }
  0xbd   : > { %9781 = vst [vmem:[#allocation51_spill] sm:$0xff] %v5667_v35  ;;  %9782 = vst [vmem:[#allocation52_spill] sm:$0xff] %v5670_v36 }
  0xbe   : > { %9783 = vst [vmem:[#allocation53_spill] sm:$0xff] %v5673_v37  ;;  %9784 = vst [vmem:[#allocation54_spill] sm:$0xff] %v5676_v38 }
  0xbf   : > { %9785 = vst [vmem:[#allocation55_spill] sm:$0xff] %v5679_v39  ;;  %9786 = vst [vmem:[#allocation56_spill] sm:$0xff] %v5682_v40 }
  0xc0   : > { %9787 = vst [vmem:[#allocation57_spill] sm:$0xff] %v5685_v41  ;;  %9788 = vst [vmem:[#allocation58_spill] sm:$0xff] %v5688_v42 }
  0xc1   : > { %9789 = vst [vmem:[#allocation59_spill] sm:$0xff] %v5691_v43  ;;  %9790 = vst [vmem:[#allocation60_spill] sm:$0xff] %v5694_v44 }
  0xc2   : > { %9791 = vst [vmem:[#allocation61_spill] sm:$0xff] %v5697_v45  ;;  %9792 = vst [vmem:[#allocation62_spill] sm:$0xff] %v5700_v46 }
  0xc3   : > { %9793 = vst [vmem:[#allocation63_spill] sm:$0xff] %v5703_v47  ;;  %9794 = vst [vmem:[#allocation64_spill] sm:$0xff] %v5706_v48 }
  0xc4   : > { %9795 = vst [vmem:[#allocation65_spill] sm:$0xff] %v5709_v49  ;;  %9796 = vst [vmem:[#allocation66_spill] sm:$0xff] %v5712_v50 }
  0xc5   : > { %9797 = vst [vmem:[#allocation67_spill] sm:$0xff] %v5715_v51 }
  0xc6 LB: >> { %v9798_v35 = vld [vmem:[#allocation51_spill] sm:$0xff]  ;;  %v9799_v34 = vld [vmem:[#allocation50_spill] sm:$0xff]  ;;  %v9800_v33 = vld [vmem:[#allocation49_spill] sm:$0xff]  ;;  %s4272_s11 = sshll.u32 %s5286_s14, 1  ;;  %s4275_s13 = sshll.u32 %s5286_s14, 3  ;;  %s5286_s14 = sphi %s5721_s14, %s361_s14  }
  0xc7   : >> { %v9801_v32 = vld [vmem:[#allocation48_spill] sm:$0xff]  ;;  %v9802_v31 = vld [vmem:[#allocation47_spill] sm:$0xff]  ;;  %v9803_v30 = vld [vmem:[#allocation46_spill] sm:$0xff]  ;;  %s363_s0 = scalar_lea.vmem %s5545_s10, %s4272_s11 [#allocation6]  ;;  %s3395_s5 = sshra.s32 %s4275_s13, 3 }
  0xc8   : >> { %v9804_v29 = vld [vmem:[#allocation45_spill] sm:$0xff]  ;;  %v9805_v28 = vld [vmem:[#allocation44_spill] sm:$0xff]  ;;  %v9806_v27 = vld [vmem:[#allocation43_spill] sm:$0xff]  ;;  %s4285_s6 = sshll.u32 %s3395_s5, 4  ;;  %s361_s14 = sadd.s32 1, %s5286_s14  }
  0xc9   : >> { %v9807_v26 = vld [vmem:[#allocation42_spill] sm:$0xff]  ;;  %v9808_v25 = vld [vmem:[#allocation41_spill] sm:$0xff]  ;;  %v9809_v24 = vld [vmem:[#allocation40_spill] sm:$0xff]  ;;  %s3399_s30 = scalar_lea.vmem [#allocation2], %s4285_s6  ;;  %p358_p2 = scmp.ge.s32.totalorder %s361_s14, 9  }
  0xca   : >> { %v9810_v23 = vld [vmem:[#allocation39_spill] sm:$0xff]  ;;  %v9811_v22 = vld [vmem:[#allocation38_spill] sm:$0xff]  ;;  %v9812_v21 = vld [vmem:[#allocation37_spill] sm:$0xff]  ;;  %s4286_s22 = sshll.u32 (%p358_p2), %s5344_s19, 8  ;;  %s4121_s29 = sshll.u32 (%p358_p2), %s5719_s25, 4  ;;  %s9277_s29 = int_to_ptr.vmem [resolvable:$true] %s4121_s29 }
  0xcb   : >> { %v9813_v20 = vld [vmem:[#allocation36_spill] sm:$0xff]  ;;  %v9814_v19 = vld [vmem:[#allocation35_spill] sm:$0xff]  ;;  %v9815_v18 = vld [vmem:[#allocation34_spill] sm:$0xff]  ;;  %s9275_s1 = scalar_lea.hbm (%p358_p2), %s9325_s4, %s4286_s22  ;;  %s4107_s28 = scalar_lea.sflag (%p358_p2), [#allocation5], %s5533_s2 }
  0xcc   : >> { %v9816_v17 = vld [vmem:[#allocation33_spill] sm:$0xff]  ;;  %v9818_v12 = vld [vmem:[#allocation28_spill] sm:$0xff]  ;;  %v9819_v11 = vld [vmem:[#allocation27_spill] sm:$0xff]  ;;  %s5200_s20 = scalar_lea.vmem (%p358_p2), %s9277_s29, 256  ;;  %p10323_p4 = scmp.ne.s32.totalorder (%p358_p2), %s9729_s26, 0 }
  0xcd   : >> { %v9817_v13 = vld [vmem:[#allocation29_spill] sm:$0xff]  ;;  %v9820_v10 = vld [vmem:[#allocation26_spill] sm:$0xff]  ;;  %v9822_v8 = vld [vmem:[#allocation24_spill] sm:$0xff]  ;;  %p5201_p7 = scmp.ne.s32.totalorder (%p358_p2), %s9277_s29, %s5200_s20  ;;  %s5297_s19 = smov (%p358_p2), [#allocation11]  }
  0xce   : >> { %v9821_v9 = vld [vmem:[#allocation25_spill] sm:$0xff]  ;;  %v9823_v7 = vld [vmem:[#allocation23_spill] sm:$0xff]  ;;  %v9824_v6 = vld [vmem:[#allocation22_spill] sm:$0xff]  ;;  %s5204_s10 = sshll.u32 (%p358_p2), %s5297_s19, 4  ;;  %s5205_s10 = int_to_ptr.vmem [resolvable:$false] %s5204_s10 }
  0xcf   : >> { %v9825_v5 = vld [vmem:[#allocation21_spill] sm:$0xff]  ;;  %v9826_v4 = vld [vmem:[#allocation20_spill] sm:$0xff]  ;;  %v9827_v3 = vld [vmem:[#allocation19_spill] sm:$0xff]  ;;  %p5202_p8 = pnand (%p358_p2), %p5201_p7, %p10323_p4  ;;  %s5206_s7 = scalar_lea.vmem (%p358_p2), %s5205_s10, 512 }
  0xd0   : >> { %v9828_v2 = vld [vmem:[#allocation18_spill] sm:$0xff]  ;;  %v9829_v1 = vld [vmem:[#allocation17_spill] sm:$0xff]  ;;  %v364_v52 = vld [vmem:[%s363_s0] sm:$0x3]  ;;  %p5207_p0 = scmp.lt.s32.totalorder (%p358_p2), %s9277_s29, %s5205_s10  ;;  %p5208_p9 = scmp.lt.s32.totalorder (%p358_p2), %s5206_s7, %s5200_s20 }
  0xd1   : >> { %v4274_v53 = vld [vmem:[%s363_s0 + $0x12] sm:$0x3]  ;;  %v369_v54 = vfloor.f32 %v364_v52  ;;  %v417_v16 = vsub.s32 1, %v9829_v1  ;;  %v413_v49 = vsub.s32 0, %v9829_v1  ;;  %p5203_p13 = pneg (%p358_p2), %p5202_p8 }
  0xd2   : >> { %v370_v55 = vfloor.f32 %v4274_v53  ;;  %p5209_p1 = por (%p358_p2), %p5208_p9, %p5207_p0 }
  0xd3   : >> { %v371_v56 = vsub.f32 %v364_v52, %v369_v54  ;;  %v4998_v58 = vtrunc.f32 %v369_v54 }
  0xd4   : >> { %v372_v57 = vsub.f32 %v4274_v53, %v370_v55  ;;  %v5000_v59 = vtrunc.f32 %v370_v55  ;;  %p5210_p5 = pnand (%p358_p2), %p5209_p1, %p5203_p13 }
  0xd5   : >> { %v4999_v60 = vcvt.f32.s32 %v4998_v58  ;;  %v375_v62 = vsub.f32 1.0, %v371_v56 }
  0xd6   : >> { %v5001_v61 = vcvt.f32.s32 %v5000_v59  ;;  %v376_v63 = vsub.f32 1.0, %v372_v57  ;;  %v410_v0 = vmul.f32 %v372_v57, %v371_v56 }
  0xd7   : >> { %vm377_vm0 = vcmp.ge.s32.totalorder %v4999_v60, 0  ;;  %vm378_vm1 = vcmp.lt.s32.totalorder %v4999_v60, 18  ;;  %v384_v50 = vmul.u32 18, %v4999_v60  ;;  %v395_v54 = vmul.f32 %v375_v62, %v372_v57 }
  0xd8   : >> { %vm380_vm2 = vcmp.ge.s32.totalorder %v5001_v61, 0  ;;  %vm382_vm3 = vcmp.lt.s32.totalorder %v5001_v61, 18  ;;  %vm5729_vm4 = vmand %vm377_vm0, %vm378_vm1  ;;  %v387_v52 = vmul.f32 %v376_v63, %v375_v62  ;;  %v388_v53 = vadd.s32 1, %v5001_v61 }
  0xd9   : >> { %vm381_vm5 = vmand %vm5729_vm4, %vm380_vm2  ;;  %v396_v55 = vadd.s32 1, %v4999_v60  ;;  %v405_v58 = vmul.f32 %v376_v63, %v371_v56  ;;  %v5736_v59 = vrot.slane %v410_v0, %v417_v16  ;;  %v385_v48 = vadd.s32 %v5001_v61, %v384_v50 }
  0xda   : >> { %vm383_vm6 = vmand %vm381_vm5, %vm382_vm3  ;;  %vm389_vm7 = vcmp.ge.s32.totalorder %v388_v53, 0  ;;  %vm391_vm8 = vcmp.lt.s32.totalorder %v388_v53, 18  ;;  %v393_v47 = vadd.s32 %v388_v53, %v384_v50  ;;  %v5743_v62 = vrot.slane %v410_v0, %v413_v49 }
  0xdb   : >> { %9832 = vst [vmem:[#allocation68_spill] sm:$0xff] %v5736_v59  ;;  %vm390_vm9 = vmand %vm5729_vm4, %vm389_vm7  ;;  %vm397_vm10 = vcmp.ge.s32.totalorder %v396_v55, 0  ;;  %vm398_vm11 = vcmp.lt.s32.totalorder %v396_v55, 18  ;;  %v402_v57 = vmul.u32 18, %v396_v55  ;;  %v386_v56 = vsel %vm383_vm6, %v385_v48, 4294967295 }
  0xdc   : >> { %9833 = vst [vmem:[#allocation69_spill] sm:$0xff] %v5743_v62  ;;  %vm392_vm12 = vmand %vm390_vm9, %vm391_vm8  ;;  %v5746_v60 = vrot.slane %v387_v52, %v417_v16  ;;  %v5748_v63 = vrot.slane %v395_v54, %v417_v16  ;;  %v5750_v46 = vrot.slane %v405_v58, %v417_v16  ;;  %v5756_v44 = vrot.slane %v386_v56, %v417_v16 }
  0xdd   : >> { %v394_v45 = vsel %vm392_vm12, %v393_v47, 4294967295  ;;  %vm5752_vm13 = vmand %vm397_vm10, %vm398_vm11  ;;  %v403_v51 = vadd.s32 %v5001_v61, %v402_v57  ;;  %v5758_v55 = vrot.slane %v387_v52, %v413_v49  ;;  %v408_v48 = vadd.s32 %v402_v57, %v388_v53 }
  0xde   : >> { %9834 = vst [vmem:[#allocation70_spill] sm:$0xff] %v5748_v63  ;;  %9835 = vst [vmem:[#allocation71_spill] sm:$0xff] %v5750_v46  ;;  %v5763_v0 = vrot.slane %v394_v45, %v417_v16  ;;  %v5765_v43 = vrot.slane %v394_v45, %v413_v49  ;;  %v5767_v42 = vrot.slane %v386_v56, %v413_v49 }
  0xdf   : >> { %9838 = vst [vmem:[#allocation72_spill] sm:$0xff] %v5758_v55  ;;  %vm400_vm14 = vmand %vm5752_vm13, %vm380_vm2  ;;  %vm732_vm0 = vcmp.eq.s32.totalorder %v9829_v1, %v5756_v44  ;;  %vm734_vm1 = vcmp.eq.s32.totalorder %v9828_v2, %v5756_v44  ;;  %v5774_v47 = vrot.slane %v395_v54, %v413_v49  ;;  %v5776_v52 = vrot.slane %v405_v58, %v413_v49 }
  0xe0   : >> { %9839 = vst [vmem:[#allocation73_spill] sm:$0xff] %v5765_v43  ;;  %9840 = vst [vmem:[#allocation74_spill] sm:$0xff] %v5767_v42  ;;  %vm628_vm4 = vcmp.eq.s32.totalorder %v9829_v1, %v5763_v0  ;;  %v839_v45 = vsel %vm732_vm0, %v5746_v60, 0.0  ;;  %v841_v54 = vsel %vm734_vm1, %v5746_v60, 0.0  ;;  %vm736_vm6 = vcmp.eq.s32.totalorder %v9827_v3, %v5756_v44 }
  0xe1   : >> { %vm401_vm15 = vmand %vm400_vm14, %vm382_vm3  ;;  %9841 = vst [vmem:[#allocation75_spill] sm:$0xff] %v5774_v47  ;;  %vm630_vm3 = vcmp.eq.s32.totalorder %v9828_v2, %v5763_v0  ;;  %v946_v58 = vsel %vm628_vm4, %v5748_v63, %v839_v45  ;;  %vm731_vm1 = vcmp.eq.s32.totalorder %v9829_v1, %v5767_v42 }
  0xe2   : >> { %9842 = vst [vmem:[#allocation76_spill] sm:$0xff] %v5776_v52  ;;  %v404_v41 = vsel %vm401_vm15, %v403_v51, 4294967295  ;;  %vm406_vm2 = vmand %vm5752_vm13, %vm389_vm7  ;;  %v948_v50 = vsel %vm630_vm3, %v5748_v63, %v841_v54  ;;  %vm627_vm7 = vcmp.eq.s32.totalorder %v9829_v1, %v5765_v43 }
  0xe3   : >> { %vm407_vm5 = vmand %vm406_vm2, %vm391_vm8  ;;  %v5787_v61 = vrot.slane %v404_v41, %v417_v16  ;;  %v5791_v57 = vrot.slane %v404_v41, %v413_v49  ;;  %vm629_vm8 = vcmp.eq.s32.totalorder %v9828_v2, %v5765_v43  ;;  %vm733_vm2 = vcmp.eq.s32.totalorder %v9828_v2, %v5767_v42 }
  0xe4   : >> { %v409_v56 = vsel %vm407_vm5, %v408_v48, 4294967295 }
  0xe5   : >> { %9843 = vst [vmem:[#allocation77_spill] sm:$0xff] %v5791_v57  ;;  %v5800_v53 = vrot.slane %v409_v56, %v417_v16  ;;  %vm524_vm9 = vcmp.eq.s32.totalorder %v9829_v1, %v5787_v61  ;;  %vm526_vm10 = vcmp.eq.s32.totalorder %v9828_v2, %v5787_v61  ;;  %v5806_v41 = vrot.slane %v409_v56, %v413_v49 }
  0xe6   : >> { %v1053_v51 = vsel %vm524_vm9, %v5750_v46, %v946_v58  ;;  %v1055_v48 = vsel %vm526_vm10, %v5750_v46, %v948_v50  ;;  %vm523_vm11 = vcmp.eq.s32.totalorder %v9829_v1, %v5791_v57  ;;  %vm525_vm12 = vcmp.eq.s32.totalorder %v9828_v2, %v5791_v57 }
  0xe7   : >> { %vm420_vm13 = vcmp.eq.s32.totalorder %v9829_v1, %v5800_v53  ;;  %vm422_vm14 = vcmp.eq.s32.totalorder %v9828_v2, %v5800_v53  ;;  %vm419_vm15 = vcmp.eq.s32.totalorder %v9829_v1, %v5806_v41  ;;  %vm421_vm0 = vcmp.eq.s32.totalorder %v9828_v2, %v5806_v41 }
  0xe8   : >> { %v1160_v16 = vsel %vm420_vm13, %v5736_v59, %v1053_v51  ;;  %v1162_v49 = vsel %vm422_vm14, %v5736_v59, %v1055_v48  ;;  %v838_v58 = vsel %vm731_vm1, %v5758_v55, 0.0  ;;  %v840_v56 = vsel %vm733_vm2, %v5758_v55, 0.0 }
  0xe9   : >> { %v1255_v45 = vand.u32 4294901760, %v1160_v16  ;;  %v1259_v54 = vand.u32 4294901760, %v1162_v49  ;;  %v945_v50 = vsel %vm627_vm7, %v5774_v47, %v838_v58  ;;  %v947_v51 = vsel %vm629_vm8, %v5774_v47, %v840_v56 }
  0xea   : >> { %vm424_vm4 = vcmp.eq.s32.totalorder %v9827_v3, %v5800_v53  ;;  %vm426_vm3 = vcmp.eq.s32.totalorder %v9826_v4, %v5800_v53  ;;  %v1052_v40 = vsel %vm523_vm11, %v5776_v52, %v945_v50  ;;  %v1054_v58 = vsel %vm525_vm12, %v5776_v52, %v947_v51 }
  0xeb   : >> { %v5842_v48 = vpack.c.bf16 %v1259_v54, %v1255_v45  ;;  %vm528_vm5 = vcmp.eq.s32.totalorder %v9827_v3, %v5787_v61  ;;  %v1159_v56 = vsel %vm419_vm15, %v5743_v62, %v1052_v40  ;;  %v1161_v39 = vsel %vm421_vm0, %v5743_v62, %v1054_v58 }
  0xec   : >> { %vm530_vm7 = vcmp.eq.s32.totalorder %v9826_v4, %v5787_v61  ;;  %vm632_vm8 = vcmp.eq.s32.totalorder %v9827_v3, %v5763_v0  ;;  %v1257_v50 = vand.u32 4294901760, %v1159_v56  ;;  %v1261_v51 = vand.u32 4294901760, %v1161_v39 }
  0xed   : >> { %9844 = vst [vmem:[#allocation78_spill] sm:$0xff] %v5842_v48  ;;  %4288 = vmatprep.subr.bf16.mxu1 %v5842_v48  ;;  %vm634_vm9 = vcmp.eq.s32.totalorder %v9826_v4, %v5763_v0  ;;  %vm738_vm10 = vcmp.eq.s32.totalorder %v9826_v4, %v5756_v44  ;;  %v843_v40 = vsel %vm736_vm6, %v5746_v60, 0.0  ;;  %v5876_v1 = vsub.f32 %v1160_v16, %v1255_v45 }
  0xee   : >> { %v845_v58 = vsel %vm738_vm10, %v5746_v60, 0.0  ;;  %v5878_v2 = vsub.f32 %v1162_v49, %v1259_v54  ;;  %v5880_v38 = vpack.c.bf16 %v1261_v51, %v1257_v50  ;;  %v950_v37 = vsel %vm632_vm8, %v5748_v63, %v843_v40 }
  0xef   : >> { %9845 = vst [vmem:[#allocation79_spill] sm:$0xff] %v5876_v1  ;;  %v952_v36 = vsel %vm634_vm9, %v5748_v63, %v845_v58  ;;  %vm423_vm11 = vcmp.eq.s32.totalorder %v9827_v3, %v5806_v41  ;;  %v1057_v48 = vsel %vm528_vm5, %v5750_v46, %v950_v37  ;;  %v1402_v49 = vand.u32 4294901760, %v5876_v1 }
  0xf0   : >> { %9846 = vst [vmem:[#allocation80_spill] sm:$0xff] %v5878_v2  ;;  %9847 = vst [vmem:[#allocation81_spill] sm:$0xff] %v5880_v38  ;;  %v1059_v16 = vsel %vm530_vm7, %v5750_v46, %v952_v36  ;;  %v1414_v45 = vand.u32 4294901760, %v5878_v2  ;;  %4290 = vmatpush1.bf16.msra.mxu1 %v5880_v38  ;;  %v1164_v54 = vsel %vm424_vm4, %v5736_v59, %v1057_v48 }
  0xf1   : >> { %v1166_v37 = vsel %vm426_vm3, %v5736_v59, %v1059_v16  ;;  %vm425_vm6 = vcmp.eq.s32.totalorder %v9826_v4, %v5806_v41  ;;  %vm527_vm12 = vcmp.eq.s32.totalorder %v9827_v3, %v5791_v57  ;;  %v1263_v36 = vand.u32 4294901760, %v1164_v54 }
  0xf2   : >> { %v1267_v40 = vand.u32 4294901760, %v1166_v37  ;;  %v5910_v58 = vsub.f32 %v5876_v1, %v1402_v49  ;;  %v5913_v38 = vsub.f32 %v5878_v2, %v1414_v45  ;;  %v4543_v48 = vpack.c.bf16 %v1414_v45, %v1402_v49 }
  0xf3   : >> { %vm529_vm13 = vcmp.eq.s32.totalorder %v9826_v4, %v5791_v57  ;;  %vm631_vm14 = vcmp.eq.s32.totalorder %v9827_v3, %v5765_v43  ;;  %vm633_vm15 = vcmp.eq.s32.totalorder %v9826_v4, %v5765_v43  ;;  %v5923_v14 = vsub.f32 %v1164_v54, %v1263_v36 }
  0xf4   : >> { %v5921_v16 = vpack.c.bf16 %v1267_v40, %v1263_v36  ;;  %v5925_v15 = vsub.f32 %v1166_v37, %v1267_v40  ;;  %4544 = vmatprep.subr.bf16.mxu0 %v4543_v48  ;;  %vm735_vm0 = vcmp.eq.s32.totalorder %v9827_v3, %v5767_v42  ;;  %vm737_vm1 = vcmp.eq.s32.totalorder %v9826_v4, %v5767_v42 }
  0xf5   : >> { %9849 = vst [vmem:[#allocation83_spill] sm:$0xff] %v5923_v14  ;;  %v5933_v49 = vsub.f32 %v1159_v56, %v1257_v50  ;;  %v842_v45 = vsel %vm735_vm0, %v5758_v55, 0.0  ;;  %v844_v54 = vsel %vm737_vm1, %v5758_v55, 0.0  ;;  %v5938_v37 = vsub.f32 %v1161_v39, %v1261_v51 }
  0xf6   : >> { %9848 = vst [vmem:[#allocation82_spill] sm:$0xff] %v5921_v16  ;;  %9850 = vst [vmem:[#allocation84_spill] sm:$0xff] %v5925_v15  ;;  %4292 = vmatprep.subr.bf16.mxu1 %v5921_v16  ;;  %vm428_vm2 = vcmp.eq.s32.totalorder %v9825_v5, %v5800_v53  ;;  %v949_v36 = vsel %vm631_vm14, %v5774_v47, %v842_v45  ;;  %v951_v56 = vsel %vm633_vm15, %v5774_v47, %v844_v54 }
  0xf7   : >> { %9851 = vst [vmem:[#allocation85_spill] sm:$0xff] %v5933_v49  ;;  %9852 = vst [vmem:[#allocation86_spill] sm:$0xff] %v5938_v37  ;;  %v1408_v50 = vand.u32 4294901760, %v5933_v49  ;;  %vm430_vm4 = vcmp.eq.s32.totalorder %v9824_v6, %v5800_v53  ;;  %v1056_v39 = vsel %vm527_vm12, %v5776_v52, %v949_v36  ;;  %v1058_v51 = vsel %vm529_vm13, %v5776_v52, %v951_v56 }
  0xf8   : >> { %v1420_v40 = vand.u32 4294901760, %v5938_v37  ;;  %vm532_vm3 = vcmp.eq.s32.totalorder %v9825_v5, %v5787_v61  ;;  %v1163_v48 = vsel %vm423_vm11, %v5743_v62, %v1056_v39  ;;  %v1165_v45 = vsel %vm425_vm6, %v5743_v62, %v1058_v51 }
  0xf9   : >> { %v5973_v54 = vsub.f32 %v5933_v49, %v1408_v50  ;;  %vm534_vm5 = vcmp.eq.s32.totalorder %v9824_v6, %v5787_v61  ;;  %v1265_v36 = vand.u32 4294901760, %v1163_v48  ;;  %v1269_v56 = vand.u32 4294901760, %v1165_v45 }
  0xfa   : >> { %v5978_v2 = vsub.f32 %v5938_v37, %v1420_v40  ;;  %v4545_v1 = vpack.c.bf16 %v1420_v40, %v1408_v50  ;;  %vm636_vm7 = vcmp.eq.s32.totalorder %v9825_v5, %v5763_v0  ;;  %vm638_vm8 = vcmp.eq.s32.totalorder %v9824_v6, %v5763_v0 }
  0xfb   : >> { %vm740_vm9 = vcmp.eq.s32.totalorder %v9825_v5, %v5756_v44  ;;  %v5987_v39 = vpack.c.bf16 %v1269_v56, %v1265_v36  ;;  %v5989_v51 = vsub.f32 %v1163_v48, %v1265_v36  ;;  %v5991_v4 = vsub.f32 %v1165_v45, %v1269_v56 }
  0xfc   : >> { %4546 = vmatpush1.bf16.msra.mxu0 %v4545_v1  ;;  %vm742_vm10 = vcmp.eq.s32.totalorder %v9824_v6, %v5756_v44  ;;  %v847_v50 = vsel %vm740_vm9, %v5746_v60, 0.0  ;;  %v9368_v40 = vand.u32 4294901760, %v5923_v14  ;;  %v9367_v3 = vand.u32 4294901760, %v5925_v15 }
  0xfd   : >> { %9853 = vst [vmem:[#allocation87_spill] sm:$0xff] %v5987_v39  ;;  %9854 = vst [vmem:[#allocation88_spill] sm:$0xff] %v5989_v51  ;;  %4294 = vmatpush1.bf16.msra.mxu1 %v5987_v39  ;;  %v849_v49 = vsel %vm742_vm10, %v5746_v60, 0.0  ;;  %v954_v48 = vsel %vm636_vm7, %v5748_v63, %v847_v50  ;;  %vm427_vm11 = vcmp.eq.s32.totalorder %v9825_v5, %v5806_v41  ;;  %v1444_v37 = vand.u32 4294901760, %v5991_v4 }
  0xfe   : >> { %9855 = vst [vmem:[#allocation89_spill] sm:$0xff] %v5991_v4  ;;  %vm429_vm6 = vcmp.eq.s32.totalorder %v9824_v6, %v5806_v41  ;;  %v956_v1 = vsel %vm638_vm8, %v5748_v63, %v849_v49  ;;  %v1061_v45 = vsel %vm532_vm3, %v5750_v46, %v954_v48  ;;  %v4547_v36 = vpack.c.bf16 %v9367_v3, %v9368_v40 }
  0xff   : >> { %vm531_vm12 = vcmp.eq.s32.totalorder %v9825_v5, %v5791_v57  ;;  %v1063_v56 = vsel %vm534_vm5, %v5750_v46, %v956_v1  ;;  %v1168_v49 = vsel %vm428_vm2, %v5736_v59, %v1061_v45  ;;  %vm533_vm13 = vcmp.eq.s32.totalorder %v9824_v6, %v5791_v57 }
 0x100   : >> { %vm635_vm14 = vcmp.eq.s32.totalorder %v9825_v5, %v5765_v43  ;;  %v1170_v50 = vsel %vm430_vm4, %v5736_v59, %v1063_v56  ;;  %v1271_v48 = vand.u32 4294901760, %v1168_v49  ;;  %4548 = vmatprep.subr.bf16.mxu0 %v4547_v36  ;;  %vm637_vm15 = vcmp.eq.s32.totalorder %v9824_v6, %v5765_v43 }
 0x101   : >> { %vm739_vm0 = vcmp.eq.s32.totalorder %v9825_v5, %v5767_v42  ;;  %v1275_v1 = vand.u32 4294901760, %v1170_v50  ;;  %vm741_vm1 = vcmp.eq.s32.totalorder %v9824_v6, %v5767_v42  ;;  %v1432_v3 = vand.u32 4294901760, %v5989_v51 }
 0x102   : >> { %v846_v45 = vsel %vm739_vm0, %v5758_v55, 0.0  ;;  %v6044_v40 = vsub.f32 %v1168_v49, %v1271_v48  ;;  %v848_v56 = vsel %vm741_vm1, %v5758_v55, 0.0  ;;  %vm432_vm2 = vcmp.eq.s32.totalorder %v9823_v7, %v5800_v53 }
 0x103   : >> { %v953_v36 = vsel %vm635_vm14, %v5774_v47, %v846_v45  ;;  %v6049_v39 = vpack.c.bf16 %v1275_v1, %v1271_v48  ;;  %v6051_v16 = vsub.f32 %v1170_v50, %v1275_v1  ;;  %v955_v15 = vsel %vm637_vm15, %v5774_v47, %v848_v56 }
 0x104   : >> { %9856 = vst [vmem:[#allocation90_spill] sm:$0xff] %v6044_v40  ;;  %v1060_v14 = vsel %vm531_vm12, %v5776_v52, %v953_v36  ;;  %v1062_v49 = vsel %vm533_vm13, %v5776_v52, %v955_v15  ;;  %v6067_v50 = vsub.f32 %v5989_v51, %v1432_v3  ;;  %v6070_v1 = vsub.f32 %v5991_v4, %v1444_v37 }
 0x105   : >> { %9857 = vst [vmem:[#allocation91_spill] sm:$0xff] %v6049_v39  ;;  %9858 = vst [vmem:[#allocation92_spill] sm:$0xff] %v6051_v16  ;;  %v1167_v48 = vsel %vm427_vm11, %v5743_v62, %v1060_v14  ;;  %4296 = vmatprep.subr.bf16.mxu1 %v6049_v39  ;;  %v1169_v45 = vsel %vm429_vm6, %v5743_v62, %v1062_v49  ;;  %v4549_v15 = vpack.c.bf16 %v1444_v37, %v1432_v3 }
 0x106   : >> { %v1273_v56 = vand.u32 4294901760, %v1167_v48  ;;  %v1277_v36 = vand.u32 4294901760, %v1169_v45  ;;  %vm434_vm4 = vcmp.eq.s32.totalorder %v9822_v8, %v5800_v53  ;;  %vm536_vm3 = vcmp.eq.s32.totalorder %v9823_v7, %v5787_v61 }
 0x107   : >> { %4550 = vmatpush1.bf16.msra.mxu0 %v4549_v15  ;;  %vm538_vm5 = vcmp.eq.s32.totalorder %v9822_v8, %v5787_v61  ;;  %vm640_vm7 = vcmp.eq.s32.totalorder %v9823_v7, %v5763_v0  ;;  %vm642_vm8 = vcmp.eq.s32.totalorder %v9822_v8, %v5763_v0  ;;  %vm744_vm9 = vcmp.eq.s32.totalorder %v9823_v7, %v5756_v44 }
 0x108   : >> { %v6083_v4 = vsub.f32 %v1167_v48, %v1273_v56  ;;  %v6091_v3 = vpack.c.bf16 %v1277_v36, %v1273_v56  ;;  %v6093_v37 = vsub.f32 %v1169_v45, %v1277_v36  ;;  %vm746_vm10 = vcmp.eq.s32.totalorder %v9822_v8, %v5756_v44 }
 0x109   : >> { %v851_v49 = vsel %vm744_vm9, %v5746_v60, 0.0  ;;  %v9381_v48 = vand.u32 4294901760, %v6044_v40  ;;  %v9380_v15 = vand.u32 4294901760, %v6051_v16  ;;  %v853_v45 = vsel %vm746_vm10, %v5746_v60, 0.0 }
 0x10a   : >> { %9859 = vst [vmem:[#allocation93_spill] sm:$0xff] %v6083_v4  ;;  %9860 = vst [vmem:[#allocation94_spill] sm:$0xff] %v6091_v3  ;;  %4298 = vmatpush1.bf16.msra.mxu1 %v6091_v3  ;;  %v958_v56 = vsel %vm640_vm7, %v5748_v63, %v851_v49  ;;  %vm431_vm11 = vcmp.eq.s32.totalorder %v9823_v7, %v5806_v41  ;;  %vm433_vm6 = vcmp.eq.s32.totalorder %v9822_v8, %v5806_v41 }
 0x10b   : >> { %9861 = vst [vmem:[#allocation95_spill] sm:$0xff] %v6093_v37  ;;  %v960_v36 = vsel %vm642_vm8, %v5748_v63, %v853_v45  ;;  %v1065_v5 = vsel %vm536_vm3, %v5750_v46, %v958_v56  ;;  %v4551_v14 = vpack.c.bf16 %v9380_v15, %v9381_v48  ;;  %vm535_vm12 = vcmp.eq.s32.totalorder %v9823_v7, %v5791_v57 }
 0x10c   : >> { %v1067_v49 = vsel %vm538_vm5, %v5750_v46, %v960_v36  ;;  %v1172_v45 = vsel %vm432_vm2, %v5736_v59, %v1065_v5  ;;  %vm537_vm13 = vcmp.eq.s32.totalorder %v9822_v8, %v5791_v57  ;;  %vm639_vm14 = vcmp.eq.s32.totalorder %v9823_v7, %v5765_v43 }
 0x10d   : >> { %v1174_v56 = vsel %vm434_vm4, %v5736_v59, %v1067_v49  ;;  %v1279_v15 = vand.u32 4294901760, %v1172_v45  ;;  %4552 = vmatprep.subr.bf16.mxu0 %v4551_v14  ;;  %vm641_vm15 = vcmp.eq.s32.totalorder %v9822_v8, %v5765_v43  ;;  %vm743_vm0 = vcmp.eq.s32.totalorder %v9823_v7, %v5767_v42 }
 0x10e   : >> { %v1283_v5 = vand.u32 4294901760, %v1174_v56  ;;  %vm745_vm1 = vcmp.eq.s32.totalorder %v9822_v8, %v5767_v42  ;;  %v850_v36 = vsel %vm743_vm0, %v5758_v55, 0.0  ;;  %v1456_v48 = vand.u32 4294901760, %v6083_v4 }
 0x10f   : >> { %v6146_v6 = vsub.f32 %v1172_v45, %v1279_v15  ;;  %v852_v49 = vsel %vm745_vm1, %v5758_v55, 0.0  ;;  %v957_v14 = vsel %vm639_vm14, %v5774_v47, %v850_v36  ;;  %v1468_v51 = vand.u32 4294901760, %v6093_v37 }
 0x110   : >> { %v6151_v3 = vpack.c.bf16 %v1283_v5, %v1279_v15  ;;  %v6153_v39 = vsub.f32 %v1174_v56, %v1283_v5  ;;  %v959_v16 = vsel %vm641_vm15, %v5774_v47, %v852_v49  ;;  %v1064_v40 = vsel %vm535_vm12, %v5776_v52, %v957_v14 }
 0x111   : >> { %9862 = vst [vmem:[#allocation96_spill] sm:$0xff] %v6146_v6  ;;  %v1066_v45 = vsel %vm537_vm13, %v5776_v52, %v959_v16  ;;  %v1171_v15 = vsel %vm431_vm11, %v5743_v62, %v1064_v40  ;;  %v6169_v56 = vsub.f32 %v6083_v4, %v1456_v48  ;;  %v6172_v5 = vsub.f32 %v6093_v37, %v1468_v51 }
 0x112   : >> { %9863 = vst [vmem:[#allocation97_spill] sm:$0xff] %v6151_v3  ;;  %9864 = vst [vmem:[#allocation98_spill] sm:$0xff] %v6153_v39  ;;  %4300 = vmatprep.subr.bf16.mxu1 %v6151_v3  ;;  %v1173_v36 = vsel %vm433_vm6, %v5743_v62, %v1066_v45  ;;  %v1281_v49 = vand.u32 4294901760, %v1171_v15  ;;  %v4553_v16 = vpack.c.bf16 %v1468_v51, %v1456_v48 }
 0x113   : >> { %vm436_vm2 = vcmp.eq.s32.totalorder %v9821_v9, %v5800_v53  ;;  %v1285_v14 = vand.u32 4294901760, %v1173_v36  ;;  %vm438_vm4 = vcmp.eq.s32.totalorder %v9820_v10, %v5800_v53  ;;  %vm540_vm3 = vcmp.eq.s32.totalorder %v9821_v9, %v5787_v61 }
 0x114   : >> { %v6185_v37 = vsub.f32 %v1171_v15, %v1281_v49  ;;  %4554 = vmatpush1.bf16.msra.mxu0 %v4553_v16  ;;  %vm542_vm5 = vcmp.eq.s32.totalorder %v9820_v10, %v5787_v61  ;;  %vm644_vm7 = vcmp.eq.s32.totalorder %v9821_v9, %v5763_v0  ;;  %vm646_vm8 = vcmp.eq.s32.totalorder %v9820_v10, %v5763_v0 }
 0x115   : >> { %v6193_v51 = vpack.c.bf16 %v1285_v14, %v1281_v49  ;;  %v6195_v48 = vsub.f32 %v1173_v36, %v1285_v14  ;;  %vm748_vm9 = vcmp.eq.s32.totalorder %v9821_v9, %v5756_v44  ;;  %vm750_vm10 = vcmp.eq.s32.totalorder %v9820_v10, %v5756_v44 }
 0x116   : >> { %9865 = vst [vmem:[#allocation99_spill] sm:$0xff] %v6185_v37  ;;  %v855_v45 = vsel %vm748_vm9, %v5746_v60, 0.0  ;;  %v9397_v15 = vand.u32 4294901760, %v6146_v6  ;;  %v9396_v16 = vand.u32 4294901760, %v6153_v39  ;;  %v857_v36 = vsel %vm750_vm10, %v5746_v60, 0.0 }
 0x117   : >> { %9866 = vst [vmem:[#allocation100_spill] sm:$0xff] %v6193_v51  ;;  %9867 = vst [vmem:[#allocation101_spill] sm:$0xff] %v6195_v48  ;;  %4302 = vmatpush1.bf16.msra.mxu1 %v6193_v51  ;;  %v962_v49 = vsel %vm644_vm7, %v5748_v63, %v855_v45  ;;  %vm435_vm11 = vcmp.eq.s32.totalorder %v9821_v9, %v5806_v41  ;;  %vm437_vm6 = vcmp.eq.s32.totalorder %v9820_v10, %v5806_v41 }
 0x118   : >> { %v964_v14 = vsel %vm646_vm8, %v5748_v63, %v857_v36  ;;  %v1069_v7 = vsel %vm540_vm3, %v5750_v46, %v962_v49  ;;  %v4555_v40 = vpack.c.bf16 %v9396_v16, %v9397_v15  ;;  %vm539_vm12 = vcmp.eq.s32.totalorder %v9821_v9, %v5791_v57 }
 0x119   : >> { %v1071_v45 = vsel %vm542_vm5, %v5750_v46, %v964_v14  ;;  %v1176_v36 = vsel %vm436_vm2, %v5736_v59, %v1069_v7  ;;  %vm541_vm13 = vcmp.eq.s32.totalorder %v9820_v10, %v5791_v57  ;;  %vm643_vm14 = vcmp.eq.s32.totalorder %v9821_v9, %v5765_v43 }
 0x11a   : >> { %v1178_v49 = vsel %vm438_vm4, %v5736_v59, %v1071_v45  ;;  %v1287_v16 = vand.u32 4294901760, %v1176_v36  ;;  %4556 = vmatprep.subr.bf16.mxu0 %v4555_v40  ;;  %vm645_vm15 = vcmp.eq.s32.totalorder %v9820_v10, %v5765_v43  ;;  %vm747_vm0 = vcmp.eq.s32.totalorder %v9821_v9, %v5767_v42 }
 0x11b   : >> { %v1291_v7 = vand.u32 4294901760, %v1178_v49  ;;  %vm749_vm1 = vcmp.eq.s32.totalorder %v9820_v10, %v5767_v42  ;;  %v854_v14 = vsel %vm747_vm0, %v5758_v55, 0.0  ;;  %v1480_v15 = vand.u32 4294901760, %v6185_v37 }
 0x11c   : >> { %v6248_v8 = vsub.f32 %v1176_v36, %v1287_v16  ;;  %v856_v45 = vsel %vm749_vm1, %v5758_v55, 0.0  ;;  %v961_v40 = vsel %vm643_vm14, %v5774_v47, %v854_v14  ;;  %v1492_v4 = vand.u32 4294901760, %v6195_v48 }
 0x11d   : >> { %v6253_v51 = vpack.c.bf16 %v1291_v7, %v1287_v16  ;;  %v6255_v3 = vsub.f32 %v1178_v49, %v1291_v7  ;;  %v963_v39 = vsel %vm645_vm15, %v5774_v47, %v856_v45  ;;  %v1068_v6 = vsel %vm539_vm12, %v5776_v52, %v961_v40 }
 0x11e   : >> { %9868 = vst [vmem:[#allocation102_spill] sm:$0xff] %v6248_v8  ;;  %v1070_v36 = vsel %vm541_vm13, %v5776_v52, %v963_v39  ;;  %v1175_v16 = vsel %vm435_vm11, %v5743_v62, %v1068_v6  ;;  %v6271_v49 = vsub.f32 %v6185_v37, %v1480_v15  ;;  %v6274_v7 = vsub.f32 %v6195_v48, %v1492_v4 }
 0x11f   : >> { %9869 = vst [vmem:[#allocation103_spill] sm:$0xff] %v6253_v51  ;;  %9870 = vst [vmem:[#allocation104_spill] sm:$0xff] %v6255_v3  ;;  %4304 = vmatprep.subr.bf16.mxu1 %v6253_v51  ;;  %v1177_v14 = vsel %vm437_vm6, %v5743_v62, %v1070_v36  ;;  %v1289_v45 = vand.u32 4294901760, %v1175_v16  ;;  %v4557_v39 = vpack.c.bf16 %v1492_v4, %v1480_v15 }
 0x120   : >> { %vm440_vm2 = vcmp.eq.s32.totalorder %v9819_v11, %v5800_v53  ;;  %v1293_v40 = vand.u32 4294901760, %v1177_v14  ;;  %vm442_vm4 = vcmp.eq.s32.totalorder %v9818_v12, %v5800_v53  ;;  %vm544_vm3 = vcmp.eq.s32.totalorder %v9819_v11, %v5787_v61 }
 0x121   : >> { %v6287_v48 = vsub.f32 %v1175_v16, %v1289_v45  ;;  %4558 = vmatpush1.bf16.msra.mxu0 %v4557_v39  ;;  %vm546_vm5 = vcmp.eq.s32.totalorder %v9818_v12, %v5787_v61  ;;  %vm648_vm7 = vcmp.eq.s32.totalorder %v9819_v11, %v5763_v0  ;;  %vm650_vm8 = vcmp.eq.s32.totalorder %v9818_v12, %v5763_v0 }
 0x122   : >> { %v6295_v4 = vpack.c.bf16 %v1293_v40, %v1289_v45  ;;  %v6297_v15 = vsub.f32 %v1177_v14, %v1293_v40  ;;  %vm752_vm9 = vcmp.eq.s32.totalorder %v9819_v11, %v5756_v44  ;;  %vm754_vm10 = vcmp.eq.s32.totalorder %v9818_v12, %v5756_v44 }
 0x123   : >> { %9871 = vst [vmem:[#allocation105_spill] sm:$0xff] %v6287_v48  ;;  %v859_v36 = vsel %vm752_vm9, %v5746_v60, 0.0  ;;  %v9413_v16 = vand.u32 4294901760, %v6248_v8  ;;  %v9412_v39 = vand.u32 4294901760, %v6255_v3  ;;  %v861_v14 = vsel %vm754_vm10, %v5746_v60, 0.0 }
 0x124   : >> { %9872 = vst [vmem:[#allocation106_spill] sm:$0xff] %v6295_v4  ;;  %9873 = vst [vmem:[#allocation107_spill] sm:$0xff] %v6297_v15  ;;  %4306 = vmatpush1.bf16.msra.mxu1 %v6295_v4  ;;  %v966_v45 = vsel %vm648_vm7, %v5748_v63, %v859_v36  ;;  %vm439_vm11 = vcmp.eq.s32.totalorder %v9819_v11, %v5806_v41  ;;  %vm441_vm6 = vcmp.eq.s32.totalorder %v9818_v12, %v5806_v41 }
 0x125   : >> { %v968_v40 = vsel %vm650_vm8, %v5748_v63, %v861_v14  ;;  %v1073_v9 = vsel %vm544_vm3, %v5750_v46, %v966_v45  ;;  %v4559_v6 = vpack.c.bf16 %v9412_v39, %v9413_v16  ;;  %vm543_vm12 = vcmp.eq.s32.totalorder %v9819_v11, %v5791_v57 }
 0x126   : >> { %v1075_v36 = vsel %vm546_vm5, %v5750_v46, %v968_v40  ;;  %v1180_v14 = vsel %vm440_vm2, %v5736_v59, %v1073_v9  ;;  %vm545_vm13 = vcmp.eq.s32.totalorder %v9818_v12, %v5791_v57  ;;  %vm647_vm14 = vcmp.eq.s32.totalorder %v9819_v11, %v5765_v43 }
 0x127   : >> { %v1182_v45 = vsel %vm442_vm4, %v5736_v59, %v1075_v36  ;;  %v1295_v39 = vand.u32 4294901760, %v1180_v14  ;;  %4560 = vmatprep.subr.bf16.mxu0 %v4559_v6  ;;  %vm649_vm15 = vcmp.eq.s32.totalorder %v9818_v12, %v5765_v43  ;;  %vm751_vm0 = vcmp.eq.s32.totalorder %v9819_v11, %v5767_v42 }
 0x128   : >> { %v1299_v9 = vand.u32 4294901760, %v1182_v45  ;;  %vm753_vm1 = vcmp.eq.s32.totalorder %v9818_v12, %v5767_v42  ;;  %v858_v40 = vsel %vm751_vm0, %v5758_v55, 0.0  ;;  %v1504_v16 = vand.u32 4294901760, %v6287_v48 }
 0x129   : >> { %v6350_v10 = vsub.f32 %v1180_v14, %v1295_v39  ;;  %v860_v36 = vsel %vm753_vm1, %v5758_v55, 0.0  ;;  %v965_v6 = vsel %vm647_vm14, %v5774_v47, %v858_v40  ;;  %v1516_v37 = vand.u32 4294901760, %v6297_v15 }
 0x12a   : >> { %v6355_v4 = vpack.c.bf16 %v1299_v9, %v1295_v39  ;;  %v6357_v51 = vsub.f32 %v1182_v45, %v1299_v9  ;;  %v967_v3 = vsel %vm649_vm15, %v5774_v47, %v860_v36  ;;  %v1072_v8 = vsel %vm543_vm12, %v5776_v52, %v965_v6 }
 0x12b   : >> { %9874 = vst [vmem:[#allocation108_spill] sm:$0xff] %v6350_v10  ;;  %v1074_v14 = vsel %vm545_vm13, %v5776_v52, %v967_v3  ;;  %v1179_v39 = vsel %vm439_vm11, %v5743_v62, %v1072_v8  ;;  %v6373_v45 = vsub.f32 %v6287_v48, %v1504_v16  ;;  %v6376_v9 = vsub.f32 %v6297_v15, %v1516_v37 }
 0x12c   : >> { %9875 = vst [vmem:[#allocation109_spill] sm:$0xff] %v6355_v4  ;;  %9876 = vst [vmem:[#allocation110_spill] sm:$0xff] %v6357_v51  ;;  %4308 = vmatprep.subr.bf16.mxu1 %v6355_v4  ;;  %v1181_v40 = vsel %vm441_vm6, %v5743_v62, %v1074_v14  ;;  %v1297_v36 = vand.u32 4294901760, %v1179_v39  ;;  %v4561_v3 = vpack.c.bf16 %v1516_v37, %v1504_v16 }
 0x12d   : >> { %vm444_vm2 = vcmp.eq.s32.totalorder %v9817_v13, %v5800_v53  ;;  %v1301_v6 = vand.u32 4294901760, %v1181_v40  ;;  %vm446_vm4 = vcmp.eq.s32.totalorder %v9816_v17, %v5800_v53  ;;  %vm548_vm3 = vcmp.eq.s32.totalorder %v9817_v13, %v5787_v61 }
 0x12e   : >> { %v6389_v15 = vsub.f32 %v1179_v39, %v1297_v36  ;;  %4562 = vmatpush1.bf16.msra.mxu0 %v4561_v3  ;;  %vm550_vm5 = vcmp.eq.s32.totalorder %v9816_v17, %v5787_v61  ;;  %vm652_vm7 = vcmp.eq.s32.totalorder %v9817_v13, %v5763_v0  ;;  %vm654_vm8 = vcmp.eq.s32.totalorder %v9816_v17, %v5763_v0 }
 0x12f   : >> { %v6397_v37 = vpack.c.bf16 %v1301_v6, %v1297_v36  ;;  %v6399_v16 = vsub.f32 %v1181_v40, %v1301_v6  ;;  %vm756_vm9 = vcmp.eq.s32.totalorder %v9817_v13, %v5756_v44  ;;  %vm758_vm10 = vcmp.eq.s32.totalorder %v9816_v17, %v5756_v44 }
 0x130   : >> { %9877 = vst [vmem:[#allocation111_spill] sm:$0xff] %v6389_v15  ;;  %v863_v14 = vsel %vm756_vm9, %v5746_v60, 0.0  ;;  %v9429_v39 = vand.u32 4294901760, %v6350_v10  ;;  %v9428_v3 = vand.u32 4294901760, %v6357_v51  ;;  %v865_v40 = vsel %vm758_vm10, %v5746_v60, 0.0 }
 0x131   : >> { %9878 = vst [vmem:[#allocation112_spill] sm:$0xff] %v6397_v37  ;;  %9879 = vst [vmem:[#allocation113_spill] sm:$0xff] %v6399_v16  ;;  %4310 = vmatpush1.bf16.msra.mxu1 %v6397_v37  ;;  %v970_v36 = vsel %vm652_vm7, %v5748_v63, %v863_v14  ;;  %vm443_vm11 = vcmp.eq.s32.totalorder %v9817_v13, %v5806_v41  ;;  %vm445_vm6 = vcmp.eq.s32.totalorder %v9816_v17, %v5806_v41 }
 0x132   : >> { %v972_v6 = vsel %vm654_vm8, %v5748_v63, %v865_v40  ;;  %v1077_v11 = vsel %vm548_vm3, %v5750_v46, %v970_v36  ;;  %v4563_v8 = vpack.c.bf16 %v9428_v3, %v9429_v39  ;;  %vm547_vm12 = vcmp.eq.s32.totalorder %v9817_v13, %v5791_v57 }
 0x133   : >> { %v1079_v14 = vsel %vm550_vm5, %v5750_v46, %v972_v6  ;;  %v1184_v40 = vsel %vm444_vm2, %v5736_v59, %v1077_v11  ;;  %vm549_vm13 = vcmp.eq.s32.totalorder %v9816_v17, %v5791_v57  ;;  %vm651_vm14 = vcmp.eq.s32.totalorder %v9817_v13, %v5765_v43 }
 0x134   : >> { %v1186_v36 = vsel %vm446_vm4, %v5736_v59, %v1079_v14  ;;  %v1303_v3 = vand.u32 4294901760, %v1184_v40  ;;  %4564 = vmatprep.subr.bf16.mxu0 %v4563_v8  ;;  %vm653_vm15 = vcmp.eq.s32.totalorder %v9816_v17, %v5765_v43  ;;  %vm755_vm0 = vcmp.eq.s32.totalorder %v9817_v13, %v5767_v42 }
 0x135   : >> { %v1307_v11 = vand.u32 4294901760, %v1186_v36  ;;  %vm757_vm1 = vcmp.eq.s32.totalorder %v9816_v17, %v5767_v42  ;;  %v862_v6 = vsel %vm755_vm0, %v5758_v55, 0.0  ;;  %v1528_v39 = vand.u32 4294901760, %v6389_v15 }
 0x136   : >> { %v6452_v12 = vsub.f32 %v1184_v40, %v1303_v3  ;;  %v864_v14 = vsel %vm757_vm1, %v5758_v55, 0.0  ;;  %v969_v8 = vsel %vm651_vm14, %v5774_v47, %v862_v6  ;;  %v1540_v48 = vand.u32 4294901760, %v6399_v16 }
 0x137   : >> { %v6457_v37 = vpack.c.bf16 %v1307_v11, %v1303_v3  ;;  %v6459_v4 = vsub.f32 %v1186_v36, %v1307_v11  ;;  %v971_v51 = vsel %vm653_vm15, %v5774_v47, %v864_v14  ;;  %v1076_v10 = vsel %vm547_vm12, %v5776_v52, %v969_v8 }
 0x138   : >> { %9880 = vst [vmem:[#allocation114_spill] sm:$0xff] %v6452_v12  ;;  %v1078_v40 = vsel %vm549_vm13, %v5776_v52, %v971_v51  ;;  %v1183_v3 = vsel %vm443_vm11, %v5743_v62, %v1076_v10  ;;  %v6475_v36 = vsub.f32 %v6389_v15, %v1528_v39  ;;  %v6478_v11 = vsub.f32 %v6399_v16, %v1540_v48 }
 0x139   : >> { %9881 = vst [vmem:[#allocation115_spill] sm:$0xff] %v6457_v37  ;;  %9882 = vst [vmem:[#allocation116_spill] sm:$0xff] %v6459_v4  ;;  %4312 = vmatprep.subr.bf16.mxu1 %v6457_v37  ;;  %v1185_v6 = vsel %vm445_vm6, %v5743_v62, %v1078_v40  ;;  %v1305_v14 = vand.u32 4294901760, %v1183_v3  ;;  %v4565_v51 = vpack.c.bf16 %v1540_v48, %v1528_v39 }
 0x13a   : >> { %vm448_vm2 = vcmp.eq.s32.totalorder %v9815_v18, %v5800_v53  ;;  %v1309_v8 = vand.u32 4294901760, %v1185_v6  ;;  %vm450_vm4 = vcmp.eq.s32.totalorder %v9814_v19, %v5800_v53  ;;  %vm552_vm3 = vcmp.eq.s32.totalorder %v9815_v18, %v5787_v61 }
 0x13b   : >> { %v6491_v16 = vsub.f32 %v1183_v3, %v1305_v14  ;;  %4566 = vmatpush1.bf16.msra.mxu0 %v4565_v51  ;;  %vm554_vm5 = vcmp.eq.s32.totalorder %v9814_v19, %v5787_v61  ;;  %vm656_vm7 = vcmp.eq.s32.totalorder %v9815_v18, %v5763_v0  ;;  %vm658_vm8 = vcmp.eq.s32.totalorder %v9814_v19, %v5763_v0 }
 0x13c   : >> { %v6499_v48 = vpack.c.bf16 %v1309_v8, %v1305_v14  ;;  %v6501_v39 = vsub.f32 %v1185_v6, %v1309_v8  ;;  %vm760_vm9 = vcmp.eq.s32.totalorder %v9815_v18, %v5756_v44  ;;  %vm762_vm10 = vcmp.eq.s32.totalorder %v9814_v19, %v5756_v44 }
 0x13d   : >> { %9883 = vst [vmem:[#allocation117_spill] sm:$0xff] %v6491_v16  ;;  %v867_v40 = vsel %vm760_vm9, %v5746_v60, 0.0  ;;  %v9444_v3 = vand.u32 4294901760, %v6452_v12  ;;  %v9443_v51 = vand.u32 4294901760, %v6459_v4  ;;  %v869_v6 = vsel %vm762_vm10, %v5746_v60, 0.0 }
 0x13e   : >> { %9884 = vst [vmem:[#allocation118_spill] sm:$0xff] %v6499_v48  ;;  %9885 = vst [vmem:[#allocation119_spill] sm:$0xff] %v6501_v39  ;;  %4314 = vmatpush1.bf16.msra.mxu1 %v6499_v48  ;;  %v974_v14 = vsel %vm656_vm7, %v5748_v63, %v867_v40  ;;  %vm447_vm11 = vcmp.eq.s32.totalorder %v9815_v18, %v5806_v41  ;;  %vm449_vm6 = vcmp.eq.s32.totalorder %v9814_v19, %v5806_v41 }
 0x13f   : >> { %v976_v8 = vsel %vm658_vm8, %v5748_v63, %v869_v6  ;;  %v1081_v13 = vsel %vm552_vm3, %v5750_v46, %v974_v14  ;;  %v4567_v10 = vpack.c.bf16 %v9443_v51, %v9444_v3  ;;  %vm551_vm12 = vcmp.eq.s32.totalorder %v9815_v18, %v5791_v57 }
 0x140   : >> { %v1083_v40 = vsel %vm554_vm5, %v5750_v46, %v976_v8  ;;  %v1188_v6 = vsel %vm448_vm2, %v5736_v59, %v1081_v13  ;;  %vm553_vm13 = vcmp.eq.s32.totalorder %v9814_v19, %v5791_v57  ;;  %vm655_vm14 = vcmp.eq.s32.totalorder %v9815_v18, %v5765_v43 }
 0x141   : >> { %v1190_v14 = vsel %vm450_vm4, %v5736_v59, %v1083_v40  ;;  %v1311_v51 = vand.u32 4294901760, %v1188_v6  ;;  %4568 = vmatprep.subr.bf16.mxu0 %v4567_v10  ;;  %vm657_vm15 = vcmp.eq.s32.totalorder %v9814_v19, %v5765_v43  ;;  %vm759_vm0 = vcmp.eq.s32.totalorder %v9815_v18, %v5767_v42 }
 0x142   : >> { %v1315_v13 = vand.u32 4294901760, %v1190_v14  ;;  %vm761_vm1 = vcmp.eq.s32.totalorder %v9814_v19, %v5767_v42  ;;  %v866_v8 = vsel %vm759_vm0, %v5758_v55, 0.0  ;;  %v1552_v3 = vand.u32 4294901760, %v6491_v16 }
 0x143   : >> { %v6554_v17 = vsub.f32 %v1188_v6, %v1311_v51  ;;  %v868_v40 = vsel %vm761_vm1, %v5758_v55, 0.0  ;;  %v973_v10 = vsel %vm655_vm14, %v5774_v47, %v866_v8  ;;  %v1564_v15 = vand.u32 4294901760, %v6501_v39 }
 0x144   : >> { %v6559_v48 = vpack.c.bf16 %v1315_v13, %v1311_v51  ;;  %v6561_v37 = vsub.f32 %v1190_v14, %v1315_v13  ;;  %v975_v4 = vsel %vm657_vm15, %v5774_v47, %v868_v40  ;;  %v1080_v12 = vsel %vm551_vm12, %v5776_v52, %v973_v10 }
 0x145   : >> { %9886 = vst [vmem:[#allocation120_spill] sm:$0xff] %v6554_v17  ;;  %v1082_v6 = vsel %vm553_vm13, %v5776_v52, %v975_v4  ;;  %v1187_v51 = vsel %vm447_vm11, %v5743_v62, %v1080_v12  ;;  %v6577_v14 = vsub.f32 %v6491_v16, %v1552_v3  ;;  %v6580_v13 = vsub.f32 %v6501_v39, %v1564_v15 }
 0x146   : >> { %9887 = vst [vmem:[#allocation121_spill] sm:$0xff] %v6559_v48  ;;  %9888 = vst [vmem:[#allocation122_spill] sm:$0xff] %v6561_v37  ;;  %4316 = vmatprep.subr.bf16.mxu1 %v6559_v48  ;;  %v1189_v8 = vsel %vm449_vm6, %v5743_v62, %v1082_v6  ;;  %v1313_v40 = vand.u32 4294901760, %v1187_v51  ;;  %v4569_v4 = vpack.c.bf16 %v1564_v15, %v1552_v3 }
 0x147   : >> { %vm452_vm2 = vcmp.eq.s32.totalorder %v9813_v20, %v5800_v53  ;;  %v1317_v10 = vand.u32 4294901760, %v1189_v8  ;;  %vm454_vm4 = vcmp.eq.s32.totalorder %v9812_v21, %v5800_v53  ;;  %vm556_vm3 = vcmp.eq.s32.totalorder %v9813_v20, %v5787_v61 }
 0x148   : >> { %v6593_v39 = vsub.f32 %v1187_v51, %v1313_v40  ;;  %4570 = vmatpush1.bf16.msra.mxu0 %v4569_v4  ;;  %vm558_vm5 = vcmp.eq.s32.totalorder %v9812_v21, %v5787_v61  ;;  %vm660_vm7 = vcmp.eq.s32.totalorder %v9813_v20, %v5763_v0  ;;  %vm662_vm8 = vcmp.eq.s32.totalorder %v9812_v21, %v5763_v0 }
 0x149   : >> { %v6601_v15 = vpack.c.bf16 %v1317_v10, %v1313_v40  ;;  %v6603_v3 = vsub.f32 %v1189_v8, %v1317_v10  ;;  %vm764_vm9 = vcmp.eq.s32.totalorder %v9813_v20, %v5756_v44  ;;  %vm766_vm10 = vcmp.eq.s32.totalorder %v9812_v21, %v5756_v44 }
 0x14a   : >> { %9889 = vst [vmem:[#allocation123_spill] sm:$0xff] %v6593_v39  ;;  %v871_v6 = vsel %vm764_vm9, %v5746_v60, 0.0  ;;  %v9458_v51 = vand.u32 4294901760, %v6554_v17  ;;  %v9457_v4 = vand.u32 4294901760, %v6561_v37  ;;  %v873_v8 = vsel %vm766_vm10, %v5746_v60, 0.0 }
 0x14b   : >> { %9890 = vst [vmem:[#allocation124_spill] sm:$0xff] %v6601_v15  ;;  %9891 = vst [vmem:[#allocation125_spill] sm:$0xff] %v6603_v3  ;;  %4318 = vmatpush1.bf16.msra.mxu1 %v6601_v15  ;;  %v978_v40 = vsel %vm660_vm7, %v5748_v63, %v871_v6  ;;  %vm451_vm11 = vcmp.eq.s32.totalorder %v9813_v20, %v5806_v41  ;;  %vm453_vm6 = vcmp.eq.s32.totalorder %v9812_v21, %v5806_v41 }
 0x14c   : >> { %v980_v10 = vsel %vm662_vm8, %v5748_v63, %v873_v8  ;;  %v1085_v18 = vsel %vm556_vm3, %v5750_v46, %v978_v40  ;;  %v4571_v12 = vpack.c.bf16 %v9457_v4, %v9458_v51  ;;  %vm555_vm12 = vcmp.eq.s32.totalorder %v9813_v20, %v5791_v57 }
 0x14d   : >> { %v1087_v6 = vsel %vm558_vm5, %v5750_v46, %v980_v10  ;;  %v1192_v8 = vsel %vm452_vm2, %v5736_v59, %v1085_v18  ;;  %vm557_vm13 = vcmp.eq.s32.totalorder %v9812_v21, %v5791_v57  ;;  %vm659_vm14 = vcmp.eq.s32.totalorder %v9813_v20, %v5765_v43 }
 0x14e   : >> { %v1194_v40 = vsel %vm454_vm4, %v5736_v59, %v1087_v6  ;;  %v1319_v4 = vand.u32 4294901760, %v1192_v8  ;;  %4572 = vmatprep.subr.bf16.mxu0 %v4571_v12  ;;  %vm661_vm15 = vcmp.eq.s32.totalorder %v9812_v21, %v5765_v43  ;;  %vm763_vm0 = vcmp.eq.s32.totalorder %v9813_v20, %v5767_v42 }
 0x14f   : >> { %v1323_v18 = vand.u32 4294901760, %v1194_v40  ;;  %vm765_vm1 = vcmp.eq.s32.totalorder %v9812_v21, %v5767_v42  ;;  %v870_v10 = vsel %vm763_vm0, %v5758_v55, 0.0  ;;  %v1576_v51 = vand.u32 4294901760, %v6593_v39 }
 0x150   : >> { %v6656_v19 = vsub.f32 %v1192_v8, %v1319_v4  ;;  %v872_v6 = vsel %vm765_vm1, %v5758_v55, 0.0  ;;  %v977_v12 = vsel %vm659_vm14, %v5774_v47, %v870_v10  ;;  %v1588_v16 = vand.u32 4294901760, %v6603_v3 }
 0x151   : >> { %v6661_v15 = vpack.c.bf16 %v1323_v18, %v1319_v4  ;;  %v6663_v48 = vsub.f32 %v1194_v40, %v1323_v18  ;;  %v979_v37 = vsel %vm661_vm15, %v5774_v47, %v872_v6  ;;  %v1084_v17 = vsel %vm555_vm12, %v5776_v52, %v977_v12 }
 0x152   : >> { %9892 = vst [vmem:[#allocation126_spill] sm:$0xff] %v6656_v19  ;;  %v1086_v8 = vsel %vm557_vm13, %v5776_v52, %v979_v37  ;;  %v1191_v4 = vsel %vm451_vm11, %v5743_v62, %v1084_v17  ;;  %v6679_v40 = vsub.f32 %v6593_v39, %v1576_v51  ;;  %v6682_v18 = vsub.f32 %v6603_v3, %v1588_v16 }
 0x153   : >> { %9893 = vst [vmem:[#allocation127_spill] sm:$0xff] %v6661_v15  ;;  %9894 = vst [vmem:[#allocation128_spill] sm:$0xff] %v6663_v48  ;;  %4320 = vmatprep.subr.bf16.mxu1 %v6661_v15  ;;  %v1193_v10 = vsel %vm453_vm6, %v5743_v62, %v1086_v8  ;;  %v1321_v6 = vand.u32 4294901760, %v1191_v4  ;;  %v4573_v37 = vpack.c.bf16 %v1588_v16, %v1576_v51 }
 0x154   : >> { %vm456_vm2 = vcmp.eq.s32.totalorder %v9811_v22, %v5800_v53  ;;  %v1325_v12 = vand.u32 4294901760, %v1193_v10  ;;  %vm458_vm4 = vcmp.eq.s32.totalorder %v9810_v23, %v5800_v53  ;;  %vm560_vm3 = vcmp.eq.s32.totalorder %v9811_v22, %v5787_v61 }
 0x155   : >> { %v6695_v3 = vsub.f32 %v1191_v4, %v1321_v6  ;;  %4574 = vmatpush1.bf16.msra.mxu0 %v4573_v37  ;;  %vm562_vm5 = vcmp.eq.s32.totalorder %v9810_v23, %v5787_v61  ;;  %vm664_vm7 = vcmp.eq.s32.totalorder %v9811_v22, %v5763_v0  ;;  %vm666_vm8 = vcmp.eq.s32.totalorder %v9810_v23, %v5763_v0 }
 0x156   : >> { %v6703_v16 = vpack.c.bf16 %v1325_v12, %v1321_v6  ;;  %v6705_v51 = vsub.f32 %v1193_v10, %v1325_v12  ;;  %vm768_vm9 = vcmp.eq.s32.totalorder %v9811_v22, %v5756_v44  ;;  %vm770_vm10 = vcmp.eq.s32.totalorder %v9810_v23, %v5756_v44 }
 0x157   : >> { %9895 = vst [vmem:[#allocation129_spill] sm:$0xff] %v6695_v3  ;;  %v875_v8 = vsel %vm768_vm9, %v5746_v60, 0.0  ;;  %v9472_v4 = vand.u32 4294901760, %v6656_v19  ;;  %v9471_v37 = vand.u32 4294901760, %v6663_v48  ;;  %v877_v10 = vsel %vm770_vm10, %v5746_v60, 0.0 }
 0x158   : >> { %9896 = vst [vmem:[#allocation130_spill] sm:$0xff] %v6703_v16  ;;  %9897 = vst [vmem:[#allocation131_spill] sm:$0xff] %v6705_v51  ;;  %4322 = vmatpush1.bf16.msra.mxu1 %v6703_v16  ;;  %v982_v6 = vsel %vm664_vm7, %v5748_v63, %v875_v8  ;;  %vm455_vm11 = vcmp.eq.s32.totalorder %v9811_v22, %v5806_v41  ;;  %vm457_vm6 = vcmp.eq.s32.totalorder %v9810_v23, %v5806_v41 }
 0x159   : >> { %v984_v12 = vsel %vm666_vm8, %v5748_v63, %v877_v10  ;;  %v1089_v20 = vsel %vm560_vm3, %v5750_v46, %v982_v6  ;;  %v4575_v17 = vpack.c.bf16 %v9471_v37, %v9472_v4  ;;  %vm559_vm12 = vcmp.eq.s32.totalorder %v9811_v22, %v5791_v57 }
 0x15a   : >> { %v1091_v8 = vsel %vm562_vm5, %v5750_v46, %v984_v12  ;;  %v1196_v10 = vsel %vm456_vm2, %v5736_v59, %v1089_v20  ;;  %vm561_vm13 = vcmp.eq.s32.totalorder %v9810_v23, %v5791_v57  ;;  %vm663_vm14 = vcmp.eq.s32.totalorder %v9811_v22, %v5765_v43 }
 0x15b   : >> { %v1198_v6 = vsel %vm458_vm4, %v5736_v59, %v1091_v8  ;;  %v1327_v37 = vand.u32 4294901760, %v1196_v10  ;;  %4576 = vmatprep.subr.bf16.mxu0 %v4575_v17  ;;  %vm665_vm15 = vcmp.eq.s32.totalorder %v9810_v23, %v5765_v43  ;;  %vm767_vm0 = vcmp.eq.s32.totalorder %v9811_v22, %v5767_v42 }
 0x15c   : >> { %v1331_v20 = vand.u32 4294901760, %v1198_v6  ;;  %vm769_vm1 = vcmp.eq.s32.totalorder %v9810_v23, %v5767_v42  ;;  %v874_v12 = vsel %vm767_vm0, %v5758_v55, 0.0  ;;  %v1600_v4 = vand.u32 4294901760, %v6695_v3 }
 0x15d   : >> { %v6758_v21 = vsub.f32 %v1196_v10, %v1327_v37  ;;  %v876_v8 = vsel %vm769_vm1, %v5758_v55, 0.0  ;;  %v981_v17 = vsel %vm663_vm14, %v5774_v47, %v874_v12  ;;  %v1612_v39 = vand.u32 4294901760, %v6705_v51 }
 0x15e   : >> { %v6763_v16 = vpack.c.bf16 %v1331_v20, %v1327_v37  ;;  %v6765_v15 = vsub.f32 %v1198_v6, %v1331_v20  ;;  %v983_v48 = vsel %vm665_vm15, %v5774_v47, %v876_v8  ;;  %v1088_v19 = vsel %vm559_vm12, %v5776_v52, %v981_v17 }
 0x15f   : >> { %9898 = vst [vmem:[#allocation132_spill] sm:$0xff] %v6758_v21  ;;  %v1090_v10 = vsel %vm561_vm13, %v5776_v52, %v983_v48  ;;  %v1195_v37 = vsel %vm455_vm11, %v5743_v62, %v1088_v19  ;;  %v6781_v6 = vsub.f32 %v6695_v3, %v1600_v4  ;;  %v6784_v20 = vsub.f32 %v6705_v51, %v1612_v39 }
 0x160   : >> { %9899 = vst [vmem:[#allocation133_spill] sm:$0xff] %v6763_v16  ;;  %9900 = vst [vmem:[#allocation134_spill] sm:$0xff] %v6765_v15  ;;  %4324 = vmatprep.subr.bf16.mxu1 %v6763_v16  ;;  %v1197_v12 = vsel %vm457_vm6, %v5743_v62, %v1090_v10  ;;  %v1329_v8 = vand.u32 4294901760, %v1195_v37  ;;  %v4577_v48 = vpack.c.bf16 %v1612_v39, %v1600_v4 }
 0x161   : >> { %vm460_vm2 = vcmp.eq.s32.totalorder %v9809_v24, %v5800_v53  ;;  %v1333_v17 = vand.u32 4294901760, %v1197_v12  ;;  %vm462_vm4 = vcmp.eq.s32.totalorder %v9808_v25, %v5800_v53  ;;  %vm564_vm3 = vcmp.eq.s32.totalorder %v9809_v24, %v5787_v61 }
 0x162   : >> { %v6797_v51 = vsub.f32 %v1195_v37, %v1329_v8  ;;  %4578 = vmatpush1.bf16.msra.mxu0 %v4577_v48  ;;  %vm566_vm5 = vcmp.eq.s32.totalorder %v9808_v25, %v5787_v61  ;;  %vm668_vm7 = vcmp.eq.s32.totalorder %v9809_v24, %v5763_v0  ;;  %vm670_vm8 = vcmp.eq.s32.totalorder %v9808_v25, %v5763_v0 }
 0x163   : >> { %v6805_v39 = vpack.c.bf16 %v1333_v17, %v1329_v8  ;;  %v6807_v4 = vsub.f32 %v1197_v12, %v1333_v17  ;;  %vm772_vm9 = vcmp.eq.s32.totalorder %v9809_v24, %v5756_v44  ;;  %vm774_vm10 = vcmp.eq.s32.totalorder %v9808_v25, %v5756_v44 }
 0x164   : >> { %9901 = vst [vmem:[#allocation135_spill] sm:$0xff] %v6797_v51  ;;  %v879_v10 = vsel %vm772_vm9, %v5746_v60, 0.0  ;;  %v9486_v37 = vand.u32 4294901760, %v6758_v21  ;;  %v9485_v48 = vand.u32 4294901760, %v6765_v15  ;;  %v881_v12 = vsel %vm774_vm10, %v5746_v60, 0.0 }
 0x165   : >> { %9902 = vst [vmem:[#allocation136_spill] sm:$0xff] %v6805_v39  ;;  %9903 = vst [vmem:[#allocation137_spill] sm:$0xff] %v6807_v4  ;;  %4326 = vmatpush1.bf16.msra.mxu1 %v6805_v39  ;;  %v986_v8 = vsel %vm668_vm7, %v5748_v63, %v879_v10  ;;  %vm459_vm11 = vcmp.eq.s32.totalorder %v9809_v24, %v5806_v41  ;;  %vm461_vm6 = vcmp.eq.s32.totalorder %v9808_v25, %v5806_v41 }
 0x166   : >> { %v988_v17 = vsel %vm670_vm8, %v5748_v63, %v881_v12  ;;  %v1093_v22 = vsel %vm564_vm3, %v5750_v46, %v986_v8  ;;  %v4579_v19 = vpack.c.bf16 %v9485_v48, %v9486_v37  ;;  %vm563_vm12 = vcmp.eq.s32.totalorder %v9809_v24, %v5791_v57 }
 0x167   : >> { %v1095_v10 = vsel %vm566_vm5, %v5750_v46, %v988_v17  ;;  %v1200_v12 = vsel %vm460_vm2, %v5736_v59, %v1093_v22  ;;  %vm565_vm13 = vcmp.eq.s32.totalorder %v9808_v25, %v5791_v57  ;;  %vm667_vm14 = vcmp.eq.s32.totalorder %v9809_v24, %v5765_v43 }
 0x168   : >> { %v1202_v8 = vsel %vm462_vm4, %v5736_v59, %v1095_v10  ;;  %v1335_v48 = vand.u32 4294901760, %v1200_v12  ;;  %4580 = vmatprep.subr.bf16.mxu0 %v4579_v19  ;;  %vm669_vm15 = vcmp.eq.s32.totalorder %v9808_v25, %v5765_v43  ;;  %vm771_vm0 = vcmp.eq.s32.totalorder %v9809_v24, %v5767_v42 }
 0x169   : >> { %v1339_v22 = vand.u32 4294901760, %v1202_v8  ;;  %vm773_vm1 = vcmp.eq.s32.totalorder %v9808_v25, %v5767_v42  ;;  %v878_v17 = vsel %vm771_vm0, %v5758_v55, 0.0  ;;  %v1624_v37 = vand.u32 4294901760, %v6797_v51 }
 0x16a   : >> { %v6860_v23 = vsub.f32 %v1200_v12, %v1335_v48  ;;  %v880_v10 = vsel %vm773_vm1, %v5758_v55, 0.0  ;;  %v985_v19 = vsel %vm667_vm14, %v5774_v47, %v878_v17  ;;  %v1636_v3 = vand.u32 4294901760, %v6807_v4 }
 0x16b   : >> { %v6865_v39 = vpack.c.bf16 %v1339_v22, %v1335_v48  ;;  %v6867_v16 = vsub.f32 %v1202_v8, %v1339_v22  ;;  %v987_v15 = vsel %vm669_vm15, %v5774_v47, %v880_v10  ;;  %v1092_v21 = vsel %vm563_vm12, %v5776_v52, %v985_v19 }
 0x16c   : >> { %9904 = vst [vmem:[#allocation138_spill] sm:$0xff] %v6860_v23  ;;  %v1094_v12 = vsel %vm565_vm13, %v5776_v52, %v987_v15  ;;  %v1199_v48 = vsel %vm459_vm11, %v5743_v62, %v1092_v21  ;;  %v6883_v8 = vsub.f32 %v6797_v51, %v1624_v37  ;;  %v6886_v22 = vsub.f32 %v6807_v4, %v1636_v3 }
 0x16d   : >> { %9905 = vst [vmem:[#allocation139_spill] sm:$0xff] %v6865_v39  ;;  %9906 = vst [vmem:[#allocation140_spill] sm:$0xff] %v6867_v16  ;;  %4328 = vmatprep.subr.bf16.mxu1 %v6865_v39  ;;  %v1201_v17 = vsel %vm461_vm6, %v5743_v62, %v1094_v12  ;;  %v1337_v10 = vand.u32 4294901760, %v1199_v48  ;;  %v4581_v15 = vpack.c.bf16 %v1636_v3, %v1624_v37 }
 0x16e   : >> { %vm464_vm2 = vcmp.eq.s32.totalorder %v9807_v26, %v5800_v53  ;;  %v1341_v19 = vand.u32 4294901760, %v1201_v17  ;;  %vm466_vm4 = vcmp.eq.s32.totalorder %v9806_v27, %v5800_v53  ;;  %vm568_vm3 = vcmp.eq.s32.totalorder %v9807_v26, %v5787_v61 }
 0x16f   : >> { %v6899_v4 = vsub.f32 %v1199_v48, %v1337_v10  ;;  %4582 = vmatpush1.bf16.msra.mxu0 %v4581_v15  ;;  %vm570_vm5 = vcmp.eq.s32.totalorder %v9806_v27, %v5787_v61  ;;  %vm672_vm7 = vcmp.eq.s32.totalorder %v9807_v26, %v5763_v0  ;;  %vm674_vm8 = vcmp.eq.s32.totalorder %v9806_v27, %v5763_v0 }
 0x170   : >> { %v6907_v3 = vpack.c.bf16 %v1341_v19, %v1337_v10  ;;  %v6909_v37 = vsub.f32 %v1201_v17, %v1341_v19  ;;  %vm776_vm9 = vcmp.eq.s32.totalorder %v9807_v26, %v5756_v44  ;;  %vm778_vm10 = vcmp.eq.s32.totalorder %v9806_v27, %v5756_v44 }
 0x171   : >> { %9907 = vst [vmem:[#allocation141_spill] sm:$0xff] %v6899_v4  ;;  %v883_v12 = vsel %vm776_vm9, %v5746_v60, 0.0  ;;  %v9500_v48 = vand.u32 4294901760, %v6860_v23  ;;  %v9499_v15 = vand.u32 4294901760, %v6867_v16  ;;  %v885_v17 = vsel %vm778_vm10, %v5746_v60, 0.0 }
 0x172   : >> { %9908 = vst [vmem:[#allocation142_spill] sm:$0xff] %v6907_v3  ;;  %9909 = vst [vmem:[#allocation143_spill] sm:$0xff] %v6909_v37  ;;  %4330 = vmatpush1.bf16.msra.mxu1 %v6907_v3  ;;  %v990_v10 = vsel %vm672_vm7, %v5748_v63, %v883_v12  ;;  %vm463_vm11 = vcmp.eq.s32.totalorder %v9807_v26, %v5806_v41  ;;  %vm465_vm6 = vcmp.eq.s32.totalorder %v9806_v27, %v5806_v41 }
 0x173   : >> { %v992_v19 = vsel %vm674_vm8, %v5748_v63, %v885_v17  ;;  %v1097_v24 = vsel %vm568_vm3, %v5750_v46, %v990_v10  ;;  %v4583_v21 = vpack.c.bf16 %v9499_v15, %v9500_v48  ;;  %vm567_vm12 = vcmp.eq.s32.totalorder %v9807_v26, %v5791_v57 }
 0x174   : >> { %v1099_v12 = vsel %vm570_vm5, %v5750_v46, %v992_v19  ;;  %v1204_v17 = vsel %vm464_vm2, %v5736_v59, %v1097_v24  ;;  %vm569_vm13 = vcmp.eq.s32.totalorder %v9806_v27, %v5791_v57  ;;  %vm671_vm14 = vcmp.eq.s32.totalorder %v9807_v26, %v5765_v43 }
 0x175   : >> { %v1206_v10 = vsel %vm466_vm4, %v5736_v59, %v1099_v12  ;;  %v1343_v15 = vand.u32 4294901760, %v1204_v17  ;;  %4584 = vmatprep.subr.bf16.mxu0 %v4583_v21  ;;  %vm673_vm15 = vcmp.eq.s32.totalorder %v9806_v27, %v5765_v43  ;;  %vm775_vm0 = vcmp.eq.s32.totalorder %v9807_v26, %v5767_v42 }
 0x176   : >> { %v1347_v24 = vand.u32 4294901760, %v1206_v10  ;;  %vm777_vm1 = vcmp.eq.s32.totalorder %v9806_v27, %v5767_v42  ;;  %v882_v19 = vsel %vm775_vm0, %v5758_v55, 0.0  ;;  %v1648_v48 = vand.u32 4294901760, %v6899_v4 }
 0x177   : >> { %v6962_v25 = vsub.f32 %v1204_v17, %v1343_v15  ;;  %v884_v12 = vsel %vm777_vm1, %v5758_v55, 0.0  ;;  %v989_v21 = vsel %vm671_vm14, %v5774_v47, %v882_v19  ;;  %v1660_v51 = vand.u32 4294901760, %v6909_v37 }
 0x178   : >> { %v6967_v3 = vpack.c.bf16 %v1347_v24, %v1343_v15  ;;  %v6969_v39 = vsub.f32 %v1206_v10, %v1347_v24  ;;  %v991_v16 = vsel %vm673_vm15, %v5774_v47, %v884_v12  ;;  %v1096_v23 = vsel %vm567_vm12, %v5776_v52, %v989_v21 }
 0x179   : >> { %9910 = vst [vmem:[#allocation144_spill] sm:$0xff] %v6962_v25  ;;  %v1098_v17 = vsel %vm569_vm13, %v5776_v52, %v991_v16  ;;  %v1203_v15 = vsel %vm463_vm11, %v5743_v62, %v1096_v23  ;;  %v6985_v10 = vsub.f32 %v6899_v4, %v1648_v48  ;;  %v6988_v24 = vsub.f32 %v6909_v37, %v1660_v51 }
 0x17a   : >> { %9911 = vst [vmem:[#allocation145_spill] sm:$0xff] %v6967_v3  ;;  %9912 = vst [vmem:[#allocation146_spill] sm:$0xff] %v6969_v39  ;;  %4332 = vmatprep.subr.bf16.mxu1 %v6967_v3  ;;  %v1205_v19 = vsel %vm465_vm6, %v5743_v62, %v1098_v17  ;;  %v1345_v12 = vand.u32 4294901760, %v1203_v15  ;;  %v4585_v16 = vpack.c.bf16 %v1660_v51, %v1648_v48 }
 0x17b   : >> { %vm468_vm2 = vcmp.eq.s32.totalorder %v9805_v28, %v5800_v53  ;;  %v1349_v21 = vand.u32 4294901760, %v1205_v19  ;;  %vm470_vm4 = vcmp.eq.s32.totalorder %v9804_v29, %v5800_v53  ;;  %vm572_vm3 = vcmp.eq.s32.totalorder %v9805_v28, %v5787_v61 }
 0x17c   : >> { %v7001_v37 = vsub.f32 %v1203_v15, %v1345_v12  ;;  %4586 = vmatpush1.bf16.msra.mxu0 %v4585_v16  ;;  %vm574_vm5 = vcmp.eq.s32.totalorder %v9804_v29, %v5787_v61  ;;  %vm676_vm7 = vcmp.eq.s32.totalorder %v9805_v28, %v5763_v0  ;;  %vm678_vm8 = vcmp.eq.s32.totalorder %v9804_v29, %v5763_v0 }
 0x17d   : >> { %v7009_v51 = vpack.c.bf16 %v1349_v21, %v1345_v12  ;;  %v7011_v48 = vsub.f32 %v1205_v19, %v1349_v21  ;;  %vm780_vm9 = vcmp.eq.s32.totalorder %v9805_v28, %v5756_v44  ;;  %vm782_vm10 = vcmp.eq.s32.totalorder %v9804_v29, %v5756_v44 }
 0x17e   : >> { %9913 = vst [vmem:[#allocation147_spill] sm:$0xff] %v7001_v37  ;;  %v887_v17 = vsel %vm780_vm9, %v5746_v60, 0.0  ;;  %v9514_v15 = vand.u32 4294901760, %v6962_v25  ;;  %v9513_v16 = vand.u32 4294901760, %v6969_v39  ;;  %v889_v19 = vsel %vm782_vm10, %v5746_v60, 0.0 }
 0x17f   : >> { %9914 = vst [vmem:[#allocation148_spill] sm:$0xff] %v7009_v51  ;;  %9915 = vst [vmem:[#allocation149_spill] sm:$0xff] %v7011_v48  ;;  %4334 = vmatpush1.bf16.msra.mxu1 %v7009_v51  ;;  %v994_v12 = vsel %vm676_vm7, %v5748_v63, %v887_v17  ;;  %vm467_vm11 = vcmp.eq.s32.totalorder %v9805_v28, %v5806_v41  ;;  %vm469_vm6 = vcmp.eq.s32.totalorder %v9804_v29, %v5806_v41 }
 0x180   : >> { %v996_v21 = vsel %vm678_vm8, %v5748_v63, %v889_v19  ;;  %v1101_v26 = vsel %vm572_vm3, %v5750_v46, %v994_v12  ;;  %v4587_v23 = vpack.c.bf16 %v9513_v16, %v9514_v15  ;;  %vm571_vm12 = vcmp.eq.s32.totalorder %v9805_v28, %v5791_v57 }
 0x181   : >> { %v1103_v17 = vsel %vm574_vm5, %v5750_v46, %v996_v21  ;;  %v1208_v19 = vsel %vm468_vm2, %v5736_v59, %v1101_v26  ;;  %vm573_vm13 = vcmp.eq.s32.totalorder %v9804_v29, %v5791_v57  ;;  %vm675_vm14 = vcmp.eq.s32.totalorder %v9805_v28, %v5765_v43 }
 0x182   : >> { %v1210_v12 = vsel %vm470_vm4, %v5736_v59, %v1103_v17  ;;  %v1351_v16 = vand.u32 4294901760, %v1208_v19  ;;  %4588 = vmatprep.subr.bf16.mxu0 %v4587_v23  ;;  %vm677_vm15 = vcmp.eq.s32.totalorder %v9804_v29, %v5765_v43  ;;  %vm779_vm0 = vcmp.eq.s32.totalorder %v9805_v28, %v5767_v42 }
 0x183   : >> { %v1355_v26 = vand.u32 4294901760, %v1210_v12  ;;  %vm781_vm1 = vcmp.eq.s32.totalorder %v9804_v29, %v5767_v42  ;;  %v886_v21 = vsel %vm779_vm0, %v5758_v55, 0.0  ;;  %v1672_v15 = vand.u32 4294901760, %v7001_v37 }
 0x184   : >> { %v7064_v27 = vsub.f32 %v1208_v19, %v1351_v16  ;;  %v888_v17 = vsel %vm781_vm1, %v5758_v55, 0.0  ;;  %v993_v23 = vsel %vm675_vm14, %v5774_v47, %v886_v21  ;;  %v1684_v4 = vand.u32 4294901760, %v7011_v48 }
 0x185   : >> { %v7069_v51 = vpack.c.bf16 %v1355_v26, %v1351_v16  ;;  %v7071_v3 = vsub.f32 %v1210_v12, %v1355_v26  ;;  %v995_v39 = vsel %vm677_vm15, %v5774_v47, %v888_v17  ;;  %v1100_v25 = vsel %vm571_vm12, %v5776_v52, %v993_v23 }
 0x186   : >> { %9916 = vst [vmem:[#allocation150_spill] sm:$0xff] %v7064_v27  ;;  %v1102_v19 = vsel %vm573_vm13, %v5776_v52, %v995_v39  ;;  %v1207_v16 = vsel %vm467_vm11, %v5743_v62, %v1100_v25  ;;  %v7087_v12 = vsub.f32 %v7001_v37, %v1672_v15  ;;  %v7090_v26 = vsub.f32 %v7011_v48, %v1684_v4 }
 0x187   : >> { %9917 = vst [vmem:[#allocation151_spill] sm:$0xff] %v7069_v51  ;;  %9918 = vst [vmem:[#allocation152_spill] sm:$0xff] %v7071_v3  ;;  %4336 = vmatprep.subr.bf16.mxu1 %v7069_v51  ;;  %v1209_v21 = vsel %vm469_vm6, %v5743_v62, %v1102_v19  ;;  %v1353_v17 = vand.u32 4294901760, %v1207_v16  ;;  %v4589_v39 = vpack.c.bf16 %v1684_v4, %v1672_v15 }
 0x188   : >> { %vm472_vm2 = vcmp.eq.s32.totalorder %v9803_v30, %v5800_v53  ;;  %v1357_v23 = vand.u32 4294901760, %v1209_v21  ;;  %vm474_vm4 = vcmp.eq.s32.totalorder %v9802_v31, %v5800_v53  ;;  %vm576_vm3 = vcmp.eq.s32.totalorder %v9803_v30, %v5787_v61 }
 0x189   : >> { %v7103_v48 = vsub.f32 %v1207_v16, %v1353_v17  ;;  %4590 = vmatpush1.bf16.msra.mxu0 %v4589_v39  ;;  %vm578_vm5 = vcmp.eq.s32.totalorder %v9802_v31, %v5787_v61  ;;  %vm680_vm7 = vcmp.eq.s32.totalorder %v9803_v30, %v5763_v0  ;;  %vm682_vm8 = vcmp.eq.s32.totalorder %v9802_v31, %v5763_v0 }
 0x18a   : >> { %v7111_v4 = vpack.c.bf16 %v1357_v23, %v1353_v17  ;;  %v7113_v15 = vsub.f32 %v1209_v21, %v1357_v23  ;;  %vm784_vm9 = vcmp.eq.s32.totalorder %v9803_v30, %v5756_v44  ;;  %vm786_vm10 = vcmp.eq.s32.totalorder %v9802_v31, %v5756_v44 }
 0x18b   : >> { %9919 = vst [vmem:[#allocation153_spill] sm:$0xff] %v7103_v48  ;;  %v891_v19 = vsel %vm784_vm9, %v5746_v60, 0.0  ;;  %v9528_v16 = vand.u32 4294901760, %v7064_v27  ;;  %v9527_v39 = vand.u32 4294901760, %v7071_v3  ;;  %v893_v21 = vsel %vm786_vm10, %v5746_v60, 0.0 }
 0x18c   : >> { %9920 = vst [vmem:[#allocation154_spill] sm:$0xff] %v7111_v4  ;;  %9921 = vst [vmem:[#allocation155_spill] sm:$0xff] %v7113_v15  ;;  %4338 = vmatpush1.bf16.msra.mxu1 %v7111_v4  ;;  %v998_v17 = vsel %vm680_vm7, %v5748_v63, %v891_v19  ;;  %vm471_vm11 = vcmp.eq.s32.totalorder %v9803_v30, %v5806_v41  ;;  %vm473_vm6 = vcmp.eq.s32.totalorder %v9802_v31, %v5806_v41 }
 0x18d   : >> { %v1000_v23 = vsel %vm682_vm8, %v5748_v63, %v893_v21  ;;  %v1105_v28 = vsel %vm576_vm3, %v5750_v46, %v998_v17  ;;  %v4591_v25 = vpack.c.bf16 %v9527_v39, %v9528_v16  ;;  %vm575_vm12 = vcmp.eq.s32.totalorder %v9803_v30, %v5791_v57 }
 0x18e   : >> { %v1107_v19 = vsel %vm578_vm5, %v5750_v46, %v1000_v23  ;;  %v1212_v21 = vsel %vm472_vm2, %v5736_v59, %v1105_v28  ;;  %vm577_vm13 = vcmp.eq.s32.totalorder %v9802_v31, %v5791_v57  ;;  %vm679_vm14 = vcmp.eq.s32.totalorder %v9803_v30, %v5765_v43 }
 0x18f   : >> { %v1214_v17 = vsel %vm474_vm4, %v5736_v59, %v1107_v19  ;;  %v1359_v39 = vand.u32 4294901760, %v1212_v21  ;;  %4592 = vmatprep.subr.bf16.mxu0 %v4591_v25  ;;  %vm681_vm15 = vcmp.eq.s32.totalorder %v9802_v31, %v5765_v43  ;;  %vm783_vm0 = vcmp.eq.s32.totalorder %v9803_v30, %v5767_v42 }
 0x190   : >> { %v1363_v28 = vand.u32 4294901760, %v1214_v17  ;;  %vm785_vm1 = vcmp.eq.s32.totalorder %v9802_v31, %v5767_v42  ;;  %v890_v23 = vsel %vm783_vm0, %v5758_v55, 0.0  ;;  %v1696_v16 = vand.u32 4294901760, %v7103_v48 }
 0x191   : >> { %v7166_v29 = vsub.f32 %v1212_v21, %v1359_v39  ;;  %v892_v19 = vsel %vm785_vm1, %v5758_v55, 0.0  ;;  %v997_v25 = vsel %vm679_vm14, %v5774_v47, %v890_v23  ;;  %v1708_v37 = vand.u32 4294901760, %v7113_v15 }
 0x192   : >> { %v7171_v4 = vpack.c.bf16 %v1363_v28, %v1359_v39  ;;  %v7173_v51 = vsub.f32 %v1214_v17, %v1363_v28  ;;  %v999_v3 = vsel %vm681_vm15, %v5774_v47, %v892_v19  ;;  %v1104_v27 = vsel %vm575_vm12, %v5776_v52, %v997_v25 }
 0x193   : >> { %9922 = vst [vmem:[#allocation156_spill] sm:$0xff] %v7166_v29  ;;  %v1106_v21 = vsel %vm577_vm13, %v5776_v52, %v999_v3  ;;  %v1211_v39 = vsel %vm471_vm11, %v5743_v62, %v1104_v27  ;;  %v7189_v17 = vsub.f32 %v7103_v48, %v1696_v16  ;;  %v7192_v28 = vsub.f32 %v7113_v15, %v1708_v37 }
 0x194   : >> { %9923 = vst [vmem:[#allocation157_spill] sm:$0xff] %v7171_v4  ;;  %9924 = vst [vmem:[#allocation158_spill] sm:$0xff] %v7173_v51  ;;  %4340 = vmatprep.subr.bf16.mxu1 %v7171_v4  ;;  %v1213_v23 = vsel %vm473_vm6, %v5743_v62, %v1106_v21  ;;  %v1361_v19 = vand.u32 4294901760, %v1211_v39  ;;  %v4593_v3 = vpack.c.bf16 %v1708_v37, %v1696_v16 }
 0x195   : >> { %vm476_vm2 = vcmp.eq.s32.totalorder %v9801_v32, %v5800_v53  ;;  %v1365_v25 = vand.u32 4294901760, %v1213_v23  ;;  %vm478_vm4 = vcmp.eq.s32.totalorder %v9800_v33, %v5800_v53  ;;  %vm580_vm3 = vcmp.eq.s32.totalorder %v9801_v32, %v5787_v61 }
 0x196   : >> { %v7205_v15 = vsub.f32 %v1211_v39, %v1361_v19  ;;  %4594 = vmatpush1.bf16.msra.mxu0 %v4593_v3  ;;  %vm582_vm5 = vcmp.eq.s32.totalorder %v9800_v33, %v5787_v61  ;;  %vm684_vm7 = vcmp.eq.s32.totalorder %v9801_v32, %v5763_v0  ;;  %vm686_vm8 = vcmp.eq.s32.totalorder %v9800_v33, %v5763_v0 }
 0x197   : >> { %v7213_v37 = vpack.c.bf16 %v1365_v25, %v1361_v19  ;;  %v7215_v16 = vsub.f32 %v1213_v23, %v1365_v25  ;;  %vm788_vm9 = vcmp.eq.s32.totalorder %v9801_v32, %v5756_v44  ;;  %vm790_vm10 = vcmp.eq.s32.totalorder %v9800_v33, %v5756_v44 }
 0x198   : >> { %9925 = vst [vmem:[#allocation159_spill] sm:$0xff] %v7205_v15  ;;  %v895_v21 = vsel %vm788_vm9, %v5746_v60, 0.0  ;;  %v9542_v39 = vand.u32 4294901760, %v7166_v29  ;;  %v9541_v3 = vand.u32 4294901760, %v7173_v51  ;;  %v897_v23 = vsel %vm790_vm10, %v5746_v60, 0.0 }
 0x199   : >> { %9926 = vst [vmem:[#allocation160_spill] sm:$0xff] %v7213_v37  ;;  %9927 = vst [vmem:[#allocation161_spill] sm:$0xff] %v7215_v16  ;;  %4342 = vmatpush1.bf16.msra.mxu1 %v7213_v37  ;;  %v1002_v19 = vsel %vm684_vm7, %v5748_v63, %v895_v21  ;;  %vm475_vm11 = vcmp.eq.s32.totalorder %v9801_v32, %v5806_v41  ;;  %vm477_vm6 = vcmp.eq.s32.totalorder %v9800_v33, %v5806_v41 }
 0x19a   : >> { %v1004_v25 = vsel %vm686_vm8, %v5748_v63, %v897_v23  ;;  %v1109_v30 = vsel %vm580_vm3, %v5750_v46, %v1002_v19  ;;  %v4595_v27 = vpack.c.bf16 %v9541_v3, %v9542_v39  ;;  %vm579_vm12 = vcmp.eq.s32.totalorder %v9801_v32, %v5791_v57 }
 0x19b   : >> { %v1111_v21 = vsel %vm582_vm5, %v5750_v46, %v1004_v25  ;;  %v1216_v23 = vsel %vm476_vm2, %v5736_v59, %v1109_v30  ;;  %vm581_vm13 = vcmp.eq.s32.totalorder %v9800_v33, %v5791_v57  ;;  %vm683_vm14 = vcmp.eq.s32.totalorder %v9801_v32, %v5765_v43 }
 0x19c   : >> { %v1218_v19 = vsel %vm478_vm4, %v5736_v59, %v1111_v21  ;;  %v1367_v3 = vand.u32 4294901760, %v1216_v23  ;;  %4596 = vmatprep.subr.bf16.mxu0 %v4595_v27  ;;  %vm685_vm15 = vcmp.eq.s32.totalorder %v9800_v33, %v5765_v43  ;;  %vm787_vm0 = vcmp.eq.s32.totalorder %v9801_v32, %v5767_v42 }
 0x19d   : >> { %v1371_v30 = vand.u32 4294901760, %v1218_v19  ;;  %vm789_vm1 = vcmp.eq.s32.totalorder %v9800_v33, %v5767_v42  ;;  %v894_v25 = vsel %vm787_vm0, %v5758_v55, 0.0  ;;  %v1720_v39 = vand.u32 4294901760, %v7205_v15 }
 0x19e   : >> { %v7268_v31 = vsub.f32 %v1216_v23, %v1367_v3  ;;  %v896_v21 = vsel %vm789_vm1, %v5758_v55, 0.0  ;;  %v1001_v27 = vsel %vm683_vm14, %v5774_v47, %v894_v25  ;;  %v1732_v48 = vand.u32 4294901760, %v7215_v16 }
 0x19f   : >> { %v7273_v37 = vpack.c.bf16 %v1371_v30, %v1367_v3  ;;  %v7275_v4 = vsub.f32 %v1218_v19, %v1371_v30  ;;  %v1003_v51 = vsel %vm685_vm15, %v5774_v47, %v896_v21  ;;  %v1108_v29 = vsel %vm579_vm12, %v5776_v52, %v1001_v27 }
 0x1a0   : >> { %9928 = vst [vmem:[#allocation162_spill] sm:$0xff] %v7268_v31  ;;  %v1110_v23 = vsel %vm581_vm13, %v5776_v52, %v1003_v51  ;;  %v1215_v3 = vsel %vm475_vm11, %v5743_v62, %v1108_v29  ;;  %v7291_v19 = vsub.f32 %v7205_v15, %v1720_v39  ;;  %v7294_v30 = vsub.f32 %v7215_v16, %v1732_v48 }
 0x1a1   : >> { %9929 = vst [vmem:[#allocation163_spill] sm:$0xff] %v7273_v37  ;;  %9930 = vst [vmem:[#allocation164_spill] sm:$0xff] %v7275_v4  ;;  %4344 = vmatprep.subr.bf16.mxu1 %v7273_v37  ;;  %v1217_v25 = vsel %vm477_vm6, %v5743_v62, %v1110_v23  ;;  %v1369_v21 = vand.u32 4294901760, %v1215_v3  ;;  %v4597_v51 = vpack.c.bf16 %v1732_v48, %v1720_v39 }
 0x1a2   : >> { %vm480_vm2 = vcmp.eq.s32.totalorder %v9799_v34, %v5800_v53  ;;  %v1373_v27 = vand.u32 4294901760, %v1217_v25  ;;  %vm482_vm4 = vcmp.eq.s32.totalorder %v9798_v35, %v5800_v53  ;;  %vm584_vm3 = vcmp.eq.s32.totalorder %v9799_v34, %v5787_v61 }
 0x1a3   : >> { %v7307_v16 = vsub.f32 %v1215_v3, %v1369_v21  ;;  %4598 = vmatpush1.bf16.msra.mxu0 %v4597_v51  ;;  %vm586_vm5 = vcmp.eq.s32.totalorder %v9798_v35, %v5787_v61  ;;  %vm688_vm7 = vcmp.eq.s32.totalorder %v9799_v34, %v5763_v0  ;;  %vm690_vm8 = vcmp.eq.s32.totalorder %v9798_v35, %v5763_v0 }
 0x1a4   : >> { %v7315_v48 = vpack.c.bf16 %v1373_v27, %v1369_v21  ;;  %v7317_v39 = vsub.f32 %v1217_v25, %v1373_v27  ;;  %vm792_vm9 = vcmp.eq.s32.totalorder %v9799_v34, %v5756_v44  ;;  %vm794_vm10 = vcmp.eq.s32.totalorder %v9798_v35, %v5756_v44 }
 0x1a5   : >> { %9931 = vst [vmem:[#allocation165_spill] sm:$0xff] %v7307_v16  ;;  %v899_v23 = vsel %vm792_vm9, %v5746_v60, 0.0  ;;  %v9556_v3 = vand.u32 4294901760, %v7268_v31  ;;  %v9555_v51 = vand.u32 4294901760, %v7275_v4  ;;  %v901_v25 = vsel %vm794_vm10, %v5746_v60, 0.0 }
 0x1a6   : >> { %9932 = vst [vmem:[#allocation166_spill] sm:$0xff] %v7315_v48  ;;  %9933 = vst [vmem:[#allocation167_spill] sm:$0xff] %v7317_v39  ;;  %4346 = vmatpush1.bf16.msra.mxu1 %v7315_v48  ;;  %v1006_v21 = vsel %vm688_vm7, %v5748_v63, %v899_v23  ;;  %vm479_vm11 = vcmp.eq.s32.totalorder %v9799_v34, %v5806_v41  ;;  %vm481_vm6 = vcmp.eq.s32.totalorder %v9798_v35, %v5806_v41 }
 0x1a7   : >> { %v1008_v27 = vsel %vm690_vm8, %v5748_v63, %v901_v25  ;;  %v1113_v32 = vsel %vm584_vm3, %v5750_v46, %v1006_v21  ;;  %v4599_v29 = vpack.c.bf16 %v9555_v51, %v9556_v3  ;;  %vm583_vm12 = vcmp.eq.s32.totalorder %v9799_v34, %v5791_v57 }
 0x1a8   : >> { %v1115_v23 = vsel %vm586_vm5, %v5750_v46, %v1008_v27  ;;  %v1220_v25 = vsel %vm480_vm2, %v5736_v59, %v1113_v32  ;;  %vm585_vm13 = vcmp.eq.s32.totalorder %v9798_v35, %v5791_v57  ;;  %vm687_vm14 = vcmp.eq.s32.totalorder %v9799_v34, %v5765_v43  ;;  %v9955_v57 = vld [vmem:[#allocation90_spill] sm:$0xff] }
 0x1a9   : >> { %v1222_v21 = vsel %vm482_vm4, %v5736_v59, %v1115_v23  ;;  %v1375_v51 = vand.u32 4294901760, %v1220_v25  ;;  %4600 = vmatprep.subr.bf16.mxu0 %v4599_v29  ;;  %vm689_vm15 = vcmp.eq.s32.totalorder %v9798_v35, %v5765_v43  ;;  %vm791_vm0 = vcmp.eq.s32.totalorder %v9799_v34, %v5767_v42 }
 0x1aa   : >> { %v1379_v32 = vand.u32 4294901760, %v1222_v21  ;;  %vm793_vm1 = vcmp.eq.s32.totalorder %v9798_v35, %v5767_v42  ;;  %v898_v27 = vsel %vm791_vm0, %v5758_v55, 0.0  ;;  %v1744_v3 = vand.u32 4294901760, %v7307_v16  ;;  %v9947_v35 = vld [vmem:[#allocation83_spill] sm:$0xff] }
 0x1ab   : >> { %v7370_v33 = vsub.f32 %v1220_v25, %v1375_v51  ;;  %v900_v23 = vsel %vm793_vm1, %v5758_v55, 0.0  ;;  %v1005_v29 = vsel %vm687_vm14, %v5774_v47, %v898_v27  ;;  %v1756_v15 = vand.u32 4294901760, %v7317_v39 }
 0x1ac   : >> { %v7375_v48 = vpack.c.bf16 %v1379_v32, %v1375_v51  ;;  %v7377_v37 = vsub.f32 %v1222_v21, %v1379_v32  ;;  %v1007_v43 = vsel %vm689_vm15, %v5774_v47, %v900_v23  ;;  %v1112_v42 = vsel %vm583_vm12, %v5776_v52, %v1005_v29  ;;  %v9937_v29 = vld [vmem:[#allocation31_spill] sm:$0xff] }
 0x1ad   : >> { %9934 = vst [vmem:[#allocation168_spill] sm:$0xff] %v7370_v33  ;;  %v1114_v25 = vsel %vm585_vm13, %v5776_v52, %v1007_v43  ;;  %v1219_v51 = vsel %vm479_vm11, %v5743_v62, %v1112_v42  ;;  %v7393_v21 = vsub.f32 %v7307_v16, %v1744_v3  ;;  %v7396_v32 = vsub.f32 %v7317_v39, %v1756_v15 }
 0x1ae   : >> { %9935 = vst [vmem:[#allocation169_spill] sm:$0xff] %v7375_v48  ;;  %9936 = vst [vmem:[#allocation170_spill] sm:$0xff] %v7377_v37  ;;  %4348 = vmatprep.subr.bf16.mxu1 %v7375_v48  ;;  %v1221_v27 = vsel %vm481_vm6, %v5743_v62, %v1114_v25  ;;  %v1377_v23 = vand.u32 4294901760, %v1219_v51  ;;  %v4601_v43 = vpack.c.bf16 %v1756_v15, %v1744_v3  ;;  %v7404_v52 = vand.u32 4294901760, %v9937_v29 }
 0x1af   : >> { %v1381_v34 = vand.u32 4294901760, %v1221_v27  ;;  %v9938_v39 = vand.u32 4294901760, %v5910_v58  ;;  %v9939_v47 = vand.u32 4294901760, %v5913_v38  ;;  %v9581_v15 = vand.u32 4294901760, %v7370_v33  ;;  %v9944_v58 = vld [vmem:[#allocation30_spill] sm:$0xff] }
 0x1b0   : >> { %v7412_v55 = vsub.f32 %v1219_v51, %v1377_v23  ;;  %4602 = vmatpush1.bf16.msra.mxu0 %v4601_v43  ;;  %v7416_v25 = vsub.f32 %v9937_v29, %v7404_v52  ;;  %v9580_v3 = vand.u32 4294901760, %v7377_v37  ;;  %2394 = vmatprep.mubr.f32.mxu0 %v7404_v52  ;;  %v7426_v38 = vand.u32 4294901760, %v9944_v58 }
 0x1b1   : >> { %v4351_v48 = vpack.c.bf16 %v9939_v47, %v9938_v39  ;;  %v7421_v42 = vpack.c.bf16 %v1381_v34, %v1377_v23  ;;  %v7423_v16 = vsub.f32 %v1221_v27, %v1381_v34  ;;  %v9945_v47 = vand.u32 4294901760, %v5973_v54 }
 0x1b2   : >> { %9940 = vst [vmem:[#allocation171_spill] sm:$0xff] %v7412_v55  ;;  %9941 = vst [vmem:[#allocation172_spill] sm:$0xff] %v7416_v25  ;;  %v9946_v39 = vand.u32 4294901760, %v5978_v2  ;;  %v4603_v29 = vpack.c.bf16 %v9580_v3, %v9581_v15  ;;  %v1768_v23 = vand.u32 4294901760, %v7412_v55  ;;  %v9948_v34 = vand.u32 4294901760, %v9947_v35 }
 0x1b3   : >> { %9942 = vst [vmem:[#allocation173_spill] sm:$0xff] %v7421_v42  ;;  %9943 = vst [vmem:[#allocation174_spill] sm:$0xff] %v7423_v16  ;;  %4350 = vmatpush1.bf16.msra.mxu1 %v7421_v42  ;;  %v7444_v54 = vsub.f32 %v9944_v58, %v7426_v38  ;;  %v1780_v2 = vand.u32 4294901760, %v7423_v16  ;;  %v9952_v3 = vand.u32 4294901760, %v6067_v50  ;;  %v9953_v15 = vand.u32 4294901760, %v6070_v1 }
 0x1b4   : >> { %v4353_v51 = vpack.c.bf16 %v9946_v39, %v9945_v47  ;;  %v1427_v27 = vsub.f32 %v9947_v35, %v9948_v34  ;;  %v9950_v47 = vld [vmem:[#allocation84_spill] sm:$0xff]  ;;  %v9954_v34 = vand.u32 4294901760, %v7416_v25  ;;  %4352 = vmatprep.subr.bf16.mxu1 %v4351_v48  ;;  %4604 = vmatprep.subr.bf16.mxu0 %v4603_v29  ;;  %v7460_v58 = vsub.f32 %v7412_v55, %v1768_v23 }
 0x1b5   : >> { %9949 = vst [vmem:[#allocation83_spill] sm:$0xff] %v7444_v54  ;;  %v9951_v39 = vand.u32 4294901760, %v9950_v47  ;;  %v7454_v62 = vpack.c.bf16 %v9953_v15, %v9952_v3  ;;  %v9956_v46 = vand.u32 4294901760, %v9955_v57  ;;  %v9601_v50 = vand.u32 4294901760, %v7444_v54  ;;  %v9957_v29 = vld [vmem:[#allocation92_spill] sm:$0xff] }
 0x1b6   : >> { %v1386_v42 = vsub.f32 %v7416_v25, %v9954_v34  ;;  %v1428_v59 = vand.u32 4294901760, %v1427_v27  ;;  %v7467_v1 = vsub.f32 %v7423_v16, %v1780_v2  ;;  %v4605_v15 = vpack.c.bf16 %v1780_v2, %v1768_v23  ;;  %v9961_v23 = vld [vmem:[#allocation78_spill] sm:$0xff] }
 0x1b7   : >> { %v1439_v43 = vsub.f32 %v9950_v47, %v9951_v39  ;;  %v1451_v39 = vsub.f32 %v9955_v57, %v9956_v46  ;;  %v9958_v25 = vand.u32 4294901760, %v9957_v29  ;;  %v1392_v27 = vsub.f32 %v7444_v54, %v9601_v50 }
 0x1b8   : >> { %v1387_v63 = vand.u32 4294901760, %v1386_v42  ;;  %4606 = vmatpush1.bf16.msra.mxu0 %v4605_v15  ;;  %v9959_v16 = vand.u32 4294901760, %v6169_v56  ;;  %v9967_v56 = vand.u32 4294901760, %v6274_v7 }
 0x1b9   : >> { %v1440_v3 = vand.u32 4294901760, %v1439_v43  ;;  %v1452_v48 = vand.u32 4294901760, %v1451_v39  ;;  %v1463_v55 = vsub.f32 %v9957_v29, %v9958_v25  ;;  %v9960_v43 = vand.u32 4294901760, %v6172_v5  ;;  %4608 = vmatprep.subr.bf16.mxu0 %v9961_v23  ;;  %v9962_v39 = vld [vmem:[#allocation96_spill] sm:$0xff]  ;;  %v9964_v29 = vld [vmem:[#allocation98_spill] sm:$0xff] }
 0x1ba   : >> { %1388 = vmatprep.mubr.f32.mxu1 %v1387_v63  ;;  %v9963_v25 = vand.u32 4294901760, %v9962_v39  ;;  %v9965_v50 = vand.u32 4294901760, %v9964_v29  ;;  %v1393_v5 = vand.u32 4294901760, %v1392_v27  ;;  %v9973_v23 = vand.u32 4294901760, %v6376_v9  ;;  %v9974_v27 = vld [vmem:[#allocation108_spill] sm:$0xff] }
 0x1bb   : >> { %v4355_v57 = vpack.c.bf16 %v1440_v3, %v1428_v59  ;;  %v7481_v42 = vpack.c.bf16 %v9960_v43, %v9959_v16  ;;  %v1464_v2 = vand.u32 4294901760, %v1463_v55  ;;  %v9966_v59 = vand.u32 4294901760, %v6271_v49  ;;  %v9968_v16 = vld [vmem:[#allocation102_spill] sm:$0xff]  ;;  %v9970_v55 = vld [vmem:[#allocation104_spill] sm:$0xff]  ;;  %2396 = vmatmul.mubr.f32.vlgmr.msra.gmra.mrb[0].mxu0 %v7426_v38 }
 0x1bc   : >> { %v1475_v34 = vsub.f32 %v9962_v39, %v9963_v25  ;;  %v1487_v46 = vsub.f32 %v9964_v29, %v9965_v50  ;;  %v9969_v63 = vand.u32 4294901760, %v9968_v16  ;;  %v9971_v43 = vand.u32 4294901760, %v9970_v55  ;;  %1394 = vmatmul.mubr.f32.vlgmr.msra.gmra.mrb[0].mxu1 %v1393_v5  ;;  %v9982_v5 = vld [vmem:[#allocation114_spill] sm:$0xff]  ;;  %2531 = vmatprep.mubr.f32.mxu0 %v7404_v52 }
 0x1bd   : >> { %v7494_v15 = vpack.c.bf16 %v9967_v56, %v9966_v59  ;;  %v9972_v25 = vand.u32 4294901760, %v6373_v45  ;;  %v4359_v49 = vpack.c.bf16 %v1464_v2, %v1452_v48  ;;  %v9975_v56 = vand.u32 4294901760, %v9974_v27  ;;  %4354 = vmatpush1.bf16.msra.mxu1 %v4353_v51  ;;  %1785 = vmatprep.mubr.f32.mxu1 %v7404_v52 }
 0x1be   : >> { %v1499_v3 = vsub.f32 %v9968_v16, %v9969_v63  ;;  %v1511_v54 = vsub.f32 %v9970_v55, %v9971_v43  ;;  %v1476_v7 = vand.u32 4294901760, %v1475_v34  ;;  %v1488_v59 = vand.u32 4294901760, %v1487_v46  ;;  %v9976_v63 = vld [vmem:[#allocation81_spill] sm:$0xff]  ;;  %v9977_v55 = vld [vmem:[#allocation110_spill] sm:$0xff]  ;;  %4356 = vmatprep.subr.bf16.mxu1 %v4355_v57 }
 0x1bf   : >> { %v7506_v50 = vpack.c.bf16 %v9973_v23, %v9972_v25  ;;  %v1523_v29 = vsub.f32 %v9974_v27, %v9975_v56  ;;  %4610 = vmatpush1.bf16.msra.mxu0 %v9976_v63  ;;  %v9978_v45 = vand.u32 4294901760, %v9977_v55  ;;  %v9979_v23 = vand.u32 4294901760, %v6475_v36  ;;  %v9981_v34 = vld [vmem:[#allocation82_spill] sm:$0xff] }
 0x1c0   : >> { %v1500_v16 = vand.u32 4294901760, %v1499_v3  ;;  %v1512_v43 = vand.u32 4294901760, %v1511_v54  ;;  %v9980_v25 = vand.u32 4294901760, %v6478_v11  ;;  %4612 = vmatprep.subr.bf16.mxu0 %v9981_v34  ;;  %v4363_v46 = vpack.c.bf16 %v1488_v59, %v1476_v7  ;;  %v9984_v54 = vld [vmem:[#allocation116_spill] sm:$0xff]  ;;  %v9990_v34 = vld [vmem:[#allocation122_spill] sm:$0xff] }
 0x1c1   : >> { %v1535_v9 = vsub.f32 %v9977_v55, %v9978_v45  ;;  %v1524_v2 = vand.u32 4294901760, %v1523_v29  ;;  %v9983_v56 = vand.u32 4294901760, %v9982_v5  ;;  %v9985_v63 = vand.u32 4294901760, %v9984_v54  ;;  %4358 = vmatpush1.bf16.msra.mxu1 %v7454_v62 }
 0x1c2   : >> { %v7520_v48 = vpack.c.bf16 %v9980_v25, %v9979_v23  ;;  %v4367_v45 = vpack.c.bf16 %v1512_v43, %v1500_v16  ;;  %v9986_v11 = vand.u32 4294901760, %v6577_v14  ;;  %v9987_v23 = vand.u32 4294901760, %v6580_v13  ;;  %v9988_v25 = vld [vmem:[#allocation120_spill] sm:$0xff]  ;;  %v9994_v13 = vld [vmem:[#allocation87_spill] sm:$0xff]  ;;  %4360 = vmatprep.subr.bf16.mxu1 %v4359_v49 }
 0x1c3   : >> { %v1547_v3 = vsub.f32 %v9982_v5, %v9983_v56  ;;  %v1559_v27 = vsub.f32 %v9984_v54, %v9985_v63  ;;  %v1536_v36 = vand.u32 4294901760, %v1535_v9  ;;  %v9989_v7 = vand.u32 4294901760, %v9988_v25  ;;  %4614 = vmatpush1.bf16.msra.mxu0 %v9994_v13  ;;  %v10010_v49 = vld [vmem:[#allocation140_spill] sm:$0xff] }
 0x1c4   : >> { %v7533_v51 = vpack.c.bf16 %v9987_v23, %v9986_v11  ;;  %v9991_v5 = vand.u32 4294901760, %v9990_v34  ;;  %v9992_v16 = vand.u32 4294901760, %v6679_v40  ;;  %v9993_v14 = vand.u32 4294901760, %v6682_v18  ;;  %v9995_v11 = vld [vmem:[#allocation126_spill] sm:$0xff]  ;;  %v9997_v23 = vld [vmem:[#allocation128_spill] sm:$0xff]  ;;  %v9999_v40 = vld [vmem:[#allocation91_spill] sm:$0xff] }
 0x1c5   : >> { %v1571_v29 = vsub.f32 %v9988_v25, %v9989_v7  ;;  %v1548_v59 = vand.u32 4294901760, %v1547_v3  ;;  %v1560_v56 = vand.u32 4294901760, %v1559_v27  ;;  %v7550_v43 = vpack.c.bf16 %v1536_v36, %v1524_v2  ;;  %4616 = vmatprep.subr.bf16.mxu0 %v9999_v40  ;;  %4362 = vmatpush1.bf16.msra.mxu1 %v7481_v42 }
 0x1c6   : >> { %v1583_v57 = vsub.f32 %v9990_v34, %v9991_v5  ;;  %v7546_v63 = vpack.c.bf16 %v9993_v14, %v9992_v16  ;;  %v9996_v3 = vand.u32 4294901760, %v9995_v11  ;;  %v9998_v7 = vand.u32 4294901760, %v9997_v23  ;;  %4364 = vmatprep.subr.bf16.mxu1 %v4363_v46  ;;  %v10028_v46 = vld [vmem:[#allocation156_spill] sm:$0xff] }
 0x1c7   : >> { %v1572_v9 = vand.u32 4294901760, %v1571_v29  ;;  %v7560_v18 = vpack.c.bf16 %v1560_v56, %v1548_v59  ;;  %v10000_v16 = vand.u32 4294901760, %v6781_v6  ;;  %v10001_v2 = vand.u32 4294901760, %v6784_v20  ;;  %v10002_v29 = vld [vmem:[#allocation132_spill] sm:$0xff] }
 0x1c8   : >> { %v1595_v27 = vsub.f32 %v9995_v11, %v9996_v3  ;;  %v1607_v5 = vsub.f32 %v9997_v23, %v9998_v7  ;;  %v1584_v52 = vand.u32 4294901760, %v1583_v57  ;;  %v10003_v14 = vand.u32 4294901760, %v10002_v29  ;;  %v10004_v23 = vld [vmem:[#allocation134_spill] sm:$0xff] }
 0x1c9   : >> { %v7566_v36 = vpack.c.bf16 %v10001_v2, %v10000_v16  ;;  %v10005_v62 = vand.u32 4294901760, %v10004_v23  ;;  %v10006_v59 = vand.u32 4294901760, %v6883_v8  ;;  %v10007_v56 = vand.u32 4294901760, %v6886_v22  ;;  %v10008_v16 = vld [vmem:[#allocation138_spill] sm:$0xff]  ;;  %4366 = vmatpush1.bf16.msra.mxu1 %v7494_v15 }
 0x1ca   : >> { %v1619_v3 = vsub.f32 %v10002_v29, %v10003_v14  ;;  %v1596_v13 = vand.u32 4294901760, %v1595_v27  ;;  %v1608_v7 = vand.u32 4294901760, %v1607_v5  ;;  %v7580_v20 = vpack.c.bf16 %v1584_v52, %v1572_v9  ;;  %v10012_v29 = vld [vmem:[#allocation94_spill] sm:$0xff]  ;;  %v10015_v52 = vld [vmem:[#allocation144_spill] sm:$0xff]  ;;  %4368 = vmatprep.subr.bf16.mxu1 %v4367_v45 }
 0x1cb   : >> { %v1631_v40 = vsub.f32 %v10004_v23, %v10005_v62  ;;  %v7578_v6 = vpack.c.bf16 %v10007_v56, %v10006_v59  ;;  %v10009_v2 = vand.u32 4294901760, %v10008_v16  ;;  %v10011_v27 = vand.u32 4294901760, %v10010_v49  ;;  %4618 = vmatpush1.bf16.msra.mxu0 %v10012_v29  ;;  %v10018_v29 = vld [vmem:[#allocation146_spill] sm:$0xff]  ;;  %v10081_v23 = vld [vmem:[#allocation127_spill] sm:$0xff] }
 0x1cc   : >> { %v1620_v57 = vand.u32 4294901760, %v1619_v3  ;;  %v7589_v62 = vpack.c.bf16 %v1608_v7, %v1596_v13  ;;  %v10013_v22 = vand.u32 4294901760, %v6985_v10  ;;  %v10014_v59 = vand.u32 4294901760, %v6988_v24 }
 0x1cd   : >> { %v1643_v14 = vsub.f32 %v10008_v16, %v10009_v2  ;;  %v1655_v5 = vsub.f32 %v10010_v49, %v10011_v27  ;;  %v1632_v8 = vand.u32 4294901760, %v1631_v40  ;;  %v10016_v3 = vand.u32 4294901760, %v10015_v52  ;;  %v10017_v2 = vld [vmem:[#allocation97_spill] sm:$0xff]  ;;  %4370 = vmatpush1.bf16.msra.mxu1 %v7506_v50 }
 0x1ce   : >> { %v7595_v9 = vpack.c.bf16 %v10014_v59, %v10013_v22  ;;  %4620 = vmatprep.subr.bf16.mxu0 %v10017_v2  ;;  %v10019_v13 = vand.u32 4294901760, %v10018_v29  ;;  %v10020_v10 = vand.u32 4294901760, %v7087_v12  ;;  %v10021_v24 = vand.u32 4294901760, %v7090_v26  ;;  %4372 = vmatprep.subr.bf16.mxu1 %v7550_v43  ;;  %v10052_v43 = vld [vmem:[#allocation112_spill] sm:$0xff] }
 0x1cf   : >> { %v1667_v56 = vsub.f32 %v10015_v52, %v10016_v3  ;;  %v1644_v27 = vand.u32 4294901760, %v1643_v14  ;;  %v1656_v49 = vand.u32 4294901760, %v1655_v5  ;;  %v7611_v22 = vpack.c.bf16 %v1632_v8, %v1620_v57  ;;  %v10022_v3 = vld [vmem:[#allocation150_spill] sm:$0xff]  ;;  %v10024_v14 = vld [vmem:[#allocation152_spill] sm:$0xff] }
 0x1d0   : >> { %v1679_v40 = vsub.f32 %v10018_v29, %v10019_v13  ;;  %v7609_v7 = vpack.c.bf16 %v10021_v24, %v10020_v10  ;;  %v10023_v42 = vand.u32 4294901760, %v10022_v3  ;;  %v10025_v5 = vand.u32 4294901760, %v10024_v14 }
 0x1d1   : >> { %v1668_v59 = vand.u32 4294901760, %v1667_v56  ;;  %v7619_v16 = vpack.c.bf16 %v1656_v49, %v1644_v27  ;;  %v10026_v12 = vand.u32 4294901760, %v7189_v17  ;;  %v10027_v26 = vand.u32 4294901760, %v7192_v28  ;;  %v10030_v56 = vld [vmem:[#allocation100_spill] sm:$0xff]  ;;  %v10035_v28 = vld [vmem:[#allocation103_spill] sm:$0xff]  ;;  %4374 = vmatpush1.bf16.msra.mxu1 %v7520_v48 }
 0x1d2   : >> { %v1691_v2 = vsub.f32 %v10022_v3, %v10023_v42  ;;  %v1703_v52 = vsub.f32 %v10024_v14, %v10025_v5  ;;  %v1680_v13 = vand.u32 4294901760, %v1679_v40  ;;  %v10029_v57 = vand.u32 4294901760, %v10028_v46  ;;  %4622 = vmatpush1.bf16.msra.mxu0 %v10030_v56  ;;  %v10031_v3 = vld [vmem:[#allocation158_spill] sm:$0xff]  ;;  %4376 = vmatprep.subr.bf16.mxu1 %v7560_v18  ;;  %v10078_v14 = vld [vmem:[#allocation69_spill] sm:$0xff] }
 0x1d3   : >> { %v7625_v10 = vpack.c.bf16 %v10027_v26, %v10026_v12  ;;  %v10032_v29 = vand.u32 4294901760, %v10031_v3  ;;  %v10033_v27 = vand.u32 4294901760, %v7291_v19  ;;  %v10034_v17 = vand.u32 4294901760, %v7294_v30  ;;  %4624 = vmatprep.subr.bf16.mxu0 %v10035_v28 }
 0x1d4   : >> { %v1715_v8 = vsub.f32 %v10028_v46, %v10029_v57  ;;  %v1692_v24 = vand.u32 4294901760, %v1691_v2  ;;  %v1704_v42 = vand.u32 4294901760, %v1703_v52  ;;  %v7642_v5 = vpack.c.bf16 %v1680_v13, %v1668_v59  ;;  %v10075_v46 = vld [vmem:[#allocation76_spill] sm:$0xff] }
 0x1d5   : >> { %v1727_v49 = vsub.f32 %v10031_v3, %v10032_v29  ;;  %v7638_v40 = vpack.c.bf16 %v10034_v17, %v10033_v27  ;;  %v10036_v2 = vand.u32 4294901760, %v7268_v31  ;;  %v10037_v26 = vand.u32 4294901760, %v7275_v4  ;;  %4378 = vmatpush1.bf16.msra.mxu1 %v7533_v51  ;;  %v10074_v3 = vld [vmem:[#allocation75_spill] sm:$0xff] }
 0x1d6   : >> { %v1716_v12 = vand.u32 4294901760, %v1715_v8  ;;  %v7650_v19 = vpack.c.bf16 %v1704_v42, %v1692_v24  ;;  %v10038_v57 = vand.u32 4294901760, %v7393_v21  ;;  %v10039_v15 = vand.u32 4294901760, %v7396_v32  ;;  %v10044_v21 = vld [vmem:[#allocation106_spill] sm:$0xff]  ;;  %4380 = vmatprep.subr.bf16.mxu1 %v7580_v20 }
 0x1d7   : >> { %v1739_v52 = vsub.f32 %v7268_v31, %v10036_v2  ;;  %v1751_v29 = vsub.f32 %v7275_v4, %v10037_v26  ;;  %v1728_v30 = vand.u32 4294901760, %v1727_v49  ;;  %v10040_v59 = vand.u32 4294901760, %v7370_v33  ;;  %4626 = vmatpush1.bf16.msra.mxu0 %v10044_v21  ;;  %v10066_v21 = vld [vmem:[#allocation72_spill] sm:$0xff] }
 0x1d8   : >> { %v7656_v27 = vpack.c.bf16 %v10039_v15, %v10038_v57  ;;  %v10041_v2 = vand.u32 4294901760, %v7377_v37  ;;  %v10042_v45 = vand.u32 4294901760, %v7460_v58  ;;  %v10043_v24 = vand.u32 4294901760, %v7467_v1  ;;  %v10045_v57 = vld [vmem:[#allocation79_spill] sm:$0xff]  ;;  %v10046_v15 = vld [vmem:[#allocation80_spill] sm:$0xff] }
 0x1d9   : >> { %v1763_v13 = vsub.f32 %v7370_v33, %v10040_v59  ;;  %v1740_v8 = vand.u32 4294901760, %v1739_v52  ;;  %v1752_v17 = vand.u32 4294901760, %v1751_v29  ;;  %v7671_v32 = vpack.c.bf16 %v1728_v30, %v1716_v12  ;;  %v10047_v52 = vld [vmem:[#allocation85_spill] sm:$0xff]  ;;  %v10048_v29 = vld [vmem:[#allocation86_spill] sm:$0xff]  ;;  %v10050_v12 = vld [vmem:[#allocation52_spill] sm:$0xff]  ;;  %4382 = vmatpush1.bf16.msra.mxu1 %v7546_v63 }
 0x1da   : >> { %v1775_v26 = vsub.f32 %v7377_v37, %v10041_v2  ;;  %v7668_v42 = vpack.c.bf16 %v10043_v24, %v10042_v45  ;;  %v10049_v2 = vld [vmem:[#allocation109_spill] sm:$0xff]  ;;  %vm484_vm2 = vcmp.eq.s32.totalorder %v10050_v12, %v5800_v53  ;;  %vm588_vm3 = vcmp.eq.s32.totalorder %v10050_v12, %v5787_v61  ;;  %v10057_v59 = vld [vmem:[#allocation71_spill] sm:$0xff]  ;;  %v10067_v33 = vld [vmem:[#allocation90_spill] sm:$0xff]  ;;  %4384 = vmatprep.subr.bf16.mxu1 %v7589_v62 }
 0x1db   : >> { %v1764_v49 = vand.u32 4294901760, %v1763_v13  ;;  %4628 = vmatprep.subr.bf16.mxu0 %v10049_v2  ;;  %v7679_v58 = vpack.c.bf16 %v1752_v17, %v1740_v8  ;;  %v10051_v30 = vld [vmem:[#allocation53_spill] sm:$0xff]  ;;  %vm692_vm7 = vcmp.eq.s32.totalorder %v10050_v12, %v5763_v0  ;;  %vm796_vm9 = vcmp.eq.s32.totalorder %v10050_v12, %v5756_v44  ;;  %v10053_v17 = vld [vmem:[#allocation88_spill] sm:$0xff] }
 0x1dc   : >> { %v1776_v1 = vand.u32 4294901760, %v1775_v26  ;;  %vm486_vm4 = vcmp.eq.s32.totalorder %v10051_v30, %v5800_v53  ;;  %vm590_vm5 = vcmp.eq.s32.totalorder %v10051_v30, %v5787_v61  ;;  %vm694_vm8 = vcmp.eq.s32.totalorder %v10051_v30, %v5763_v0  ;;  %4630 = vmatpush1.bf16.msra.mxu0 %v10052_v43  ;;  %v10054_v26 = vld [vmem:[#allocation89_spill] sm:$0xff]  ;;  %v10069_v43 = vld [vmem:[#allocation54_spill] sm:$0xff] }
 0x1dd   : >> { %vm798_vm10 = vcmp.eq.s32.totalorder %v10051_v30, %v5756_v44  ;;  %v903_v13 = vsel %vm796_vm9, %v5746_v60, 0.0  ;;  %vm483_vm11 = vcmp.eq.s32.totalorder %v10050_v12, %v5806_v41  ;;  %vm485_vm6 = vcmp.eq.s32.totalorder %v10051_v30, %v5806_v41  ;;  %4386 = vmatpush1.bf16.msra.mxu1 %v7566_v36 }
 0x1de   : >> { %v7694_v50 = vpack.c.bf16 %v1776_v1, %v1764_v49  ;;  %v905_v8 = vsel %vm798_vm10, %v5746_v60, 0.0  ;;  %v10055_v49 = vld [vmem:[#allocation115_spill] sm:$0xff]  ;;  %v10056_v1 = vld [vmem:[#allocation70_spill] sm:$0xff]  ;;  %vm800_vm9 = vcmp.eq.s32.totalorder %v10069_v43, %v5756_v44  ;;  %4388 = vmatprep.subr.bf16.mxu1 %v7611_v22 }
 0x1df   : >> { %4632 = vmatprep.subr.bf16.mxu0 %v10055_v49  ;;  %v1010_v45 = vsel %vm692_vm7, %v10056_v1, %v903_v13  ;;  %v1012_v28 = vsel %vm694_vm8, %v10056_v1, %v905_v8  ;;  %v10058_v49 = vld [vmem:[#allocation77_spill] sm:$0xff]  ;;  %v10059_v13 = vld [vmem:[#allocation68_spill] sm:$0xff]  ;;  %vm696_vm7 = vcmp.eq.s32.totalorder %v10069_v43, %v5763_v0 }
 0x1e0   : >> { %v1117_v24 = vsel %vm588_vm3, %v10057_v59, %v1010_v45  ;;  %v1119_v48 = vsel %vm590_vm5, %v10057_v59, %v1012_v28  ;;  %vm587_vm12 = vcmp.eq.s32.totalorder %v10050_v12, %v10058_v49  ;;  %vm589_vm13 = vcmp.eq.s32.totalorder %v10051_v30, %v10058_v49  ;;  %v10062_v8 = vld [vmem:[#allocation73_spill] sm:$0xff]  ;;  %v10063_v28 = vld [vmem:[#allocation118_spill] sm:$0xff] }
 0x1e1   : >> { %v7732_v18 = vsel %vm484_vm2, %v10059_v13, %v1117_v24  ;;  %v7738_v45 = vsel %vm486_vm4, %v10059_v13, %v1119_v48  ;;  %vm691_vm14 = vcmp.eq.s32.totalorder %v10050_v12, %v10062_v8  ;;  %vm693_vm15 = vcmp.eq.s32.totalorder %v10051_v30, %v10062_v8  ;;  %4634 = vmatpush1.bf16.msra.mxu0 %v10063_v28  ;;  %v10064_v24 = vld [vmem:[#allocation74_spill] sm:$0xff]  ;;  %v10065_v48 = vld [vmem:[#allocation121_spill] sm:$0xff]  ;;  %v10068_v28 = vld [vmem:[#allocation92_spill] sm:$0xff] }
 0x1e2   : >> { %10060 = vst [vmem:[#allocation84_spill] sm:$0xff] %v7732_v18  ;;  %10061 = vst [vmem:[#allocation96_spill] sm:$0xff] %v7738_v45  ;;  %vm795_vm0 = vcmp.eq.s32.totalorder %v10050_v12, %v10064_v24  ;;  %vm797_vm1 = vcmp.eq.s32.totalorder %v10051_v30, %v10064_v24  ;;  %4636 = vmatprep.subr.bf16.mxu0 %v10065_v48  ;;  %vm488_vm2 = vcmp.eq.s32.totalorder %v10069_v43, %v5800_v53 }
 0x1e3   : >> { %v902_v56 = vsel %vm795_vm0, %v10066_v21, 0.0  ;;  %v904_v37 = vsel %vm797_vm1, %v10066_v21, 0.0  ;;  %v10070_v2 = vand.u32 4294901760, %v7732_v18  ;;  %v10072_v51 = vand.u32 4294901760, %v7738_v45  ;;  %4390 = vmatpush1.bf16.msra.mxu1 %v7578_v6 }
 0x1e4   : >> { %v1009_v4 = vsel %vm691_vm14, %v10074_v3, %v902_v56  ;;  %v1011_v20 = vsel %vm693_vm15, %v10074_v3, %v904_v37  ;;  %vm592_vm3 = vcmp.eq.s32.totalorder %v10069_v43, %v5787_v61  ;;  %v10077_v56 = vld [vmem:[#allocation124_spill] sm:$0xff]  ;;  %4392 = vmatprep.subr.bf16.mxu1 %v7619_v16  ;;  %vm695_vm14 = vcmp.eq.s32.totalorder %v10069_v43, %v10062_v8 }
 0x1e5   : >> { %v7763_v31 = vsub.f32 %v7732_v18, %v10070_v2  ;;  %v7768_v48 = vsub.f32 %v7738_v45, %v10072_v51  ;;  %v1116_v2 = vsel %vm587_vm12, %v10075_v46, %v1009_v4  ;;  %v1118_v51 = vsel %vm589_vm13, %v10075_v46, %v1011_v20  ;;  %v10076_v45 = vld [vmem:[#allocation55_spill] sm:$0xff]  ;;  %4638 = vmatpush1.bf16.msra.mxu0 %v10077_v56 }
 0x1e6   : >> { %vm490_vm4 = vcmp.eq.s32.totalorder %v10076_v45, %v5800_v53  ;;  %v7797_v4 = vsel %vm483_vm11, %v10078_v14, %v1116_v2  ;;  %v7803_v20 = vsel %vm485_vm6, %v10078_v14, %v1118_v51  ;;  %4640 = vmatprep.subr.bf16.mxu0 %v10081_v23  ;;  %vm594_vm5 = vcmp.eq.s32.totalorder %v10076_v45, %v5787_v61 }
 0x1e7   : >> { %10071 = vst [vmem:[#allocation110_spill] sm:$0xff] %v7763_v31  ;;  %10073 = vst [vmem:[#allocation116_spill] sm:$0xff] %v7768_v48  ;;  %v9632_v37 = vand.u32 4294901760, %v7797_v4  ;;  %v10082_v2 = vand.u32 4294901760, %v7763_v31  ;;  %v10083_v63 = vand.u32 4294901760, %v7768_v48  ;;  %vm698_vm8 = vcmp.eq.s32.totalorder %v10076_v45, %v5763_v0  ;;  %4394 = vmatpush1.bf16.msra.mxu1 %v7595_v9 }
 0x1e8   : >> { %10079 = vst [vmem:[#allocation120_spill] sm:$0xff] %v7797_v4  ;;  %10080 = vst [vmem:[#allocation122_spill] sm:$0xff] %v7803_v20  ;;  %v10085_v62 = vand.u32 4294901760, %v7803_v20  ;;  %vm802_vm10 = vcmp.eq.s32.totalorder %v10076_v45, %v5756_v44  ;;  %vm487_vm11 = vcmp.eq.s32.totalorder %v10069_v43, %v5806_v41  ;;  %vm489_vm6 = vcmp.eq.s32.totalorder %v10076_v45, %v5806_v41 }
 0x1e9   : >> { %v2650_v51 = vsub.f32 %v7763_v31, %v10082_v2  ;;  %v2662_v12 = vsub.f32 %v7768_v48, %v10083_v63  ;;  %v7827_v18 = vsub.f32 %v7797_v4, %v9632_v37  ;;  %v907_v2 = vsel %vm800_vm9, %v5746_v60, 0.0  ;;  %v10087_v63 = vld [vmem:[#allocation130_spill] sm:$0xff]  ;;  %v10088_v37 = vld [vmem:[#allocation133_spill] sm:$0xff]  ;;  %4396 = vmatprep.subr.bf16.mxu1 %v7642_v5 }
 0x1ea   : >> { %v7832_v30 = vsub.f32 %v7803_v20, %v10085_v62  ;;  %4642 = vmatpush1.bf16.msra.mxu0 %v10087_v63  ;;  %v909_v48 = vsel %vm802_vm10, %v5746_v60, 0.0  ;;  %v1014_v31 = vsel %vm696_vm7, %v10056_v1, %v907_v2  ;;  %v10091_v20 = vld [vmem:[#allocation95_spill] sm:$0xff]  ;;  %vm591_vm12 = vcmp.eq.s32.totalorder %v10069_v43, %v10058_v49 }
 0x1eb   : >> { %10084 = vst [vmem:[#allocation126_spill] sm:$0xff] %v7827_v18  ;;  %v2651_v23 = vand.u32 4294901760, %v2650_v51  ;;  %v2663_v56 = vand.u32 4294901760, %v2662_v12  ;;  %4644 = vmatprep.subr.bf16.mxu0 %v10088_v37  ;;  %v1016_v4 = vsel %vm698_vm8, %v10056_v1, %v909_v48  ;;  %v1121_v51 = vsel %vm592_vm3, %v10057_v59, %v1014_v31  ;;  %v10090_v48 = vld [vmem:[#allocation93_spill] sm:$0xff]  ;;  %v10095_v37 = vld [vmem:[#allocation136_spill] sm:$0xff]  ;;  %4398 = vmatpush1.bf16.msra.mxu1 %v7609_v7 }
 0x1ec   : >> { %10086 = vst [vmem:[#allocation79_spill] sm:$0xff] %v7832_v30  ;;  %v1123_v36 = vsel %vm594_vm5, %v10057_v59, %v1016_v4  ;;  %v7860_v2 = vsel %vm488_vm2, %v10059_v13, %v1121_v51  ;;  %v10092_v31 = vand.u32 4294901760, %v7827_v18  ;;  %vm593_vm13 = vcmp.eq.s32.totalorder %v10076_v45, %v10058_v49  ;;  %4400 = vmatprep.subr.bf16.mxu1 %v7650_v19  ;;  %v10109_v19 = vld [vmem:[#allocation99_spill] sm:$0xff] }
 0x1ed   : >> { %v7850_v12 = vpack.c.bf16 %v2663_v56, %v2651_v23  ;;  %10089 = vst [vmem:[#allocation80_spill] sm:$0xff] %v7860_v2  ;;  %v10093_v23 = vand.u32 4294901760, %v7832_v30  ;;  %v7874_v4 = vsel %vm490_vm4, %v10059_v13, %v1123_v36  ;;  %v9636_v51 = vand.u32 4294901760, %v7860_v2 }
 0x1ee   : >> { %v2656_v22 = vsub.f32 %v7827_v18, %v10092_v31  ;;  %10094 = vst [vmem:[#allocation85_spill] sm:$0xff] %v7874_v4  ;;  %4646 = vmatpush1.bf16.msra.mxu0 %v10095_v37  ;;  %v9635_v62 = vand.u32 4294901760, %v7874_v4  ;;  %v10096_v31 = vld [vmem:[#allocation139_spill] sm:$0xff]  ;;  %vm697_vm15 = vcmp.eq.s32.totalorder %v10076_v45, %v10062_v8  ;;  %vm799_vm0 = vcmp.eq.s32.totalorder %v10069_v43, %v10064_v24 }
 0x1ef   : >> { %v2668_v56 = vsub.f32 %v7832_v30, %v10093_v23  ;;  %4648 = vmatprep.subr.bf16.mxu0 %v10096_v31  ;;  %v7890_v37 = vsub.f32 %v7860_v2, %v9636_v51  ;;  %vm801_vm1 = vcmp.eq.s32.totalorder %v10076_v45, %v10064_v24  ;;  %v906_v16 = vsel %vm799_vm0, %v10066_v21, 0.0  ;;  %4402 = vmatpush1.bf16.msra.mxu1 %v7625_v10 }
 0x1f0   : >> { %v2657_v36 = vand.u32 4294901760, %v2656_v22  ;;  %v7898_v63 = vsub.f32 %v7874_v4, %v9635_v62  ;;  %v908_v51 = vsel %vm801_vm1, %v10066_v21, 0.0  ;;  %v1013_v31 = vsel %vm695_vm14, %v10074_v3, %v906_v16  ;;  %v10099_v4 = vld [vmem:[#allocation98_spill] sm:$0xff]  ;;  %4404 = vmatprep.subr.bf16.mxu1 %v7671_v32 }
 0x1f1   : >> { %v2669_v23 = vand.u32 4294901760, %v2668_v56  ;;  %v9641_v22 = vand.u32 4294901760, %v7890_v37  ;;  %v10098_v56 = vld [vmem:[#allocation142_spill] sm:$0xff]  ;;  %v1015_v30 = vsel %vm697_vm15, %v10074_v3, %v908_v51  ;;  %v1120_v62 = vsel %vm591_vm12, %v10075_v46, %v1013_v31 }
 0x1f2   : >> { %10097 = vst [vmem:[#allocation86_spill] sm:$0xff] %v7898_v63  ;;  %4650 = vmatpush1.bf16.msra.mxu0 %v10098_v56  ;;  %v10101_v16 = vand.u32 4294901760, %v7898_v63  ;;  %v1122_v9 = vsel %vm593_vm13, %v10075_v46, %v1015_v30  ;;  %v7940_v51 = vsel %vm487_vm11, %v10078_v14, %v1120_v62  ;;  %v10105_v30 = vld [vmem:[#allocation57_spill] sm:$0xff] }
 0x1f3   : >> { %v7906_v6 = vpack.c.bf16 %v2669_v23, %v2657_v36  ;;  %v10100_v36 = vld [vmem:[#allocation145_spill] sm:$0xff]  ;;  %v2674_v23 = vsub.f32 %v7890_v37, %v9641_v22  ;;  %10102 = vst [vmem:[#allocation88_spill] sm:$0xff] %v7940_v51  ;;  %v10103_v22 = vld [vmem:[#allocation56_spill] sm:$0xff]  ;;  %v7948_v5 = vsel %vm489_vm6, %v10078_v14, %v1122_v9  ;;  %vm494_vm4 = vcmp.eq.s32.totalorder %v10105_v30, %v5800_v53 }
 0x1f4   : >> { %4652 = vmatprep.subr.bf16.mxu0 %v10100_v36  ;;  %v2686_v2 = vsub.f32 %v7898_v63, %v10101_v16  ;;  %vm492_vm2 = vcmp.eq.s32.totalorder %v10103_v22, %v5800_v53  ;;  %10104 = vst [vmem:[#allocation89_spill] sm:$0xff] %v7948_v5  ;;  %v9643_v16 = vand.u32 4294901760, %v7940_v51  ;;  %v10106_v36 = vld [vmem:[#allocation148_spill] sm:$0xff]  ;;  %v9645_v62 = vand.u32 4294901760, %v7948_v5  ;;  %4406 = vmatpush1.bf16.msra.mxu1 %v7638_v40 }
 0x1f5   : >> { %v2675_v31 = vand.u32 4294901760, %v2674_v23  ;;  %vm596_vm3 = vcmp.eq.s32.totalorder %v10103_v22, %v5787_v61  ;;  %vm598_vm5 = vcmp.eq.s32.totalorder %v10105_v30, %v5787_v61  ;;  %v10107_v23 = vld [vmem:[#allocation151_spill] sm:$0xff]  ;;  %vm700_vm7 = vcmp.eq.s32.totalorder %v10103_v22, %v5763_v0  ;;  %4408 = vmatprep.subr.bf16.mxu1 %v7679_v58 }
 0x1f6   : >> { %4654 = vmatpush1.bf16.msra.mxu0 %v10106_v36  ;;  %v2687_v43 = vand.u32 4294901760, %v2686_v2  ;;  %v7964_v9 = vsub.f32 %v7940_v51, %v9643_v16  ;;  %vm702_vm8 = vcmp.eq.s32.totalorder %v10105_v30, %v5763_v0  ;;  %v7976_v7 = vsub.f32 %v7948_v5, %v9645_v62  ;;  %v10111_v36 = vld [vmem:[#allocation154_spill] sm:$0xff]  ;;  %v10112_v16 = vld [vmem:[#allocation157_spill] sm:$0xff] }
 0x1f7   : >> { %4656 = vmatprep.subr.bf16.mxu0 %v10107_v23  ;;  %vm804_vm9 = vcmp.eq.s32.totalorder %v10103_v22, %v5756_v44  ;;  %vm806_vm10 = vcmp.eq.s32.totalorder %v10105_v30, %v5756_v44  ;;  %vm491_vm11 = vcmp.eq.s32.totalorder %v10103_v22, %v5806_v41  ;;  %vm493_vm6 = vcmp.eq.s32.totalorder %v10105_v30, %v5806_v41 }
 0x1f8   : >> { %v7971_v2 = vpack.c.bf16 %v2687_v43, %v2675_v31  ;;  %10108 = vst [vmem:[#allocation70_spill] sm:$0xff] %v7976_v7  ;;  %v911_v45 = vsel %vm804_vm9, %v5746_v60, 0.0  ;;  %v913_v23 = vsel %vm806_vm10, %v5746_v60, 0.0  ;;  %v10110_v43 = vld [vmem:[#allocation101_spill] sm:$0xff]  ;;  %v9650_v62 = vand.u32 4294901760, %v7976_v7  ;;  %4410 = vmatpush1.bf16.msra.mxu1 %v7656_v27 }
 0x1f9   : >> { %v1018_v56 = vsel %vm700_vm7, %v10056_v1, %v911_v45  ;;  %v1020_v5 = vsel %vm702_vm8, %v10056_v1, %v913_v23  ;;  %v10113_v51 = vand.u32 4294901760, %v7964_v9  ;;  %vm595_vm12 = vcmp.eq.s32.totalorder %v10103_v22, %v10058_v49  ;;  %4412 = vmatprep.subr.bf16.mxu1 %v7694_v50 }
 0x1fa   : >> { %4658 = vmatpush1.bf16.msra.mxu0 %v10111_v36  ;;  %v1125_v31 = vsel %vm596_vm3, %v10057_v59, %v1018_v56  ;;  %v1127_v45 = vsel %vm598_vm5, %v10057_v59, %v1020_v5  ;;  %v2692_v10 = vsub.f32 %v7976_v7, %v9650_v62  ;;  %v10116_v62 = vld [vmem:[#allocation160_spill] sm:$0xff]  ;;  %vm597_vm13 = vcmp.eq.s32.totalorder %v10105_v30, %v10058_v49  ;;  %v10120_v7 = vld [vmem:[#allocation166_spill] sm:$0xff] }
 0x1fb   : >> { %4660 = vmatprep.subr.bf16.mxu0 %v10112_v16  ;;  %v2680_v63 = vsub.f32 %v7964_v9, %v10113_v51  ;;  %v8014_v51 = vsel %vm492_vm2, %v10059_v13, %v1125_v31  ;;  %v8020_v56 = vsel %vm494_vm4, %v10059_v13, %v1127_v45  ;;  %vm699_vm14 = vcmp.eq.s32.totalorder %v10103_v22, %v10062_v8  ;;  %v10122_v16 = vld [vmem:[#allocation59_spill] sm:$0xff] }
 0x1fc   : >> { %10114 = vst [vmem:[#allocation71_spill] sm:$0xff] %v8014_v51  ;;  %10115 = vst [vmem:[#allocation77_spill] sm:$0xff] %v8020_v56  ;;  %v9651_v5 = vand.u32 4294901760, %v8014_v51  ;;  %v9652_v23 = vand.u32 4294901760, %v8020_v56  ;;  %v2693_v31 = vand.u32 4294901760, %v2692_v10  ;;  %vm701_vm15 = vcmp.eq.s32.totalorder %v10105_v30, %v10062_v8  ;;  %4414 = vmatpush1.bf16.msra.mxu1 %v7668_v42 }
 0x1fd   : >> { %v2681_v32 = vand.u32 4294901760, %v2680_v63  ;;  %v10117_v63 = vld [vmem:[#allocation163_spill] sm:$0xff]  ;;  %vm803_vm0 = vcmp.eq.s32.totalorder %v10103_v22, %v10064_v24  ;;  %vm805_vm1 = vcmp.eq.s32.totalorder %v10105_v30, %v10064_v24  ;;  %vm498_vm4 = vcmp.eq.s32.totalorder %v10122_v16, %v5800_v53 }
 0x1fe   : >> { %4662 = vmatpush1.bf16.msra.mxu0 %v10116_v62  ;;  %v8040_v45 = vsub.f32 %v8014_v51, %v9651_v5  ;;  %v8045_v10 = vsub.f32 %v8020_v56, %v9652_v23  ;;  %v910_v40 = vsel %vm803_vm0, %v10066_v21, 0.0  ;;  %v10119_v5 = vld [vmem:[#allocation104_spill] sm:$0xff]  ;;  %v912_v56 = vsel %vm805_vm1, %v10066_v21, 0.0 }
 0x1ff   : >> { %4664 = vmatprep.subr.bf16.mxu0 %v10117_v63  ;;  %v8050_v62 = vpack.c.bf16 %v2693_v31, %v2681_v32  ;;  %v10118_v63 = vld [vmem:[#allocation102_spill] sm:$0xff]  ;;  %v1017_v51 = vsel %vm699_vm14, %v10074_v3, %v910_v40  ;;  %v1019_v58 = vsel %vm701_vm15, %v10074_v3, %v912_v56  ;;  %v10123_v40 = vld [vmem:[#allocation169_spill] sm:$0xff]  ;;  %vm602_vm5 = vcmp.eq.s32.totalorder %v10122_v16, %v5787_v61 }
 0x200   : >> { %v9657_v36 = vand.u32 4294901760, %v8040_v45  ;;  %v1124_v32 = vsel %vm595_vm12, %v10075_v46, %v1017_v51  ;;  %v10121_v31 = vld [vmem:[#allocation58_spill] sm:$0xff]  ;;  %v10124_v56 = vand.u32 4294901760, %v8045_v10  ;;  %v1126_v51 = vsel %vm597_vm13, %v10075_v46, %v1019_v58  ;;  %1787 = vmatmul.mubr.f32.vlgmr.msra.gmra.mrb[0].mxu1 %v7426_v38 }
 0x201   : >> { %vm496_vm2 = vcmp.eq.s32.totalorder %v10121_v31, %v5800_v53  ;;  %v8091_v27 = vsel %vm491_vm11, %v10078_v14, %v1124_v32  ;;  %vm600_vm3 = vcmp.eq.s32.totalorder %v10121_v31, %v5787_v61  ;;  %v10127_v32 = vld [vmem:[#allocation173_spill] sm:$0xff]  ;;  %vm704_vm7 = vcmp.eq.s32.totalorder %v10121_v31, %v5763_v0 }
 0x202   : >> { %4666 = vmatpush1.bf16.msra.mxu0 %v10120_v7  ;;  %v2698_v23 = vsub.f32 %v8040_v45, %v9657_v36  ;;  %v2710_v7 = vsub.f32 %v8045_v10, %v10124_v56  ;;  %10125 = vst [vmem:[#allocation68_spill] sm:$0xff] %v8091_v27  ;;  %v8097_v36 = vsel %vm493_vm6, %v10078_v14, %v1126_v51  ;;  %v9661_v56 = vand.u32 4294901760, %v8091_v27 }
 0x203   : >> { %4668 = vmatprep.subr.bf16.mxu0 %v10123_v40  ;;  %10126 = vst [vmem:[#allocation73_spill] sm:$0xff] %v8097_v36  ;;  %v9660_v22 = vand.u32 4294901760, %v8097_v36  ;;  %vm706_vm8 = vcmp.eq.s32.totalorder %v10122_v16, %v5763_v0  ;;  %vm808_vm9 = vcmp.eq.s32.totalorder %v10121_v31, %v5756_v44  ;;  %vm810_vm10 = vcmp.eq.s32.totalorder %v10122_v16, %v5756_v44 }
 0x204   : >> { %v2699_v58 = vand.u32 4294901760, %v2698_v23  ;;  %v2711_v50 = vand.u32 4294901760, %v2710_v7  ;;  %v8119_v23 = vsub.f32 %v8091_v27, %v9661_v56  ;;  %v915_v30 = vsel %vm808_vm9, %v5746_v60, 0.0  ;;  %v10162_v27 = vld [vmem:[#allocation66_spill] sm:$0xff] }
 0x205   : >> { %v8124_v51 = vsub.f32 %v8097_v36, %v9660_v22  ;;  %v917_v42 = vsel %vm810_vm10, %v5746_v60, 0.0  ;;  %vm495_vm11 = vcmp.eq.s32.totalorder %v10121_v31, %v5806_v41  ;;  %vm497_vm6 = vcmp.eq.s32.totalorder %v10122_v16, %v5806_v41 }
 0x206   : >> { %4670 = vmatpush1.bf16.msra.mxu0 %v10127_v32  ;;  %v4711_v7 = vpack.c.bf16 %v2711_v50, %v2699_v58  ;;  %v10128_v32 = vpack.c.bf16 %v10046_v15, %v10045_v57  ;;  %v10129_v58 = vld [vmem:[#allocation105_spill] sm:$0xff]  ;;  %v10130_v50 = vld [vmem:[#allocation107_spill] sm:$0xff]  ;;  %v9663_v22 = vand.u32 4294901760, %v8119_v23  ;;  %v1024_v57 = vsel %vm706_vm8, %v10056_v1, %v917_v42 }
 0x207   : >> { %4704 = vmatprep.subr.bf16.mxu0 %v7850_v12  ;;  %v1022_v12 = vsel %vm704_vm7, %v10056_v1, %v915_v30  ;;  %v4433_v40 = vpack.c.bf16 %v10130_v50, %v10129_v58  ;;  %v9662_v56 = vand.u32 4294901760, %v8124_v51  ;;  %v1131_v30 = vsel %vm602_vm5, %v10057_v59, %v1024_v57 }
 0x208   : >> { %4416 = vmatprep.subr.bf16.mxu1 %v10128_v32  ;;  %v1129_v15 = vsel %vm600_vm3, %v10057_v59, %v1022_v12  ;;  %v10132_v42 = vpack.c.bf16 %v10048_v29, %v10047_v52  ;;  %v8175_v12 = vsel %vm498_vm4, %v10059_v13, %v1131_v30  ;;  %v10134_v52 = vpack.c.bf16 %v9950_v47, %v9947_v35  ;;  %v10135_v47 = vld [vmem:[#allocation172_spill] sm:$0xff] }
 0x209   : >> { %2533 = vmatmul.mubr.f32.vlgmr.msra.gmra.mrb[0].mxu0 %v7426_v38  ;;  %v8157_v32 = vsel %vm496_vm2, %v10059_v13, %v1129_v15  ;;  %v2704_v38 = vsub.f32 %v8119_v23, %v9663_v22  ;;  %10133 = vst [vmem:[#allocation72_spill] sm:$0xff] %v8175_v12  ;;  %v9664_v29 = vand.u32 4294901760, %v8175_v12  ;;  %vm599_vm12 = vcmp.eq.s32.totalorder %v10121_v31, %v10058_v49 }
 0x20a   : >> { %4706 = vmatpush1.bf16.msra.mxu0 %v7906_v6  ;;  %10131 = vst [vmem:[#allocation74_spill] sm:$0xff] %v8157_v32  ;;  %4418 = vmatpush1.bf16.msra.mxu1 %v10132_v42  ;;  %v2716_v6 = vsub.f32 %v8124_v51, %v9662_v56  ;;  %v9665_v57 = vand.u32 4294901760, %v8157_v32  ;;  %vm601_vm13 = vcmp.eq.s32.totalorder %v10122_v16, %v10058_v49 }
 0x20b   : >> { %4708 = vmatprep.subr.bf16.mxu0 %v7971_v2  ;;  %4420 = vmatprep.subr.bf16.mxu1 %v10134_v52  ;;  %vm703_vm14 = vcmp.eq.s32.totalorder %v10121_v31, %v10062_v8  ;;  %v9666_v2 = vmov 0.0   ;;  %v2705_v15 = vand.u32 4294901760, %v2704_v38  ;;  %vm705_vm15 = vcmp.eq.s32.totalorder %v10122_v16, %v10062_v8  ;;  %v10137_v38 = vld [vmem:[#allocation108_spill] sm:$0xff] }
 0x20c   : >> { %2871 = vmatprep.mubr.f32.mxu0 %v9666_v2  ;;  %v2717_v30 = vand.u32 4294901760, %v2716_v6  ;;  %v8192_v35 = vsub.f32 %v8157_v32, %v9665_v57  ;;  %1987 = vmatprep.mubr.f32.mxu1 %v10135_v47  ;;  %v8201_v42 = vsub.f32 %v8175_v12, %v9664_v29  ;;  %vm807_vm0 = vcmp.eq.s32.totalorder %v10121_v31, %v10064_v24 }
 0x20d   : >> { %vm809_vm1 = vcmp.eq.s32.totalorder %v10122_v16, %v10064_v24  ;;  %v4435_v6 = vpack.c.bf16 %v9977_v55, %v10137_v38  ;;  %v10138_v52 = vpack.c.bf16 %v10054_v26, %v10053_v17  ;;  %v914_v22 = vsel %vm807_vm0, %v10066_v21, 0.0  ;;  %v10140_v26 = vld [vmem:[#allocation60_spill] sm:$0xff]  ;;  %v10160_v16 = vld [vmem:[#allocation125_spill] sm:$0xff] }
 0x20e   : >> { %4710 = vmatpush1.bf16.msra.mxu0 %v8050_v62  ;;  %10136 = vst [vmem:[#allocation90_spill] sm:$0xff] %v8201_v42  ;;  %v4713_v62 = vpack.c.bf16 %v2717_v30, %v2705_v15  ;;  %v9669_v56 = vand.u32 4294901760, %v8192_v35  ;;  %v916_v29 = vsel %vm809_vm1, %v10066_v21, 0.0  ;;  %v10139_v57 = vpack.c.bf16 %v10068_v28, %v10067_v33 }
 0x20f   : >> { %4422 = vmatpush1.bf16.msra.mxu1 %v10138_v52  ;;  %4712 = vmatprep.subr.bf16.mxu0 %v4711_v7  ;;  %v9668_v2 = vand.u32 4294901760, %v8201_v42  ;;  %v1021_v55 = vsel %vm703_vm14, %v10074_v3, %v914_v22  ;;  %v1023_v17 = vsel %vm705_vm15, %v10074_v3, %v916_v29  ;;  %vm500_vm2 = vcmp.eq.s32.totalorder %v10140_v26, %v5800_v53  ;;  %v10141_v7 = vld [vmem:[#allocation61_spill] sm:$0xff] }
 0x210   : >> { %4424 = vmatprep.subr.bf16.mxu1 %v10139_v57  ;;  %v2722_v33 = vsub.f32 %v8192_v35, %v9669_v56  ;;  %v1128_v28 = vsel %vm599_vm12, %v10075_v46, %v1021_v55  ;;  %v1130_v22 = vsel %vm601_vm13, %v10075_v46, %v1023_v17  ;;  %vm502_vm4 = vcmp.eq.s32.totalorder %v10141_v7, %v5800_v53 }
 0x211   : >> { %v2734_v57 = vsub.f32 %v8201_v42, %v9668_v2  ;;  %v8249_v29 = vsel %vm495_vm11, %v10078_v14, %v1128_v28  ;;  %v8255_v15 = vsel %vm497_vm6, %v10078_v14, %v1130_v22  ;;  %vm604_vm3 = vcmp.eq.s32.totalorder %v10140_v26, %v5787_v61  ;;  %v10148_v22 = vld [vmem:[#allocation111_spill] sm:$0xff]  ;;  %v10192_v42 = vld [vmem:[#allocation161_spill] sm:$0xff] }
 0x212   : >> { %4714 = vmatpush1.bf16.msra.mxu0 %v4713_v62  ;;  %10142 = vst [vmem:[#allocation92_spill] sm:$0xff] %v8249_v29  ;;  %10143 = vst [vmem:[#allocation75_spill] sm:$0xff] %v8255_v15  ;;  %v10144_v30 = vpack.c.bf16 %v10091_v20, %v10090_v48  ;;  %v2723_v38 = vand.u32 4294901760, %v2722_v33  ;;  %v9673_v52 = vand.u32 4294901760, %v8249_v29  ;;  %v9670_v62 = vand.u32 4294901760, %v8255_v15 }
 0x213   : >> { %vm606_vm5 = vcmp.eq.s32.totalorder %v10141_v7, %v5787_v61  ;;  %v10145_v55 = vpack.c.bf16 %v10099_v4, %v9962_v39  ;;  %v2735_v17 = vand.u32 4294901760, %v2734_v57  ;;  %vm708_vm7 = vcmp.eq.s32.totalorder %v10140_v26, %v5763_v0  ;;  %v10149_v57 = vld [vmem:[#allocation113_spill] sm:$0xff] }
 0x214   : >> { %4426 = vmatpush1.bf16.msra.mxu1 %v10144_v30  ;;  %vm710_vm8 = vcmp.eq.s32.totalorder %v10141_v7, %v5763_v0  ;;  %vm812_vm9 = vcmp.eq.s32.totalorder %v10140_v26, %v5756_v44  ;;  %v8278_v20 = vsub.f32 %v8249_v29, %v9673_v52  ;;  %v8283_v39 = vsub.f32 %v8255_v15, %v9670_v62 }
 0x215   : >> { %4428 = vmatprep.subr.bf16.mxu1 %v10145_v55  ;;  %vm814_vm10 = vcmp.eq.s32.totalorder %v10141_v7, %v5756_v44  ;;  %v919_v48 = vsel %vm812_vm9, %v5746_v60, 0.0  ;;  %v4715_v4 = vpack.c.bf16 %v2735_v17, %v2723_v38  ;;  %v4437_v30 = vpack.c.bf16 %v10149_v57, %v10148_v22 }
 0x216   : >> { %10146 = vst [vmem:[#allocation76_spill] sm:$0xff] %v8278_v20  ;;  %10147 = vst [vmem:[#allocation69_spill] sm:$0xff] %v8283_v39  ;;  %v921_v33 = vsel %vm814_vm10, %v5746_v60, 0.0  ;;  %v1026_v28 = vsel %vm708_vm7, %v10056_v1, %v919_v48  ;;  %v10150_v55 = vpack.c.bf16 %v10110_v43, %v10109_v19  ;;  %v9672_v2 = vand.u32 4294901760, %v8278_v20 }
 0x217   : >> { %v9671_v56 = vand.u32 4294901760, %v8283_v39  ;;  %v1028_v62 = vsel %vm710_vm8, %v10056_v1, %v921_v33  ;;  %v1133_v38 = vsel %vm604_vm3, %v10057_v59, %v1026_v28  ;;  %v10151_v17 = vpack.c.bf16 %v10119_v5, %v10118_v63  ;;  %4716 = vmatprep.subr.bf16.mxu0 %v4715_v4 }
 0x218   : >> { %4430 = vmatpush1.bf16.msra.mxu1 %v10150_v55  ;;  %v1135_v19 = vsel %vm606_vm5, %v10057_v59, %v1028_v62  ;;  %v8313_v43 = vsel %vm500_vm2, %v10059_v13, %v1133_v38  ;;  %vm499_vm11 = vcmp.eq.s32.totalorder %v10140_v26, %v5806_v41  ;;  %v2728_v5 = vsub.f32 %v8278_v20, %v9672_v2  ;;  %v10156_v2 = vld [vmem:[#allocation119_spill] sm:$0xff] }
 0x219   : >> { %4432 = vmatprep.subr.bf16.mxu1 %v10151_v17  ;;  %v2740_v63 = vsub.f32 %v8283_v39, %v9671_v56  ;;  %v8327_v62 = vsel %vm502_vm4, %v10059_v13, %v1135_v19  ;;  %v9682_v48 = vand.u32 4294901760, %v8313_v43  ;;  %vm501_vm6 = vcmp.eq.s32.totalorder %v10141_v7, %v5806_v41  ;;  %v10152_v19 = vld [vmem:[#allocation114_spill] sm:$0xff]  ;;  %v10155_v56 = vld [vmem:[#allocation117_spill] sm:$0xff] }
 0x21a   : >> { %v9678_v4 = vand.u32 4294901760, %v8327_v62  ;;  %vm603_vm12 = vcmp.eq.s32.totalorder %v10140_v26, %v10058_v49  ;;  %vm605_vm13 = vcmp.eq.s32.totalorder %v10141_v7, %v10058_v49  ;;  %v2729_v33 = vand.u32 4294901760, %v2728_v5 }
 0x21b   : >> { %v2741_v28 = vand.u32 4294901760, %v2740_v63  ;;  %v8343_v22 = vsub.f32 %v8313_v43, %v9682_v48  ;;  %vm707_vm14 = vcmp.eq.s32.totalorder %v10140_v26, %v10062_v8  ;;  %vm709_vm15 = vcmp.eq.s32.totalorder %v10141_v7, %v10062_v8 }
 0x21c   : >> { %4434 = vmatpush1.bf16.msra.mxu1 %v4433_v40  ;;  %v8350_v57 = vsub.f32 %v8327_v62, %v9678_v4  ;;  %vm811_vm0 = vcmp.eq.s32.totalorder %v10140_v26, %v10064_v24  ;;  %vm813_vm1 = vcmp.eq.s32.totalorder %v10141_v7, %v10064_v24  ;;  %v4439_v5 = vpack.c.bf16 %v9984_v54, %v10152_v19  ;;  %v10154_v19 = vld [vmem:[#allocation63_spill] sm:$0xff]  ;;  %v10157_v7 = vld [vmem:[#allocation64_spill] sm:$0xff] }
 0x21d   : >> { %4436 = vmatprep.subr.bf16.mxu1 %v4435_v6  ;;  %v4717_v40 = vpack.c.bf16 %v2741_v28, %v2729_v33  ;;  %v9675_v58 = vand.u32 4294901760, %v8343_v22  ;;  %v918_v50 = vsel %vm811_vm0, %v10066_v21, 0.0  ;;  %v920_v6 = vsel %vm813_vm1, %v10066_v21, 0.0 }
 0x21e   : >> { %v9674_v55 = vand.u32 4294901760, %v8350_v57  ;;  %v1025_v38 = vsel %vm707_vm14, %v10074_v3, %v918_v50  ;;  %v1027_v17 = vsel %vm709_vm15, %v10074_v3, %v920_v6  ;;  %v10153_v50 = vld [vmem:[#allocation62_spill] sm:$0xff]  ;;  %vm506_vm4 = vcmp.eq.s32.totalorder %v10154_v19, %v5800_v53 }
 0x21f   : >> { %4718 = vmatpush1.bf16.msra.mxu0 %v4717_v40  ;;  %v2746_v63 = vsub.f32 %v8343_v22, %v9675_v58  ;;  %v1132_v33 = vsel %vm603_vm12, %v10075_v46, %v1025_v38  ;;  %v1134_v28 = vsel %vm605_vm13, %v10075_v46, %v1027_v17  ;;  %vm504_vm2 = vcmp.eq.s32.totalorder %v10153_v50, %v5800_v53 }
 0x220   : >> { %4438 = vmatpush1.bf16.msra.mxu1 %v4437_v30  ;;  %v2758_v54 = vsub.f32 %v8350_v57, %v9674_v55  ;;  %v8384_v40 = vsel %vm499_vm11, %v10078_v14, %v1132_v33  ;;  %v8390_v30 = vsel %vm501_vm6, %v10078_v14, %v1134_v28  ;;  %vm608_vm3 = vcmp.eq.s32.totalorder %v10153_v50, %v5787_v61 }
 0x221   : >> { %4440 = vmatprep.subr.bf16.mxu1 %v4439_v5  ;;  %v2747_v6 = vand.u32 4294901760, %v2746_v63  ;;  %v9677_v38 = vand.u32 4294901760, %v8384_v40  ;;  %v9676_v17 = vand.u32 4294901760, %v8390_v30  ;;  %vm610_vm5 = vcmp.eq.s32.totalorder %v10154_v19, %v5787_v61 }
 0x222   : >> { %v2759_v33 = vand.u32 4294901760, %v2758_v54  ;;  %vm712_vm7 = vcmp.eq.s32.totalorder %v10153_v50, %v5763_v0  ;;  %vm714_vm8 = vcmp.eq.s32.totalorder %v10154_v19, %v5763_v0  ;;  %vm816_vm9 = vcmp.eq.s32.totalorder %v10153_v50, %v5756_v44 }
 0x223   : >> { %v8407_v5 = vsub.f32 %v8384_v40, %v9677_v38  ;;  %v8412_v63 = vsub.f32 %v8390_v30, %v9676_v17  ;;  %vm818_vm10 = vcmp.eq.s32.totalorder %v10154_v19, %v5756_v44  ;;  %v923_v54 = vsel %vm816_vm9, %v5746_v60, 0.0 }
 0x224   : >> { %v4719_v28 = vpack.c.bf16 %v2759_v33, %v2747_v6  ;;  %v4441_v52 = vpack.c.bf16 %v10156_v2, %v10155_v56  ;;  %v925_v17 = vsel %vm818_vm10, %v5746_v60, 0.0  ;;  %v1030_v38 = vsel %vm712_vm7, %v10056_v1, %v923_v54 }
 0x225   : >> { %v9680_v55 = vand.u32 4294901760, %v8407_v5  ;;  %v9679_v58 = vand.u32 4294901760, %v8412_v63  ;;  %v1032_v4 = vsel %vm714_vm8, %v10056_v1, %v925_v17  ;;  %v1137_v6 = vsel %vm608_vm3, %v10057_v59, %v1030_v38 }
 0x226   : >> { %4720 = vmatprep.subr.bf16.mxu0 %v4719_v28  ;;  %4442 = vmatpush1.bf16.msra.mxu1 %v4441_v52  ;;  %vm503_vm11 = vcmp.eq.s32.totalorder %v10153_v50, %v5806_v41  ;;  %v1139_v17 = vsel %vm610_vm5, %v10057_v59, %v1032_v4  ;;  %v8448_v52 = vsel %vm504_vm2, %v10059_v13, %v1137_v6 }
 0x227   : >> { %v2752_v56 = vsub.f32 %v8407_v5, %v9680_v55  ;;  %v2764_v2 = vsub.f32 %v8412_v63, %v9679_v58  ;;  %v8454_v38 = vsel %vm506_vm4, %v10059_v13, %v1139_v17  ;;  %v9681_v33 = vand.u32 4294901760, %v8448_v52 }
 0x228   : >> { %vm505_vm6 = vcmp.eq.s32.totalorder %v10154_v19, %v5806_v41  ;;  %vm607_vm12 = vcmp.eq.s32.totalorder %v10153_v50, %v10058_v49  ;;  %v9683_v54 = vand.u32 4294901760, %v8454_v38  ;;  %vm609_vm13 = vcmp.eq.s32.totalorder %v10154_v19, %v10058_v49 }
 0x229   : >> { %v2753_v4 = vand.u32 4294901760, %v2752_v56  ;;  %v2765_v28 = vand.u32 4294901760, %v2764_v2  ;;  %v8467_v6 = vsub.f32 %v8448_v52, %v9681_v33  ;;  %vm711_vm14 = vcmp.eq.s32.totalorder %v10153_v50, %v10062_v8 }
 0x22a   : >> { %vm713_vm15 = vcmp.eq.s32.totalorder %v10154_v19, %v10062_v8  ;;  %vm815_vm0 = vcmp.eq.s32.totalorder %v10153_v50, %v10064_v24  ;;  %v8478_v2 = vsub.f32 %v8454_v38, %v9683_v54  ;;  %vm817_vm1 = vcmp.eq.s32.totalorder %v10154_v19, %v10064_v24 }
 0x22b   : >> { %v4721_v56 = vpack.c.bf16 %v2765_v28, %v2753_v4  ;;  %v922_v17 = vsel %vm815_vm0, %v10066_v21, 0.0  ;;  %v9686_v58 = vand.u32 4294901760, %v8467_v6  ;;  %v924_v55 = vsel %vm817_vm1, %v10066_v21, 0.0 }
 0x22c   : >> { %v1029_v33 = vsel %vm711_vm14, %v10074_v3, %v922_v17  ;;  %v4443_v48 = vpack.c.bf16 %v9990_v34, %v9988_v25  ;;  %v9685_v4 = vand.u32 4294901760, %v8478_v2  ;;  %v1031_v28 = vsel %vm713_vm15, %v10074_v3, %v924_v55  ;;  %v10158_v55 = vld [vmem:[#allocation65_spill] sm:$0xff] }
 0x22d   : >> { %4722 = vmatpush1.bf16.msra.mxu0 %v4721_v56  ;;  %v1136_v54 = vsel %vm607_vm12, %v10075_v46, %v1029_v33  ;;  %vm508_vm2 = vcmp.eq.s32.totalorder %v10157_v7, %v5800_v53  ;;  %v2770_v17 = vsub.f32 %v8467_v6, %v9686_v58  ;;  %v1138_v34 = vsel %vm609_vm13, %v10075_v46, %v1031_v28  ;;  %v10159_v58 = vld [vmem:[#allocation123_spill] sm:$0xff] }
 0x22e   : >> { %v8507_v25 = vsel %vm503_vm11, %v10078_v14, %v1136_v54  ;;  %4444 = vmatprep.subr.bf16.mxu1 %v4443_v48  ;;  %vm510_vm4 = vcmp.eq.s32.totalorder %v10158_v55, %v5800_v53  ;;  %v2782_v33 = vsub.f32 %v8478_v2, %v9685_v4  ;;  %v8518_v56 = vsel %vm505_vm6, %v10078_v14, %v1138_v34 }
 0x22f   : >> { %v9688_v28 = vand.u32 4294901760, %v8507_v25  ;;  %vm612_vm3 = vcmp.eq.s32.totalorder %v10157_v7, %v5787_v61  ;;  %v2771_v54 = vand.u32 4294901760, %v2770_v17  ;;  %v9694_v48 = vand.u32 4294901760, %v8518_v56 }
 0x230   : >> { %vm614_vm5 = vcmp.eq.s32.totalorder %v10158_v55, %v5787_v61  ;;  %vm716_vm7 = vcmp.eq.s32.totalorder %v10157_v7, %v5763_v0  ;;  %v2783_v4 = vand.u32 4294901760, %v2782_v33  ;;  %vm718_vm8 = vcmp.eq.s32.totalorder %v10158_v55, %v5763_v0 }
 0x231   : >> { %v8531_v34 = vsub.f32 %v8507_v25, %v9688_v28  ;;  %vm820_vm9 = vcmp.eq.s32.totalorder %v10157_v7, %v5756_v44  ;;  %v8540_v17 = vsub.f32 %v8518_v56, %v9694_v48  ;;  %vm822_vm10 = vcmp.eq.s32.totalorder %v10158_v55, %v5756_v44 }
 0x232   : >> { %v927_v33 = vsel %vm820_vm9, %v5746_v60, 0.0  ;;  %v4445_v28 = vpack.c.bf16 %v10160_v16, %v10159_v58  ;;  %v4723_v19 = vpack.c.bf16 %v2783_v4, %v2771_v54  ;;  %v929_v31 = vsel %vm822_vm10, %v5746_v60, 0.0 }
 0x233   : >> { %v9697_v26 = vand.u32 4294901760, %v8531_v34  ;;  %v1034_v50 = vsel %vm716_vm7, %v10056_v1, %v927_v33  ;;  %v9696_v15 = vand.u32 4294901760, %v8540_v17  ;;  %v1036_v48 = vsel %vm718_vm8, %v10056_v1, %v929_v31 }
 0x234   : >> { %v1141_v29 = vsel %vm612_vm3, %v10057_v59, %v1034_v50  ;;  %4446 = vmatpush1.bf16.msra.mxu1 %v4445_v28  ;;  %vm507_vm11 = vcmp.eq.s32.totalorder %v10157_v7, %v5806_v41  ;;  %4724 = vmatprep.subr.bf16.mxu0 %v4723_v19  ;;  %v1143_v58 = vsel %vm614_vm5, %v10057_v59, %v1036_v48 }
 0x235   : >> { %v2776_v16 = vsub.f32 %v8531_v34, %v9697_v26  ;;  %v8569_v31 = vsel %vm508_vm2, %v10059_v13, %v1141_v29  ;;  %vm509_vm6 = vcmp.eq.s32.totalorder %v10158_v55, %v5806_v41  ;;  %v2788_v50 = vsub.f32 %v8540_v17, %v9696_v15 }
 0x236   : >> { %v8580_v19 = vsel %vm510_vm4, %v10059_v13, %v1143_v58  ;;  %v9698_v4 = vand.u32 4294901760, %v8569_v31  ;;  %vm611_vm12 = vcmp.eq.s32.totalorder %v10157_v7, %v10058_v49  ;;  %vm613_vm13 = vcmp.eq.s32.totalorder %v10158_v55, %v10058_v49  ;;  %v10161_v58 = vld [vmem:[#allocation128_spill] sm:$0xff] }
 0x237   : >> { %v2777_v29 = vand.u32 4294901760, %v2776_v16  ;;  %v9701_v28 = vand.u32 4294901760, %v8580_v19  ;;  %vm715_vm14 = vcmp.eq.s32.totalorder %v10157_v7, %v10062_v8  ;;  %v2789_v54 = vand.u32 4294901760, %v2788_v50 }
 0x238   : >> { %v8593_v48 = vsub.f32 %v8569_v31, %v9698_v4  ;;  %vm717_vm15 = vcmp.eq.s32.totalorder %v10158_v55, %v10062_v8  ;;  %vm819_vm0 = vcmp.eq.s32.totalorder %v10157_v7, %v10064_v24  ;;  %vm821_vm1 = vcmp.eq.s32.totalorder %v10158_v55, %v10064_v24 }
 0x239   : >> { %v8602_v33 = vsub.f32 %v8580_v19, %v9701_v28  ;;  %v926_v16 = vsel %vm819_vm0, %v10066_v21, 0.0  ;;  %v4447_v50 = vpack.c.bf16 %v10161_v58, %v9995_v11  ;;  %v4725_v15 = vpack.c.bf16 %v2789_v54, %v2777_v29 }
 0x23a   : >> { %v9705_v26 = vand.u32 4294901760, %v8593_v48  ;;  %v928_v4 = vsel %vm821_vm1, %v10066_v21, 0.0  ;;  %v1033_v12 = vsel %vm715_vm14, %v10074_v3, %v926_v16  ;;  %vm512_vm2 = vcmp.eq.s32.totalorder %v10162_v27, %v5800_v53 }
 0x23b   : >> { %v9704_v32 = vand.u32 4294901760, %v8602_v33  ;;  %v1035_v28 = vsel %vm717_vm15, %v10074_v3, %v928_v4  ;;  %v1140_v36 = vsel %vm611_vm12, %v10075_v46, %v1033_v12  ;;  %4448 = vmatprep.subr.bf16.mxu1 %v4447_v50  ;;  %4726 = vmatpush1.bf16.msra.mxu0 %v4725_v15  ;;  %v10163_v12 = vld [vmem:[#allocation67_spill] sm:$0xff]  ;;  %vm616_vm3 = vcmp.eq.s32.totalorder %v10162_v27, %v5787_v61 }
 0x23c   : >> { %v2794_v11 = vsub.f32 %v8593_v48, %v9705_v26  ;;  %v1142_v29 = vsel %vm613_vm13, %v10075_v46, %v1035_v28  ;;  %v8631_v4 = vsel %vm507_vm11, %v10078_v14, %v1140_v36  ;;  %vm514_vm4 = vcmp.eq.s32.totalorder %v10163_v12, %v5800_v53 }
 0x23d   : >> { %v2806_v15 = vsub.f32 %v8602_v33, %v9704_v32  ;;  %v8642_v54 = vsel %vm509_vm6, %v10078_v14, %v1142_v29  ;;  %v9706_v28 = vand.u32 4294901760, %v8631_v4  ;;  %vm618_vm5 = vcmp.eq.s32.totalorder %v10163_v12, %v5787_v61  ;;  %v10165_v32 = vld [vmem:[#allocation131_spill] sm:$0xff] }
 0x23e   : >> { %v2795_v36 = vand.u32 4294901760, %v2794_v11  ;;  %v9709_v16 = vand.u32 4294901760, %v8642_v54  ;;  %vm720_vm7 = vcmp.eq.s32.totalorder %v10162_v27, %v5763_v0  ;;  %vm722_vm8 = vcmp.eq.s32.totalorder %v10163_v12, %v5763_v0 }
 0x23f   : >> { %v2807_v58 = vand.u32 4294901760, %v2806_v15  ;;  %v8655_v50 = vsub.f32 %v8631_v4, %v9706_v28  ;;  %vm824_vm9 = vcmp.eq.s32.totalorder %v10162_v27, %v5756_v44  ;;  %vm826_vm10 = vcmp.eq.s32.totalorder %v10163_v12, %v5756_v44  ;;  %v10164_v15 = vld [vmem:[#allocation129_spill] sm:$0xff] }
 0x240   : >> { %v8664_v11 = vsub.f32 %v8642_v54, %v9709_v16  ;;  %v931_v29 = vsel %vm824_vm9, %v5746_v60, 0.0  ;;  %v4449_v26 = vpack.c.bf16 %v10165_v32, %v10164_v15  ;;  %v933_v0 = vsel %vm826_vm10, %v5746_v60, 0.0 }
 0x241   : >> { %v4727_v28 = vpack.c.bf16 %v2807_v58, %v2795_v36  ;;  %v9712_v7 = vand.u32 4294901760, %v8655_v50  ;;  %v1038_v55 = vsel %vm720_vm7, %v10056_v1, %v931_v29  ;;  %v1040_v16 = vsel %vm722_vm8, %v10056_v1, %v933_v0  ;;  %v10166_v58 = vld [vmem:[#allocation132_spill] sm:$0xff]  ;;  %v10167_v29 = vld [vmem:[#allocation134_spill] sm:$0xff] }
 0x242   : >> { %v9711_v47 = vand.u32 4294901760, %v8664_v11  ;;  %v1145_v44 = vsel %vm616_vm3, %v10057_v59, %v1038_v55  ;;  %4450 = vmatpush1.bf16.msra.mxu1 %v4449_v26  ;;  %vm511_vm11 = vcmp.eq.s32.totalorder %v10162_v27, %v5806_v41  ;;  %v1147_v32 = vsel %vm618_vm5, %v10057_v59, %v1040_v16 }
 0x243   : >> { %4728 = vmatprep.subr.bf16.mxu0 %v4727_v28  ;;  %v2800_v60 = vsub.f32 %v8655_v50, %v9712_v7  ;;  %v8693_v1 = vsel %vm512_vm2, %v10059_v13, %v1145_v44  ;;  %vm513_vm6 = vcmp.eq.s32.totalorder %v10163_v12, %v5806_v41  ;;  %v8704_v55 = vsel %vm514_vm4, %v10059_v13, %v1147_v32 }
 0x244   : >> { %v2812_v26 = vsub.f32 %v8664_v11, %v9711_v47  ;;  %v9715_v61 = vand.u32 4294901760, %v8693_v1  ;;  %vm615_vm12 = vcmp.eq.s32.totalorder %v10162_v27, %v10058_v49  ;;  %v9714_v28 = vand.u32 4294901760, %v8704_v55 }
 0x245   : >> { %v2801_v59 = vand.u32 4294901760, %v2800_v60  ;;  %vm617_vm13 = vcmp.eq.s32.totalorder %v10163_v12, %v10058_v49  ;;  %vm719_vm14 = vcmp.eq.s32.totalorder %v10162_v27, %v10062_v8  ;;  %vm721_vm15 = vcmp.eq.s32.totalorder %v10163_v12, %v10062_v8 }
 0x246   : >> { %v2813_v36 = vand.u32 4294901760, %v2812_v26  ;;  %v8717_v53 = vsub.f32 %v8693_v1, %v9715_v61  ;;  %vm823_vm0 = vcmp.eq.s32.totalorder %v10162_v27, %v10064_v24  ;;  %v8726_v13 = vsub.f32 %v8704_v55, %v9714_v28  ;;  %v10177_v28 = vld [vmem:[#allocation146_spill] sm:$0xff]  ;;  %v10185_v61 = vld [vmem:[#allocation116_spill] sm:$0xff] }
 0x247   : >> { %vm825_vm1 = vcmp.eq.s32.totalorder %v10163_v12, %v10064_v24  ;;  %v930_v16 = vsel %vm823_vm0, %v10066_v21, 0.0  ;;  %v4451_v15 = vpack.c.bf16 %v10167_v29, %v10166_v58  ;;  %v10186_v12 = vld [vmem:[#allocation156_spill] sm:$0xff]  ;;  %vm3423_vm2 = vcmask (%p358_p2), 588800  }
 0x248   : >> { %v4729_v0 = vpack.c.bf16 %v2813_v36, %v2801_v59  ;;  %v9710_v44 = vand.u32 4294901760, %v8717_v53  ;;  %v932_v8 = vsel %vm825_vm1, %v10066_v21, 0.0  ;;  %v1037_v60 = vsel %vm719_vm14, %v10074_v3, %v930_v16  ;;  %v10168_v36 = vld [vmem:[#allocation135_spill] sm:$0xff]  ;;  %v10169_v16 = vld [vmem:[#allocation137_spill] sm:$0xff] }
 0x249   : >> { %v9713_v32 = vand.u32 4294901760, %v8726_v13  ;;  %v1039_v26 = vsel %vm721_vm15, %v10074_v3, %v932_v8  ;;  %v1144_v24 = vsel %vm615_vm12, %v10075_v46, %v1037_v60  ;;  %4452 = vmatprep.subr.bf16.mxu1 %v4451_v15  ;;  %v4453_v58 = vpack.c.bf16 %v10169_v16, %v10168_v36  ;;  %v10170_v8 = vld [vmem:[#allocation138_spill] sm:$0xff]  ;;  %v10171_v60 = vld [vmem:[#allocation140_spill] sm:$0xff]  ;;  %v10173_v36 = vld [vmem:[#allocation141_spill] sm:$0xff] }
 0x24a   : >> { %4730 = vmatpush1.bf16.msra.mxu0 %v4729_v0  ;;  %v2818_v59 = vsub.f32 %v8717_v53, %v9710_v44  ;;  %v1146_v21 = vsel %vm617_vm13, %v10075_v46, %v1039_v26  ;;  %v1251_v3 = vsel %vm511_vm11, %v10078_v14, %v1144_v24  ;;  %v4455_v26 = vpack.c.bf16 %v10171_v60, %v10170_v8  ;;  %v10174_v16 = vld [vmem:[#allocation143_spill] sm:$0xff]  ;;  %v10179_v8 = vld [vmem:[#allocation149_spill] sm:$0xff]  ;;  %v10180_v60 = vld [vmem:[#allocation150_spill] sm:$0xff] }
 0x24b   : >> { %v2830_v29 = vsub.f32 %v8726_v13, %v9713_v32  ;;  %v1253_v15 = vsel %vm513_vm6, %v10078_v14, %v1146_v21  ;;  %v2597_v0 = vand.u32 4294901760, %v1251_v3  ;;  %4454 = vmatpush1.bf16.msra.mxu1 %v4453_v58  ;;  %v4457_v47 = vpack.c.bf16 %v10174_v16, %v10173_v36  ;;  %v10176_v32 = vld [vmem:[#allocation144_spill] sm:$0xff]  ;;  %v10178_v58 = vld [vmem:[#allocation147_spill] sm:$0xff]  ;;  %v10182_v16 = vld [vmem:[#allocation153_spill] sm:$0xff] }
 0x24c   : >> { %v2819_v49 = vand.u32 4294901760, %v2818_v59  ;;  %v2601_v46 = vand.u32 4294901760, %v1253_v15  ;;  %4456 = vmatprep.subr.bf16.mxu1 %v4455_v26  ;;  %v4459_v41 = vpack.c.bf16 %v10177_v28, %v10176_v32  ;;  %v10181_v26 = vld [vmem:[#allocation152_spill] sm:$0xff]  ;;  %v4751_v28 = vpack.c.bf16 %v8350_v57, %v8343_v22 }
 0x24d   : >> { %v2831_v24 = vand.u32 4294901760, %v2830_v29  ;;  %v8764_v44 = vsub.f32 %v1251_v3, %v2597_v0  ;;  %v4461_v29 = vpack.c.bf16 %v10179_v8, %v10178_v58  ;;  %v4749_v3 = vpack.c.bf16 %v8283_v39, %v8278_v20  ;;  %v10183_v58 = vld [vmem:[#allocation155_spill] sm:$0xff]  ;;  %v10184_v8 = vld [vmem:[#allocation110_spill] sm:$0xff]  ;;  %v10188_v39 = vld [vmem:[#allocation32_spill] sm:$0xff] }
 0x24e   : >> { %v8768_v7 = vsub.f32 %v1253_v15, %v2601_v46  ;;  %v4463_v36 = vpack.c.bf16 %v10181_v26, %v10180_v60  ;;  %v10187_v60 = vld [vmem:[#allocation158_spill] sm:$0xff]  ;;  %v8793_v20 = vand.u32 4294901760, %v10188_v39 }
 0x24f   : >> { %10172 = vst [vmem:[#allocation93_spill] sm:$0xff] %v8764_v44  ;;  %v4731_v14 = vpack.c.bf16 %v2831_v24, %v2819_v49  ;;  %v2823_v59 = vand.u32 4294901760, %v8764_v44  ;;  %4458 = vmatpush1.bf16.msra.mxu1 %v4457_v47  ;;  %v4753_v47 = vpack.c.bf16 %v8412_v63, %v8407_v5  ;;  %v4467_v26 = vpack.c.bf16 %v10187_v60, %v10186_v12 }
 0x250   : >> { %10175 = vst [vmem:[#allocation95_spill] sm:$0xff] %v8768_v7  ;;  %v2835_v21 = vand.u32 4294901760, %v8768_v7  ;;  %4460 = vmatprep.subr.bf16.mxu1 %v4459_v41  ;;  %v4735_v41 = vpack.c.bf16 %v10185_v61, %v10184_v8  ;;  %v10195_v12 = vand.u32 4294901760, %v8313_v43  ;;  %v10197_v60 = vand.u32 4294901760, %v8384_v40 }
 0x251   : >> { %4732 = vmatprep.subr.bf16.mxu0 %v4731_v14  ;;  %v2824_v15 = vsub.f32 %v8764_v44, %v2823_v59  ;;  %v4465_v14 = vpack.c.bf16 %v10183_v58, %v10182_v16  ;;  %v10193_v58 = vld [vmem:[#allocation162_spill] sm:$0xff]  ;;  %v10201_v43 = vand.u32 4294901760, %v8507_v25  ;;  %v10203_v40 = vand.u32 4294901760, %v8569_v31 }
 0x252   : >> { %v2836_v32 = vsub.f32 %v8768_v7, %v2835_v21  ;;  %v10189_v7 = vld [vmem:[#allocation79_spill] sm:$0xff]  ;;  %v10208_v25 = vand.u32 4294901760, %v8704_v55  ;;  %v10209_v31 = vld [vmem:[#allocation70_spill] sm:$0xff] }
 0x253   : >> { %v2825_v49 = vand.u32 4294901760, %v2824_v15  ;;  %4462 = vmatpush1.bf16.msra.mxu1 %v4461_v29  ;;  %v4737_v44 = vpack.c.bf16 %v10189_v7, %v7827_v18  ;;  %v10190_v15 = vld [vmem:[#allocation86_spill] sm:$0xff]  ;;  %v10198_v7 = vand.u32 4294901760, %v8390_v30  ;;  %v10204_v30 = vand.u32 4294901760, %v8580_v19 }
 0x254   : >> { %v2837_v24 = vand.u32 4294901760, %v2836_v32  ;;  %4464 = vmatprep.subr.bf16.mxu1 %v4463_v36  ;;  %v4739_v29 = vpack.c.bf16 %v10190_v15, %v7890_v37  ;;  %v10191_v32 = vld [vmem:[#allocation159_spill] sm:$0xff]  ;;  %v10194_v36 = vld [vmem:[#allocation164_spill] sm:$0xff]  ;;  %v4741_v19 = vpack.c.bf16 %v10209_v31, %v7964_v9 }
 0x255   : >> { %v4469_v16 = vpack.c.bf16 %v10192_v42, %v10191_v32  ;;  %v4471_v61 = vpack.c.bf16 %v10194_v36, %v10193_v58  ;;  %v8813_v18 = vpack.c.bf16 %v10198_v7, %v10197_v60  ;;  %v10200_v42 = vand.u32 4294901760, %v8454_v38  ;;  %v10211_v36 = vld [vmem:[#allocation167_spill] sm:$0xff] }
 0x256   : >> { %v4733_v27 = vpack.c.bf16 %v2837_v24, %v2825_v49  ;;  %v10196_v49 = vand.u32 4294901760, %v8327_v62  ;;  %v10202_v62 = vand.u32 4294901760, %v8518_v56  ;;  %v8831_v7 = vpack.c.bf16 %v10204_v30, %v10203_v40 }
 0x257   : >> { %4466 = vmatpush1.bf16.msra.mxu1 %v4465_v14  ;;  %v10207_v38 = vand.u32 4294901760, %v8693_v1  ;;  %v8845_v56 = vpack.c.bf16 %v2601_v46, %v2597_v0  ;;  %v10212_v1 = vld [vmem:[#allocation168_spill] sm:$0xff]  ;;  %v10214_v0 = vand.u32 4294901760, %v8343_v22  ;;  %v10215_v46 = vand.u32 4294901760, %v8350_v57 }
 0x258   : >> { %4734 = vmatpush1.bf16.msra.mxu0 %v4733_v27  ;;  %v8807_v24 = vpack.c.bf16 %v10196_v49, %v10195_v12  ;;  %4468 = vmatprep.subr.bf16.mxu1 %v4467_v26  ;;  %v10199_v27 = vand.u32 4294901760, %v8448_v52  ;;  %v8825_v32 = vpack.c.bf16 %v10202_v62, %v10201_v43  ;;  %v10206_v52 = vand.u32 4294901760, %v8642_v54  ;;  %v10210_v54 = vld [vmem:[#allocation165_spill] sm:$0xff]  ;;  %v10213_v49 = vld [vmem:[#allocation170_spill] sm:$0xff] }
 0x259   : >> { %4736 = vmatprep.subr.bf16.mxu0 %v4735_v41  ;;  %v10205_v41 = vand.u32 4294901760, %v8631_v4  ;;  %v8843_v58 = vpack.c.bf16 %v10208_v25, %v10207_v38  ;;  %v4743_v4 = vpack.c.bf16 %v8045_v10, %v8040_v45  ;;  %v4473_v12 = vpack.c.bf16 %v10211_v36, %v10210_v54 }
 0x25a   : >> { %v8819_v14 = vpack.c.bf16 %v10200_v42, %v10199_v27  ;;  %v4475_v55 = vpack.c.bf16 %v10213_v49, %v10212_v1  ;;  %v8860_v60 = vpack.c.bf16 %v10215_v46, %v10214_v0  ;;  %v10217_v27 = vand.u32 4294901760, %v8412_v63  ;;  %v10229_v49 = vld [vmem:[#allocation171_spill] sm:$0xff]  ;;  %v10230_v0 = vld [vmem:[#allocation174_spill] sm:$0xff] }
 0x25b   : >> { %v8837_v26 = vpack.c.bf16 %v10206_v52, %v10205_v41  ;;  %2873 = vmatmul.mubr.f32.vlgmr.msra.gmra.mrb[2].mxu0 %v8793_v20  ;;  %4470 = vmatpush1.bf16.msra.mxu1 %v4469_v16  ;;  %v10218_v16 = vand.u32 4294901760, %v8467_v6  ;;  %v10219_v43 = vand.u32 4294901760, %v8478_v2  ;;  %v10221_v22 = vand.u32 4294901760, %v8531_v34 }
 0x25c   : >> { %4738 = vmatpush1.bf16.msra.mxu0 %v4737_v44  ;;  %4472 = vmatprep.subr.bf16.mxu1 %v4471_v61  ;;  %v10216_v44 = vand.u32 4294901760, %v8407_v5  ;;  %v10222_v57 = vand.u32 4294901760, %v8540_v17  ;;  %v10223_v5 = vand.u32 4294901760, %v8593_v48  ;;  %v10224_v63 = vand.u32 4294901760, %v8602_v33 }
 0x25d   : >> { %4740 = vmatprep.subr.bf16.mxu0 %v4739_v29  ;;  %v8872_v62 = vpack.c.bf16 %v10219_v43, %v10218_v16  ;;  %v10220_v29 = vmov 0.0   ;;  %v10225_v30 = vand.u32 4294901760, %v8655_v50  ;;  %v10226_v41 = vand.u32 4294901760, %v8664_v11  ;;  %v10232_v16 = vld [vmem:[#allocation78_spill] sm:$0xff] }
 0x25e   : >> { %v8866_v42 = vpack.c.bf16 %v10217_v27, %v10216_v44  ;;  %3007 = vmatprep.mubr.f32.mxu0 %v10220_v29  ;;  %v8879_v61 = vpack.c.bf16 %v10222_v57, %v10221_v22  ;;  %v8885_v40 = vpack.c.bf16 %v10224_v63, %v10223_v5  ;;  %v10227_v38 = vand.u32 4294901760, %v8717_v53  ;;  %v10231_v44 = vld [vmem:[#allocation90_spill] sm:$0xff]  ;;  %v10238_v22 = vld [vmem:[#allocation87_spill] sm:$0xff]  ;;  %v10244_v63 = vld [vmem:[#allocation100_spill] sm:$0xff] }
 0x25f   : >> { %v8891_v52 = vpack.c.bf16 %v10226_v41, %v10225_v30  ;;  %v10228_v25 = vand.u32 4294901760, %v8726_v13  ;;  %v8899_v36 = vpack.c.bf16 %v2835_v21, %v2823_v59  ;;  %v4745_v1 = vpack.c.bf16 %v8124_v51, %v8119_v23  ;;  %4474 = vmatpush1.bf16.msra.mxu1 %v4473_v12  ;;  %v10233_v59 = vld [vmem:[#allocation83_spill] sm:$0xff]  ;;  %v10234_v21 = vld [vmem:[#allocation81_spill] sm:$0xff]  ;;  %v10235_v12 = vld [vmem:[#allocation82_spill] sm:$0xff] }
 0x260   : >> { %4742 = vmatpush1.bf16.msra.mxu0 %v4741_v19  ;;  %v4477_v46 = vpack.c.bf16 %v10230_v0, %v10229_v49  ;;  %v4747_v27 = vpack.c.bf16 %v10231_v44, %v8192_v35  ;;  %4476 = vmatprep.subr.bf16.mxu1 %v4475_v55  ;;  %v4755_v19 = vpack.c.bf16 %v8478_v2, %v8467_v6  ;;  %v10239_v57 = vld [vmem:[#allocation91_spill] sm:$0xff]  ;;  %v10240_v2 = vld [vmem:[#allocation94_spill] sm:$0xff]  ;;  %v10247_v30 = vld [vmem:[#allocation96_spill] sm:$0xff] }
 0x261   : >> { %v8897_v54 = vpack.c.bf16 %v10228_v25, %v10227_v38  ;;  %4744 = vmatprep.subr.bf16.mxu0 %v4743_v4  ;;  %v10236_v4 = vld [vmem:[#allocation172_spill] sm:$0xff]  ;;  %v4757_v55 = vpack.c.bf16 %v8540_v17, %v8531_v34  ;;  %v4761_v6 = vpack.c.bf16 %v8664_v11, %v8655_v50  ;;  %v10242_v34 = vld [vmem:[#allocation93_spill] sm:$0xff]  ;;  %v10243_v17 = vld [vmem:[#allocation95_spill] sm:$0xff]  ;;  %v10248_v41 = vand.u32 4294901760, %v10247_v30 }
 0x262   : >> { %v10237_v43 = vand.u32 4294901760, %v10236_v4  ;;  %v4765_v5 = vpack.c.bf16 %v10243_v17, %v10242_v34  ;;  %v10249_v11 = vld [vmem:[#allocation103_spill] sm:$0xff]  ;;  %v10252_v25 = vld [vmem:[#allocation122_spill] sm:$0xff]  ;;  %v10260_v4 = vld [vmem:[#allocation88_spill] sm:$0xff] }
 0x263   : >> { %4478 = vmatpush1.bf16.msra.mxu1 %v4477_v46  ;;  %v10254_v0 = vld [vmem:[#allocation106_spill] sm:$0xff]  ;;  %v10255_v46 = vld [vmem:[#allocation80_spill] sm:$0xff]  ;;  %v10269_v17 = vld [vmem:[#allocation115_spill] sm:$0xff] }
 0x264   : >> { %4746 = vmatpush1.bf16.msra.mxu0 %v4745_v1  ;;  %4480 = vmatprep.subr.bf16.mxu1 %v10232_v16  ;;  %v10253_v1 = vand.u32 4294901760, %v10252_v25  ;;  %v10257_v16 = vld [vmem:[#allocation85_spill] sm:$0xff] }
 0x265   : >> { %4748 = vmatprep.subr.bf16.mxu0 %v4747_v27  ;;  %v10256_v27 = vand.u32 4294901760, %v10255_v46  ;;  %v10280_v46 = vld [vmem:[#allocation92_spill] sm:$0xff] }
 0x266   : >> { %1990 = vmatmul.mubr.f32.vlgmr.msra.gmra.mrb[0].mxu1 %v10233_v59 }
 0x267   : >> { %4482 = vmatpush1.bf16.msra.mxu1 %v10234_v21  ;;  %2127 = vmatprep.mubr.f32.mxu1 %v10237_v43  ;;  %v10258_v21 = vand.u32 4294901760, %v10257_v16  ;;  %v10261_v43 = vand.u32 4294901760, %v10260_v4  ;;  %v10282_v16 = vld [vmem:[#allocation75_spill] sm:$0xff]  ;;  %v10284_v4 = vld [vmem:[#allocation124_spill] sm:$0xff] }
 0x268   : >> { %4750 = vmatpush1.bf16.msra.mxu0 %v4749_v3  ;;  %4484 = vmatprep.subr.bf16.mxu1 %v10235_v12  ;;  %v4759_v3 = vpack.c.bf16 %v8602_v33, %v8593_v48  ;;  %v10245_v48 = vld [vmem:[#allocation84_spill] sm:$0xff]  ;;  %v10259_v12 = vld [vmem:[#allocation109_spill] sm:$0xff] }
 0x269   : >> { %4752 = vmatprep.subr.bf16.mxu0 %v4751_v28  ;;  %v4763_v28 = vpack.c.bf16 %v8726_v13, %v8717_v53  ;;  %v10246_v33 = vand.u32 4294901760, %v10245_v48  ;;  %v8939_v53 = vsub.f32 %v10188_v39, %v8793_v20  ;;  %v10250_v13 = vld [vmem:[#allocation120_spill] sm:$0xff]  ;;  %v10272_v48 = vld [vmem:[#allocation73_spill] sm:$0xff] }
 0x26a   : >> { %v10251_v38 = vand.u32 4294901760, %v10250_v13 }
 0x26b   : >> { %4486 = vmatpush1.bf16.msra.mxu1 %v10238_v22  ;;  %v8934_v50 = vpack.c.bf16 %v10248_v41, %v10246_v33  ;;  %v10273_v33 = vand.u32 4294901760, %v10272_v48  ;;  %v10274_v41 = vld [vmem:[#allocation118_spill] sm:$0xff] }
 0x26c   : >> { %4754 = vmatpush1.bf16.msra.mxu0 %v4753_v47  ;;  %4488 = vmatprep.subr.bf16.mxu1 %v10239_v57  ;;  %v10241_v47 = vld [vmem:[#allocation97_spill] sm:$0xff]  ;;  %v8945_v49 = vpack.c.bf16 %v10253_v1, %v10251_v38  ;;  %v10264_v57 = vld [vmem:[#allocation112_spill] sm:$0xff] }
 0x26d   : >> { %4756 = vmatprep.subr.bf16.mxu0 %v4755_v19  ;;  %v8953_v19 = vpack.c.bf16 %v10258_v21, %v10256_v27  ;;  %v10277_v38 = vld [vmem:[#allocation72_spill] sm:$0xff]  ;;  %v10281_v27 = vand.u32 4294901760, %v10280_v46  ;;  %v10283_v21 = vand.u32 4294901760, %v10282_v16  ;;  %v10301_v46 = vld [vmem:[#allocation154_spill] sm:$0xff] }
 0x26e   : >> { %v10278_v25 = vand.u32 4294901760, %v10277_v38  ;;  %v10299_v38 = vld [vmem:[#allocation79_spill] sm:$0xff] }
 0x26f   : >> { %4490 = vmatpush1.bf16.msra.mxu1 %v10240_v2 }
 0x270   : >> { %4758 = vmatpush1.bf16.msra.mxu0 %v4757_v55  ;;  %4492 = vmatprep.subr.bf16.mxu1 %v10241_v47  ;;  %v10262_v55 = vld [vmem:[#allocation89_spill] sm:$0xff] }
 0x271   : >> { %4760 = vmatprep.subr.bf16.mxu0 %v4759_v3  ;;  %v10263_v22 = vand.u32 4294901760, %v10262_v55  ;;  %v10286_v55 = vld [vmem:[#allocation130_spill] sm:$0xff] }
 0x273   : >> { %4494 = vmatpush1.bf16.msra.mxu1 %v10244_v63  ;;  %v8962_v3 = vpack.c.bf16 %v10263_v22, %v10261_v43  ;;  %v10285_v43 = vld [vmem:[#allocation127_spill] sm:$0xff]  ;;  %v10287_v22 = vld [vmem:[#allocation133_spill] sm:$0xff] }
 0x274   : >> { %4762 = vmatpush1.bf16.msra.mxu0 %v4761_v6  ;;  %4496 = vmatprep.subr.bf16.mxu1 %v10249_v11  ;;  %v10265_v6 = vld [vmem:[#allocation71_spill] sm:$0xff]  ;;  %v10275_v11 = vld [vmem:[#allocation74_spill] sm:$0xff] }
 0x275   : >> { %4764 = vmatprep.subr.bf16.mxu0 %v4763_v28  ;;  %v10266_v2 = vand.u32 4294901760, %v10265_v6  ;;  %v10267_v28 = vld [vmem:[#allocation77_spill] sm:$0xff]  ;;  %v10276_v13 = vand.u32 4294901760, %v10275_v11  ;;  %v10289_v6 = vld [vmem:[#allocation139_spill] sm:$0xff]  ;;  %v10297_v11 = vld [vmem:[#allocation126_spill] sm:$0xff] }
 0x276   : >> { %v10268_v47 = vand.u32 4294901760, %v10267_v28  ;;  %v10291_v28 = vld [vmem:[#allocation145_spill] sm:$0xff] }
 0x277   : >> { %4498 = vmatpush1.bf16.msra.mxu1 %v10254_v0  ;;  %v8987_v1 = vpack.c.bf16 %v10278_v25, %v10276_v13  ;;  %v10279_v0 = vld [vmem:[#allocation121_spill] sm:$0xff]  ;;  %v10298_v13 = vand.u32 4294901760, %v10297_v11  ;;  %v10300_v25 = vand.u32 4294901760, %v10299_v38 }
 0x278   : >> { %4766 = vmatpush1.bf16.msra.mxu0 %v4765_v5  ;;  %4500 = vmatprep.subr.bf16.mxu1 %v10259_v12  ;;  %v8970_v34 = vpack.c.bf16 %v10268_v47, %v10266_v2  ;;  %v10270_v5 = vld [vmem:[#allocation68_spill] sm:$0xff]  ;;  %v8995_v12 = vpack.c.bf16 %v10283_v21, %v10281_v27  ;;  %v10290_v2 = vld [vmem:[#allocation142_spill] sm:$0xff]  ;;  %v10302_v27 = vand.u32 4294901760, %v7890_v37  ;;  %v10304_v21 = vld [vmem:[#allocation157_spill] sm:$0xff] }
 0x279   : >> { %4768 = vmatprep.subr.bf16.mxu0 %v8934_v50  ;;  %v10271_v63 = vand.u32 4294901760, %v10270_v5  ;;  %v10292_v47 = vld [vmem:[#allocation148_spill] sm:$0xff] }
 0x27a   : >> { %v10294_v5 = vld [vmem:[#allocation116_spill] sm:$0xff] }
 0x27b   : >> { %3010 = vmatmul.mubr.f32.vlgmr.msra.gmra.mrb[2].mxu0 %v8939_v53  ;;  %4502 = vmatpush1.bf16.msra.mxu1 %v10264_v57  ;;  %v8979_v30 = vpack.c.bf16 %v10273_v33, %v10271_v63  ;;  %v10288_v57 = vld [vmem:[#allocation136_spill] sm:$0xff]  ;;  %v10295_v63 = vand.u32 4294901760, %v10294_v5  ;;  %v10296_v33 = vld [vmem:[#allocation151_spill] sm:$0xff] }
 0x27c   : >> { %4770 = vmatpush1.bf16.msra.mxu0 %v8945_v49  ;;  %4504 = vmatprep.subr.bf16.mxu1 %v10269_v17  ;;  %v10293_v17 = vand.u32 4294901760, %v10184_v8  ;;  %v10303_v8 = vand.u32 4294901760, %v10190_v15  ;;  %v10311_v15 = vand.u32 4294901760, %v8119_v23  ;;  %v10317_v5 = vld [vmem:[#allocation76_spill] sm:$0xff]  ;;  %v10321_v23 = vld [vmem:[#allocation173_spill] sm:$0xff] }
 0x27d   : >> { %4772 = vmatprep.subr.bf16.mxu0 %v8953_v19  ;;  %3112 = vmatprep.mubr.f32.mxu0 %v10220_v29 }
 0x27e   : >> { %v4799_v48 = vpack.c.bf16 %v10295_v63, %v10293_v17  ;;  %v4803_v16 = vpack.c.bf16 %v10303_v8, %v10302_v27  ;;  %v10318_v63 = vand.u32 4294901760, %v10317_v5 }
 0x27f   : >> { %4506 = vmatpush1.bf16.msra.mxu1 %v10274_v41  ;;  %v2638_v41 = vand.u32 4294901760, %v8939_v53 }
 0x280   : >> { %4774 = vmatpush1.bf16.msra.mxu0 %v8962_v3  ;;  %4508 = vmatprep.subr.bf16.mxu1 %v10279_v0  ;;  %v4801_v0 = vpack.c.bf16 %v10300_v25, %v10298_v13 }
 0x281   : >> { %4776 = vmatprep.subr.bf16.mxu0 %v8970_v34 }
 0x283   : >> { %4510 = vmatpush1.bf16.msra.mxu1 %v10284_v4  ;;  %v10305_v4 = vand.u32 4294901760, %v7964_v9  ;;  %v10312_v9 = vand.u32 4294901760, %v8124_v51  ;;  %v10322_v51 = vand.u32 4294901760, %v10233_v59 }
 0x284   : >> { %4778 = vmatpush1.bf16.msra.mxu0 %v8979_v30  ;;  %4512 = vmatprep.subr.bf16.mxu1 %v10285_v43  ;;  %v10306_v43 = vand.u32 4294901760, %v10209_v31  ;;  %v10313_v31 = vld [vmem:[#allocation166_spill] sm:$0xff] }
 0x285   : >> { %4780 = vmatprep.subr.bf16.mxu0 %v8987_v1 }
 0x287   : >> { %4514 = vmatpush1.bf16.msra.mxu1 %v10286_v55  ;;  %v4805_v55 = vpack.c.bf16 %v10306_v43, %v10305_v4 }
 0x288   : >> { %4782 = vmatpush1.bf16.msra.mxu0 %v8995_v12  ;;  %4516 = vmatprep.subr.bf16.mxu1 %v10287_v22  ;;  %v10307_v22 = vld [vmem:[#allocation160_spill] sm:$0xff] }
 0x289   : >> { %4784 = vmatprep.subr.bf16.mxu0 %v8807_v24 }
 0x28b   : >> { %4518 = vmatpush1.bf16.msra.mxu1 %v10288_v57  ;;  %v10308_v57 = vand.u32 4294901760, %v8040_v45  ;;  %v10315_v45 = vand.u32 4294901760, %v10231_v44 }
 0x28c   : >> { %4786 = vmatpush1.bf16.msra.mxu0 %v8813_v18  ;;  %4520 = vmatprep.subr.bf16.mxu1 %v10289_v6  ;;  %v10309_v6 = vand.u32 4294901760, %v8045_v10  ;;  %v10316_v10 = vld [vmem:[#allocation169_spill] sm:$0xff] }
 0x28d   : >> { %4788 = vmatprep.subr.bf16.mxu0 %v8819_v14 }
 0x28e   : >> { %v4807_v37 = vpack.c.bf16 %v10309_v6, %v10308_v57 }
 0x28f   : >> { %4522 = vmatpush1.bf16.msra.mxu1 %v10290_v2  ;;  %v10310_v2 = vld [vmem:[#allocation163_spill] sm:$0xff] }
 0x290   : >> { %4790 = vmatpush1.bf16.msra.mxu0 %v8825_v32  ;;  %4524 = vmatprep.subr.bf16.mxu1 %v10291_v28  ;;  %v4809_v28 = vpack.c.bf16 %v10312_v9, %v10311_v15 }
 0x291   : >> { %4792 = vmatprep.subr.bf16.mxu0 %v8831_v7 }
 0x293   : >> { %4526 = vmatpush1.bf16.msra.mxu1 %v10292_v47  ;;  %v10314_v47 = vand.u32 4294901760, %v8192_v35  ;;  %v2639_v35 = vsub.f32 %v8939_v53, %v2638_v41 }
 0x294   : >> { %4794 = vmatpush1.bf16.msra.mxu0 %v8837_v26  ;;  %4528 = vmatprep.subr.bf16.mxu1 %v10296_v33 }
 0x295   : >> { %4796 = vmatprep.subr.bf16.mxu0 %v8843_v58  ;;  %v4811_v17 = vpack.c.bf16 %v10315_v45, %v10314_v47 }
 0x297   : >> { %4530 = vmatpush1.bf16.msra.mxu1 %v10301_v46 }
 0x298   : >> { %4798 = vmatpush1.bf16.msra.mxu0 %v8845_v56  ;;  %4532 = vmatprep.subr.bf16.mxu1 %v10304_v21 }
 0x299   : >> { %4800 = vmatprep.subr.bf16.mxu0 %v4799_v48  ;;  %v10319_v48 = vld [vmem:[#allocation69_spill] sm:$0xff] }
 0x29a   : >> { %v10320_v33 = vand.u32 4294901760, %v10319_v48 }
 0x29b   : >> { %3116 = vmatmul.mubr.f32.vlgmr.msra.gmra.mrb[2].mxu0 %v2638_v41  ;;  %4534 = vmatpush1.bf16.msra.mxu1 %v10307_v22 }
 0x29c   : >> { %4802 = vmatpush1.bf16.msra.mxu0 %v4801_v0  ;;  %4536 = vmatprep.subr.bf16.mxu1 %v10310_v2  ;;  %v4813_v11 = vpack.c.bf16 %v10320_v33, %v10318_v63 }
 0x29d   : >> { %4804 = vmatprep.subr.bf16.mxu0 %v4803_v16  ;;  %3282 = vmatprep.mubr.f32.mxu0 %v10220_v29 }
 0x29f   : >> { %4538 = vmatpush1.bf16.msra.mxu1 %v10313_v31 }
 0x2a0   : >> { %4806 = vmatpush1.bf16.msra.mxu0 %v4805_v55  ;;  %4540 = vmatprep.subr.bf16.mxu1 %v10316_v10 }
 0x2a1   : >> { %4808 = vmatprep.subr.bf16.mxu0 %v4807_v37 }
 0x2a3   : >> { %4542 = vmatpush1.bf16.msra.mxu1 %v10321_v23 }
 0x2a4   : >> { %4810 = vmatpush1.bf16.msra.mxu0 %v4809_v28  ;;  %4672 = vmatprep.subr.bf16.mxu1 %v8934_v50 }
 0x2a5   : >> { %4812 = vmatprep.subr.bf16.mxu0 %v4811_v17 }
 0x2a6   : >> { %2131 = vmatmul.mubr.f32.vlgmr.msra.gmra.mrb[0].mxu1 %v10322_v51 }
 0x2a7   : >> { %4674 = vmatpush1.bf16.msra.mxu1 %v8945_v49  ;;  %2635 = vmatprep.mubr.f32.mxu1 %v10220_v29 }
 0x2a8   : >> { %4814 = vmatpush1.bf16.msra.mxu0 %v4813_v11  ;;  %4676 = vmatprep.subr.bf16.mxu1 %v8953_v19  ;;  %v3402_v11 = vld [vmem:[#allocation8] sm:$0xff] (%p358_p2) }
 0x2a9   : >> { %4816 = vmatprep.subr.bf16.mxu0 %v8860_v60  ;;  %v2640_v60 = vand.u32 4294901760, %v2639_v35 }
 0x2ab   : >> { %4678 = vmatpush1.bf16.msra.mxu1 %v8962_v3 }
 0x2ac   : >> { %4818 = vmatpush1.bf16.msra.mxu0 %v8866_v42  ;;  %4680 = vmatprep.subr.bf16.mxu1 %v8970_v34 }
 0x2ad   : >> { %4820 = vmatprep.subr.bf16.mxu0 %v8872_v62 }
 0x2af   : >> { %4682 = vmatpush1.bf16.msra.mxu1 %v8979_v30 }
 0x2b0   : >> { %4822 = vmatpush1.bf16.msra.mxu0 %v8879_v61  ;;  %4684 = vmatprep.subr.bf16.mxu1 %v8987_v1 }
 0x2b1   : >> { %4824 = vmatprep.subr.bf16.mxu0 %v8885_v40 }
 0x2b3   : >> { %4686 = vmatpush1.bf16.msra.mxu1 %v8995_v12 }
 0x2b4   : >> { %4826 = vmatpush1.bf16.msra.mxu0 %v8891_v52  ;;  %4688 = vmatprep.subr.bf16.mxu1 %v8807_v24 }
 0x2b5   : >> { %4828 = vmatprep.subr.bf16.mxu0 %v8897_v54 }
 0x2b7   : >> { %4690 = vmatpush1.bf16.msra.mxu1 %v8813_v18 }
 0x2b8   : >> { %4830 = vmatpush1.bf16.msra.mxu0 %v8899_v36  ;;  %4692 = vmatprep.subr.bf16.mxu1 %v8819_v14 }
 0x2b9   : >> { %4832 = vmatprep.subr.bf16.mxu0 %v8934_v50 }
 0x2bb   : >> { %3284 = vmatmul.mubr.f32.vlgmr.msra.gmra.mrb[2].mxu0 %v8793_v20  ;;  %4694 = vmatpush1.bf16.msra.mxu1 %v8825_v32 }
 0x2bc   : >> { %4834 = vmatpush1.bf16.msra.mxu0 %v8945_v49  ;;  %4696 = vmatprep.subr.bf16.mxu1 %v8831_v7 }
 0x2bd   : >> { %4836 = vmatprep.subr.bf16.mxu0 %v8953_v19  ;;  %3386 = vmatprep.mubr.f32.mxu0 %v10220_v29 }
 0x2bf   : >> { %4698 = vmatpush1.bf16.msra.mxu1 %v8837_v26 }
 0x2c0   : >> { %4838 = vmatpush1.bf16.msra.mxu0 %v8962_v3  ;;  %4700 = vmatprep.subr.bf16.mxu1 %v8843_v58  ;;  %v5296_v3 = vmov (%p358_p2), 0.0  }
 0x2c1   : >> { %4840 = vmatprep.subr.bf16.mxu0 %v8970_v34 }
 0x2c3   : >> { %4702 = vmatpush1.bf16.msra.mxu1 %v8845_v56 }
 0x2c4   : >> { %4842 = vmatpush1.bf16.msra.mxu0 %v8979_v30 }
 0x2c5   : >> { %4844 = vmatprep.subr.bf16.mxu0 %v8987_v1 }
 0x2c6   : >> { %2641 = vmatmul.mubr.f32.vlgmr.msra.gmra.mrb[2].mxu1 %v2640_v60 }
 0x2c7   : > { %3509 = vmatprep.mubr.f32.mxu1 (%p358_p2), %v5296_v3 }
 0x2c8   : >> { %4846 = vmatpush1.bf16.msra.mxu0 %v8995_v12 }
 0x2c9   : >> { %4848 = vmatprep.subr.bf16.mxu0 %v8807_v24 }
 0x2cc   : >> { %4850 = vmatpush1.bf16.msra.mxu0 %v8813_v18 }
 0x2cd   : >> { %4852 = vmatprep.subr.bf16.mxu0 %v8819_v14 }
 0x2d0   : >> { %4854 = vmatpush1.bf16.msra.mxu0 %v8825_v32 }
 0x2d1   : >> { %4856 = vmatprep.subr.bf16.mxu0 %v8831_v7 }
 0x2d4   : >> { %4858 = vmatpush1.bf16.msra.mxu0 %v8837_v26 }
 0x2d5   : >> { %4860 = vmatprep.subr.bf16.mxu0 %v8843_v58 }
 0x2d8   : >> { %4862 = vmatpush1.bf16.msra.mxu0 %v8845_v56 }
 0x2db   : >> { %3388 = vmatmul.mubr.f32.vlgmr.msra.gmra.mrb[2].mxu0 %v8793_v20 }
 0x2dc   : >> { %v2534_v42 = vpop.f32.mrb[0].mxu0  ;;  %3874 = vmatprep.mubr.f32.mxu0 (%p358_p2), %v5296_v3 }
 0x2dd   : >> { %v2536_v62 = vpop.f32.mrb[1].mxu0 }
 0x379   : >> { %v2132_v24 = vpop.f32.mrb[0].mxu1 }
 0x37a   : >> { %v4959_v29 = vadd.f32 %v2534_v42, %v2132_v24  ;;  %v2134_v18 = vpop.f32.mrb[1].mxu1 }
 0x37b   : >> { %v4962_v61 = vadd.f32 %v2536_v62, %v2134_v18 }
 0x399   : >> { %v2642_v14 = vpop.f32.mrb[2].mxu1 }
 0x39a   : >> { %v4960_v40 = vadd.f32 %v4959_v29, %v2642_v14  ;;  %v2644_v32 = vpop.f32.mrb[3].mxu1 }
 0x39b   : >> { %v4963_v52 = vadd.f32 %v4962_v61, %v2644_v32 }
 0x3ac   : > { %360 = sbr.rel (!%p358_p2) target bundleno = 198 (0xc6), region = 121 }
 0x3ae   : >> { %v3389_v7 = vpop.f32.mrb[2].mxu0 }
 0x3af   : >> { %v4961_v26 = vadd.f32 %v4960_v40, %v3389_v7  ;;  %v3391_v58 = vpop.f32.mrb[3].mxu0 }
 0x3b0   : >> { %v4964_v54 = vadd.f32 %v4963_v52, %v3391_v58  ;;  %v3425_v52 = vsel (%p358_p2), %vm3423_vm2, %v3402_v11, 0 }
 0x3b1   : >> { %3400 = vst [vmem:[%s3399_s30] sm:$0xff] %v4961_v26 }
 0x3b2   : >> { %3401 = vst [vmem:[%s3399_s30 + $0x8] sm:$0xff] %v4964_v54  ;;  %v9175_v54 = vand.u32 (%p358_p2), 4294901760, %v3425_v52 }
 0x3b9   : > { %v3404_v20 = vld [vmem:[#allocation2 + $0x8] sm:$0xff]  ;;  %v3406_v56 = vld [vmem:[#allocation2 + $0x18] sm:$0xff]  ;;  %v3403_v36 = vld [vmem:[#allocation2] sm:$0xff] }
 0x3ba   : > { %v3427_v44 = vand.u32 4294901760, %v3404_v20  ;;  %v3431_v59 = vand.u32 4294901760, %v3406_v56  ;;  %v3405_v50 = vld [vmem:[#allocation2 + $0x10] sm:$0xff]  ;;  %v3429_v53 = vand.u32 4294901760, %v3403_v36  ;;  %v3408_v49 = vld [vmem:[#allocation2 + $0x28] sm:$0xff]  ;;  %v3410_v19 = vld [vmem:[#allocation2 + $0x38] sm:$0xff] }
 0x3bb   : > { %v3433_v34 = vand.u32 4294901760, %v3405_v50  ;;  %v3435_v30 = vand.u32 4294901760, %v3408_v49  ;;  %v3439_v1 = vand.u32 4294901760, %v3410_v19  ;;  %v3407_v12 = vld [vmem:[#allocation2 + $0x20] sm:$0xff]  ;;  %v3409_v41 = vld [vmem:[#allocation2 + $0x30] sm:$0xff]  ;;  %v3412_v13 = vld [vmem:[#allocation2 + $0x48] sm:$0xff] }
 0x3bc   : > { %v9111_v39 = vpack.c.bf16 %v3431_v59, %v3427_v44  ;;  %v9113_v38 = vsub.f32 %v3404_v20, %v3427_v44  ;;  %v3414_v25 = vld [vmem:[#allocation2 + $0x58] sm:$0xff]  ;;  %v3411_v0 = vld [vmem:[#allocation2 + $0x40] sm:$0xff]  ;;  %v3413_v46 = vld [vmem:[#allocation2 + $0x50] sm:$0xff]  ;;  %v9115_v27 = vsub.f32 %v3406_v56, %v3431_v59  ;;  %v9119_v16 = vsub.f32 %v3403_v36, %v3429_v53 }
 0x3bd   : > { %v9117_v8 = vpack.c.bf16 %v3433_v34, %v3429_v53  ;;  %v9121_v21 = vpack.c.bf16 %v3439_v1, %v3435_v30  ;;  %v3416_v4 = vld [vmem:[#allocation2 + $0x68] sm:$0xff]  ;;  %v3418_v43 = vld [vmem:[#allocation2 + $0x78] sm:$0xff]  ;;  %v9125_v55 = vsub.f32 %v3405_v50, %v3433_v34  ;;  %v3437_v22 = vand.u32 4294901760, %v3407_v12  ;;  %v3415_v17 = vld [vmem:[#allocation2 + $0x60] sm:$0xff] }
 0x3be   : > { %4864 = vmatprep.subr.bf16.mxu1 %v9111_v39  ;;  %4912 = vmatprep.subr.bf16.mxu0 %v9111_v39  ;;  %v3441_v57 = vand.u32 4294901760, %v3409_v41  ;;  %v3443_v6 = vand.u32 4294901760, %v3412_v13  ;;  %v3447_v37 = vand.u32 4294901760, %v3414_v25  ;;  %v3445_v2 = vand.u32 4294901760, %v3411_v0  ;;  %v3417_v10 = vld [vmem:[#allocation2 + $0x70] sm:$0xff]  ;;  %v9153_v42 = vld [vmem:[#allocation2 + $0x88] sm:$0xff] }
 0x3bf   : > { %4866 = vmatpush1.bf16.msra.mxu1 %v9117_v8  ;;  %4914 = vmatpush1.bf16.msra.mxu0 %v9117_v8  ;;  %v3449_v15 = vand.u32 4294901760, %v3413_v46  ;;  %v3451_v9 = vand.u32 4294901760, %v3416_v4  ;;  %v9130_v28 = vsub.f32 %v3408_v49, %v3435_v30  ;;  %v9132_v31 = vsub.f32 %v3410_v19, %v3439_v1  ;;  %v3419_v62 = vld [vmem:[#allocation2 + $0x80] sm:$0xff] }
 0x3c0   : > { %4868 = vmatprep.subr.bf16.mxu1 %v9121_v21  ;;  %4916 = vmatprep.subr.bf16.mxu0 %v9121_v21  ;;  %v9135_v47 = vpack.c.bf16 %v3441_v57, %v3437_v22  ;;  %v3455_v45 = vand.u32 4294901760, %v3418_v43  ;;  %v9137_v5 = vsub.f32 %v3407_v12, %v3437_v22  ;;  %v9139_v63 = vsub.f32 %v3409_v41, %v3441_v57 }
 0x3c1   : > { %v9141_v48 = vpack.c.bf16 %v3447_v37, %v3443_v6  ;;  %v9143_v33 = vsub.f32 %v3412_v13, %v3443_v6  ;;  %v9145_v23 = vsub.f32 %v3414_v25, %v3447_v37  ;;  %v9147_v51 = vpack.c.bf16 %v3449_v15, %v3445_v2 }
 0x3c2   : > { %v9149_v35 = vsub.f32 %v3411_v0, %v3445_v2  ;;  %v9151_v60 = vsub.f32 %v3413_v46, %v3449_v15  ;;  %v9157_v24 = vpack.c.bf16 %v3455_v45, %v3451_v9  ;;  %v9159_v29 = vsub.f32 %v3416_v4, %v3451_v9 }
 0x3c3   : > { %4870 = vmatpush1.bf16.msra.mxu1 %v9135_v47  ;;  %4918 = vmatpush1.bf16.msra.mxu0 %v9135_v47  ;;  %v3453_v18 = vand.u32 4294901760, %v3415_v17  ;;  %v3457_v61 = vand.u32 4294901760, %v3417_v10  ;;  %v9163_v14 = vsub.f32 %v3418_v43, %v3455_v45  ;;  %v3523_v40 = vand.u32 4294901760, %v9113_v38 }
 0x3c4   : > { %4872 = vmatprep.subr.bf16.mxu1 %v9141_v48  ;;  %4920 = vmatprep.subr.bf16.mxu0 %v9141_v48  ;;  %v3535_v32 = vand.u32 4294901760, %v9115_v27  ;;  %v9171_v26 = vand.u32 4294901760, %v9153_v42  ;;  %v9173_v58 = vand.u32 4294901760, %v3419_v62  ;;  %v9186_v59 = vsub.f32 %v3425_v52, %v9175_v54 }
 0x3c5   : > { %v9168_v7 = vpack.c.bf16 %v3457_v61, %v3453_v18  ;;  %v9177_v20 = vsub.f32 %v3415_v17, %v3453_v18  ;;  %v9179_v56 = vsub.f32 %v3417_v10, %v3457_v61  ;;  %v3524_v36 = vsub.f32 %v9113_v38, %v3523_v40 }
 0x3c6   : > { %v3536_v44 = vsub.f32 %v9115_v27, %v3535_v32  ;;  %v3529_v50 = vand.u32 4294901760, %v9119_v16  ;;  %v3541_v53 = vand.u32 4294901760, %v9125_v55  ;;  %v3547_v49 = vand.u32 4294901760, %v9130_v28 }
 0x3c7   : > { %4874 = vmatpush1.bf16.msra.mxu1 %v9147_v51  ;;  %4922 = vmatpush1.bf16.msra.mxu0 %v9147_v51  ;;  %v3525_v19 = vand.u32 4294901760, %v3524_v36  ;;  %v3559_v30 = vand.u32 4294901760, %v9132_v31  ;;  %v3553_v1 = vand.u32 4294901760, %v9137_v5  ;;  %v9196_v12 = vsub.f32 %v3419_v62, %v9173_v58 }
 0x3c8   : > { %4876 = vmatprep.subr.bf16.mxu1 %v9157_v24  ;;  %4924 = vmatprep.subr.bf16.mxu0 %v9157_v24  ;;  %v3537_v34 = vand.u32 4294901760, %v3536_v44  ;;  %v3512_v41 = vand.u32 4294901760, %v9186_v59  ;;  %v3530_v13 = vsub.f32 %v9119_v16, %v3529_v50  ;;  %v3542_v25 = vsub.f32 %v9125_v55, %v3541_v53 }
 0x3c9   : > { %v4927_v46 = vpack.c.bf16 %v3535_v32, %v3523_v40  ;;  %v3548_v4 = vsub.f32 %v9130_v28, %v3547_v49  ;;  %v3560_v43 = vsub.f32 %v9132_v31, %v3559_v30  ;;  %v3554_v37 = vsub.f32 %v9137_v5, %v3553_v1 }
 0x3ca   : > { %v4879_v0 = vpack.c.bf16 %v3537_v34, %v3525_v19  ;;  %v3513_v22 = vsub.f32 %v9186_v59, %v3512_v41  ;;  %v3531_v57 = vand.u32 4294901760, %v3530_v13  ;;  %v3543_v6 = vand.u32 4294901760, %v3542_v25 }
 0x3cb   : > { %4878 = vmatpush1.bf16.msra.mxu1 %v9168_v7  ;;  %4926 = vmatpush1.bf16.msra.mxu0 %v9168_v7  ;;  %v3549_v2 = vand.u32 4294901760, %v3548_v4  ;;  %v3561_v15 = vand.u32 4294901760, %v3560_v43  ;;  %v3565_v9 = vand.u32 4294901760, %v9139_v63  ;;  %v3571_v45 = vand.u32 4294901760, %v9143_v33 }
 0x3cc   : > { %3460 = vmatprep.subr.mxu1 %v9171_v26  ;;  %3825 = vmatprep.subr.mxu0 %v9171_v26  ;;  %v3514_v17 = vand.u32 4294901760, %v3513_v22  ;;  %v4929_v10 = vpack.c.bf16 %v3541_v53, %v3529_v50  ;;  %v4931_v11 = vpack.c.bf16 %v3559_v30, %v3547_v49  ;;  %v3583_v62 = vand.u32 4294901760, %v9145_v23 }
 0x3cd   : > { %v4881_v18 = vpack.c.bf16 %v3543_v6, %v3531_v57  ;;  %v3555_v61 = vand.u32 4294901760, %v3554_v37  ;;  %v3566_v40 = vsub.f32 %v9139_v63, %v3565_v9  ;;  %v3572_v32 = vsub.f32 %v9143_v33, %v3571_v45 }
 0x3ce   : > { %v4883_v52 = vpack.c.bf16 %v3561_v15, %v3549_v2  ;;  %v3584_v36 = vsub.f32 %v9145_v23, %v3583_v62  ;;  %v3577_v44 = vand.u32 4294901760, %v9149_v35  ;;  %v3589_v50 = vand.u32 4294901760, %v9151_v60 }
 0x3cf   : > { %3462 = vmatpush1.msra.mxu1 %v9173_v58  ;;  %3827 = vmatpush1.msra.mxu0 %v9173_v58  ;;  %v3567_v53 = vand.u32 4294901760, %v3566_v40  ;;  %v3573_v49 = vand.u32 4294901760, %v3572_v32  ;;  %v3595_v19 = vand.u32 4294901760, %v9159_v29  ;;  %v3607_v34 = vand.u32 4294901760, %v9163_v14 }
 0x3d0   : > { %4880 = vmatprep.subr.bf16.mxu1 %v4879_v0  ;;  %4928 = vmatprep.subr.bf16.mxu0 %v4927_v46  ;;  %v4933_v30 = vpack.c.bf16 %v3565_v9, %v3553_v1  ;;  %v3585_v13 = vand.u32 4294901760, %v3584_v36  ;;  %v3578_v25 = vsub.f32 %v9149_v35, %v3577_v44  ;;  %v3590_v4 = vsub.f32 %v9151_v60, %v3589_v50 }
 0x3d1   : > { %3515 = vmatmul.mubr.f32.vlgmr.msra.gmra.mrb[0].mxu1 %v3514_v17  ;;  %3878 = vmatmul.mubr.f32.vlgmr.msra.gmra.mrb[0].mxu0 %v3512_v41  ;;  %v4885_v43 = vpack.c.bf16 %v3567_v53, %v3555_v61  ;;  %v3596_v0 = vsub.f32 %v9159_v29, %v3595_v19  ;;  %v3608_v46 = vsub.f32 %v9163_v14, %v3607_v34  ;;  %v3601_v22 = vand.u32 4294901760, %v9177_v20 }
 0x3d2   : > { %4882 = vmatpush1.bf16.msra.mxu1 %v4881_v18  ;;  %4930 = vmatpush1.bf16.msra.mxu0 %v4929_v10  ;;  %v4887_v57 = vpack.c.bf16 %v3585_v13, %v3573_v49  ;;  %v4935_v6 = vpack.c.bf16 %v3583_v62, %v3571_v45  ;;  %v3579_v41 = vand.u32 4294901760, %v3578_v25  ;;  %v3591_v1 = vand.u32 4294901760, %v3590_v4 }
 0x3d3   : > { %4884 = vmatprep.subr.bf16.mxu1 %v4883_v52  ;;  %4932 = vmatprep.subr.bf16.mxu0 %v4931_v11  ;;  %v3597_v37 = vand.u32 4294901760, %v3596_v0  ;;  %v3609_v2 = vand.u32 4294901760, %v3608_v46  ;;  %v3602_v15 = vsub.f32 %v9177_v20, %v3601_v22  ;;  %v3613_v9 = vand.u32 4294901760, %v9179_v56 }
 0x3d4   : > { %3675 = vmatprep.mubr.f32.mxu1 %v5296_v3  ;;  %4002 = vmatprep.mubr.f32.mxu0 %v5296_v3  ;;  %v4937_v17 = vpack.c.bf16 %v3589_v50, %v3577_v44  ;;  %v3618_v10 = vsub.f32 %v9153_v42, %v9171_v26  ;;  %v4889_v11 = vpack.c.bf16 %v3591_v1, %v3579_v41  ;;  %v3625_v18 = vand.u32 4294901760, %v9196_v12 }
 0x3d5   : > { %v3603_v45 = vand.u32 4294901760, %v3602_v15  ;;  %v3614_v62 = vsub.f32 %v9179_v56, %v3613_v9  ;;  %v4891_v61 = vpack.c.bf16 %v3609_v2, %v3597_v37  ;;  %v4939_v40 = vpack.c.bf16 %v3607_v34, %v3595_v19 }
 0x3d6   : > { %4886 = vmatpush1.bf16.msra.mxu1 %v4885_v43  ;;  %4934 = vmatpush1.bf16.msra.mxu0 %v4933_v30  ;;  %v3619_v32 = vand.u32 4294901760, %v3618_v10  ;;  %v4941_v50 = vpack.c.bf16 %v3613_v9, %v3601_v22  ;;  %v3626_v42 = vsub.f32 %v9196_v12, %v3625_v18  ;;  %v4895_v19 = vpack.c.bf16 %v9115_v27, %v9113_v38 }
 0x3d7   : > { %4888 = vmatprep.subr.bf16.mxu1 %v4887_v57  ;;  %4936 = vmatprep.subr.bf16.mxu0 %v4935_v6  ;;  %v3615_v52 = vand.u32 4294901760, %v3614_v62  ;;  %v4897_v34 = vpack.c.bf16 %v9125_v55, %v9119_v16  ;;  %v4899_v30 = vpack.c.bf16 %v9132_v31, %v9130_v28  ;;  %v4901_v38 = vpack.c.bf16 %v9139_v63, %v9137_v5  ;;  %v3421_v16 = vld [vmem:[%s5559_s12] sm:$0xff] }
 0x3d8   : > { %v3620_v36 = vsub.f32 %v3618_v10, %v3619_v32  ;;  %v3627_v49 = vand.u32 4294901760, %v3626_v42  ;;  %v4903_v27 = vpack.c.bf16 %v9145_v23, %v9143_v33 }
 0x3d9   : > { %v4893_v44 = vpack.c.bf16 %v3615_v52, %v3603_v45 }
 0x3da   : > { %4890 = vmatpush1.bf16.msra.mxu1 %v4889_v11  ;;  %4938 = vmatpush1.bf16.msra.mxu0 %v4937_v17  ;;  %v3621_v53 = vand.u32 4294901760, %v3620_v36 }
 0x3db   : > { %4892 = vmatprep.subr.bf16.mxu1 %v4891_v61  ;;  %4940 = vmatprep.subr.bf16.mxu0 %v4939_v40 }
 0x3de   : > { %4894 = vmatpush1.bf16.msra.mxu1 %v4893_v44  ;;  %4942 = vmatpush1.bf16.msra.mxu0 %v4941_v50 }
 0x3df   : > { %3622 = vmatprep.subr.mxu1 %v3621_v53  ;;  %3951 = vmatprep.subr.mxu0 %v3619_v32 }
 0x3e2   : > { %3628 = vmatpush1.msra.mxu1 %v3627_v49  ;;  %3955 = vmatpush1.msra.mxu0 %v3625_v18 }
 0x3e3   : > { %4896 = vmatprep.subr.bf16.mxu1 %v4895_v19  ;;  %4944 = vmatprep.subr.bf16.mxu0 %v9111_v39  ;;  %v4905_v39 = vpack.c.bf16 %v9151_v60, %v9149_v35 }
 0x3e4   : > { %3677 = vmatmul.mubr.f32.vlgmr.msra.gmra.mrb[0].mxu1 %v9175_v54  ;;  %4004 = vmatmul.mubr.f32.vlgmr.msra.gmra.mrb[0].mxu0 %v9175_v54 }
 0x3e5   : > { %4898 = vmatpush1.bf16.msra.mxu1 %v4897_v34  ;;  %4946 = vmatpush1.bf16.msra.mxu0 %v9117_v8  ;;  %v4907_v8 = vpack.c.bf16 %v9163_v14, %v9159_v29 }
 0x3e6   : > { %4900 = vmatprep.subr.bf16.mxu1 %v4899_v30  ;;  %4948 = vmatprep.subr.bf16.mxu0 %v9121_v21  ;;  %v3422_v21 = vld [vmem:[%s5559_s12 + $0x8] sm:$0xff] }
 0x3e7   : > { %3783 = vmatprep.mubr.f32.mxu1 %v5296_v3  ;;  %4092 = vmatprep.mubr.f32.mxu0 %v5296_v3  ;;  %v4909_v3 = vpack.c.bf16 %v9179_v56, %v9177_v20 }
 0x3e9   : > { %4902 = vmatpush1.bf16.msra.mxu1 %v4901_v38  ;;  %4950 = vmatpush1.bf16.msra.mxu0 %v9135_v47 }
 0x3ea   : > { %4904 = vmatprep.subr.bf16.mxu1 %v4903_v27  ;;  %4952 = vmatprep.subr.bf16.mxu0 %v9141_v48 }
 0x3ed   : > { %4906 = vmatpush1.bf16.msra.mxu1 %v4905_v39  ;;  %4954 = vmatpush1.bf16.msra.mxu0 %v9147_v51 }
 0x3ee   : > { %4908 = vmatprep.subr.bf16.mxu1 %v4907_v8  ;;  %4956 = vmatprep.subr.bf16.mxu0 %v9157_v24 }
 0x3f1   : > { %4910 = vmatpush1.bf16.msra.mxu1 %v4909_v3  ;;  %4958 = vmatpush1.bf16.msra.mxu0 %v9168_v7 }
 0x3f2   : > { %3733 = vmatprep.subr.mxu1 %v3618_v10  ;;  %4043 = vmatprep.subr.mxu0 %v9171_v26 }
 0x3f5   : > { %3736 = vmatpush1.msra.mxu1 %v9196_v12  ;;  %4045 = vmatpush1.msra.mxu0 %v9173_v58 }
 0x3f6   : > { %3786 = vmatmul.mubr.f32.vlgmr.msra.gmra.mrb[0].mxu1 %v9186_v59  ;;  %4094 = vmatmul.mubr.f32.vlgmr.msra.gmra.mrb[0].mxu0 %v9175_v54 }
 0x4c9   : > { %v3787_v55 = vpop.f32.mrb[0].mxu1  ;;  %v4095_v28 = vpop.f32.mrb[0].mxu0 }
 0x4ca   : > { %v4981_v31 = vadd.f32 %v3787_v55, %v3421_v16  ;;  %v3789_v47 = vpop.f32.mrb[1].mxu1  ;;  %v4097_v5 = vpop.f32.mrb[1].mxu0 }
 0x4cb   : > { %v4983_v63 = vadd.f32 %v3789_v47, %v3422_v21 }
 0x4cc   : > { %v4982_v48 = vadd.f32 %v4981_v31, %v4095_v28 }
 0x4cd   : > { %v4984_v33 = vadd.f32 %v4983_v63, %v4097_v5 }
 0x4ce   : > { %v4100_v23 = vmax.f32 %v4982_v48, 0.0 }
 0x4cf   : > { %v4101_v51 = vmax.f32 %v4984_v33, 0.0 }
 0x4d0   : > { %v4102_v35 = vmin.f32 %v4100_v23, 6.0 }
 0x4d1   : > { %v4103_v60 = vmin.f32 %v4101_v51, 6.0 }
 0x4d2   : > { %4104 = vst [vmem:[%s5719_s25] sm:$0xff] %v4102_v35 }
 0x4d3   : > { %4105 = vst [vmem:[%s5719_s25 + $0x8] sm:$0xff] %v4103_v60 }
 0x4d4   : > { %5213 = shalt.err (!%p5210_p5)
}
 0x4d5   : > { %s5214_s2 = scalar_lea.hbm %s9275_s1, 256  ;;  %s5218_s25 = scalar_lea.hbm %s9325_s4, 512 }
 0x4d6   : > { %p5215_p10 = scmp.ne.s32.totalorder %s9275_s1, %s5214_s2  ;;  %p5219_p6 = scmp.lt.u32.totalorder %s9275_s1, %s9325_s4 }
 0x4d7   : > { %p5220_p12 = scmp.lt.u32.totalorder %s5218_s25, %s5214_s2  ;;  %p5222_p7 = scmp.lt.u32.totalorder %s5214_s2, %s9275_s1 }
 0x4d8   : > { %p5216_p3 = pnand %p5215_p10, %p10323_p4 }
 0x4d9   : > { %p5221_p2 = por %p5220_p12, %p5219_p6 }
 0x4da   : > { %p5217_p11 = pneg %p5216_p3 }
 0x4db   : > { %p5223_p8 = por %p5222_p7, %p5221_p2 }
 0x4dd   : > { %p5224_p13 = pnand %p5223_p8, %p5217_p11 }
 0x4df   : > { %5227 = shalt.err (!%p5224_p13)
}
 0x4e0   : > { %5012 = dma.vmem_to_hbm [thread:$0]  (%p10323_p4), %s9277_s29, 256, %s9275_s1, %s4107_s28  }
 0x4e1 PF: > { %s4133_s0 = sand.u32 1, %s5270_s15   ;;  %p10324_p0 = scmp.ne.s32.totalorder %s9730_s27, 0 }
 0x4e2   : > { %p10325_p9 = scmp.ge.s32.totalorder %s5282_s18, 2  ;;  %s4134_s13 = scalar_lea.sflag [#allocation5], %s4133_s0 }
 0x4e4   : > { %p5029_p1 = pnand %p10325_p9, %p10324_p0 }
 0x4e6   : > { %5265 = dma.done.wait (!%p5029_p1), %s4134_s13, 256  }
 0x4e7   : > { %5267 = vsyncadd (!%p5029_p1), %s4134_s13, 4294967040  ;;  %p23_p5 = scmp.ge.s32.totalorder %s5348_s21, 4   ;;  %s10326_s15 = smov %s5274_s16 }
 0x4e8   : > { %s10327_s16 = smov %s5278_s17  ;;  %s10328_s17 = smov %s5360_s24 }
 0x4e9   : > { %s10329_s18 = smov %s5348_s21  ;;  %25 = sbr.rel (!%p23_p5) target bundleno = 13 (0xd), region = 132 }
 0x4f0   :  { %4139 = vsyncpa [#allocation4], 1 }
 0x4f1   :  { %4141 = vsyncpa [#allocation4 + $0x1], 1 }
 0x4f2   :  { %4142 = vsyncpa [#allocation7], 1 }
 0x4f3   :  { %4144 = vsyncpa [#allocation7 + $0x1], 1 }
 0x4f4   :  { %4145 = vsyncpa [#allocation10], 1 }
 0x4f5   :  { %4147 = vsyncpa [#allocation10 + $0x1], 1 }
 0x4f6   :  { %4148 = vsyncpa [#allocation5], 1 }
 0x4f7   :  { %4150 = vsyncpa [#allocation5 + $0x1], 1 }

</bundles_post_ra>
